<compile_context>
chip_gen: v5e
topology: v5e:2x2
jax: 0.10.0
libtpu: 0.0.40
codegen_flags: <defaults>
</compile_context>

<pallas_src>
import functools

import jax
import jax.numpy as jnp
from jax.experimental import pallas as pl
from jax.experimental.pallas import tpu as pltpu

EPS = 1e-5


def _fused_conv_bn_kernel(
    x_ref,      # (N*H*W, C)    f32   valid pixels, NHWC-flattened, un-padded
    w1_ref,     # (9*C, C)      bf16  packed conv1 weights (kh, kw, cin) x cout
    w2_ref,     # (9*C, C)      bf16  packed conv2 weights
    bn_ref,     # (4, C)        f32   rows: gamma1, beta1, gamma2, beta2
    out_ref,    # (m_rows, C)   f32   padded-layout output (wrapper crops borders)
    ext_ref,    # (rows_ext, C) f32   VMEM scratch shared by both layers
    *, N, H, W, C, offs, pad_rows, inv_count,
):
    Hp, Wp = H + 2, W + 2
    m_rows = N * Hp * Wp

    # ---- validity mask, built in-kernel (no mask input / DMA) --------------------
    # Valid pixels occupy a static union of N*H contiguous row ranges of the padded
    # flat layout; pure iota + compares, no integer division.
    r = jax.lax.broadcasted_iota(jnp.int32, (m_rows, C), 0)
    valid = jnp.zeros((m_rows, C), jnp.bool_)
    for n in range(N):
        for h in range(H):
            s = n * Hp * Wp + (h + 1) * Wp + 1
            valid = valid | ((r >= s) & (r < s + W))
    mask = valid.astype(jnp.float32)                               # (M, C)

    def conv_bn(w_ref, gamma, beta):
        # In-VMEM im2col: 9 shifted row-windows of the padded scratch, cast to bf16
        # per-slice (patch slab materializes in bf16), one deep-K MXU matmul.
        cols = [ext_ref[pl.ds(o, m_rows), :].astype(jnp.bfloat16) for o in offs]
        patches = jnp.concatenate(cols, axis=1)                    # (M, 9*C) bf16
        acc = jnp.dot(patches, w_ref[...],
                      preferred_element_type=jnp.float32)          # (M, C) f32

        # Training-mode BatchNorm over valid pixels only (masked stats, biased var).
        mean = jnp.sum(acc * mask, axis=0, keepdims=True) * inv_count
        cen = (acc - mean) * mask
        var = jnp.sum(cen * cen, axis=0, keepdims=True) * inv_count
        scale = gamma * jax.lax.rsqrt(var + EPS)                   # (1, C)
        shift = beta - mean * scale
        return acc * scale + shift                                 # (M, C) f32

    g1 = bn_ref[pl.ds(0, 1), :]
    b1 = bn_ref[pl.ds(1, 1), :]
    g2 = bn_ref[pl.ds(2, 1), :]
    b2 = bn_ref[pl.ds(3, 1), :]

    # ---- build the padded layer-1 input in VMEM (both pads folded into kernel) ---
    # Zero fill covers the zero-extension strips AND the spatial 1-px border; then
    # copy the valid activation rows into the interior.
    ext_ref[...] = jnp.zeros_like(ext_ref)
    for n in range(N):
        for h in range(H):
            dst = pad_rows + n * Hp * Wp + (h + 1) * Wp + 1
            src = (n * H + h) * W
            ext_ref[pl.ds(dst, W), :] = x_ref[pl.ds(src, W), :]

    # ---- layer 1: conv1 + bn1 -----------------------------------------------------
    y1 = conv_bn(w1_ref, g1, b1)

    # Re-embed layer-1 output into the same padded scratch: only the interior is
    # rewritten (mask zeroes the border pixels, which act as conv2's zero padding);
    # the extension strips keep their initial zeros — no redundant re-zeroing.
    ext_ref[pl.ds(pad_rows, m_rows), :] = y1 * mask

    # ---- layer 2: conv2 + bn2 -----------------------------------------------------
    y2 = conv_bn(w2_ref, g2, b2)
    out_ref[...] = y2.astype(out_ref.dtype)


def pack_params(params):
    """One-time weight packing (hoisted out of the per-call path)."""
    c_out1, c_in = params["w1"].shape[:2]
    c_out2 = params["w2"].shape[0]
    assert c_in == c_out1 == c_out2, "kernel assumes a uniform channel width"
    w1p = jnp.transpose(params["w1"], (2, 3, 1, 0)).reshape(9 * c_in, c_out1)
    w2p = jnp.transpose(params["w2"], (2, 3, 1, 0)).reshape(9 * c_out1, c_out2)
    bn = jnp.stack([params["g1"], params["b1"], params["g2"], params["b2"]], axis=0)
    return {
        "w1p": w1p.astype(jnp.bfloat16),
        "w2p": w2p.astype(jnp.bfloat16),
        "bn": bn.astype(jnp.float32),
    }


def model_forward(x_nchw, packed):
    N, Cin, H, W = x_nchw.shape
    C = packed["bn"].shape[1]
    assert Cin == C
    assert packed["w1p"].shape == (9 * C, C) and packed["w2p"].shape == (9 * C, C)

    Hp, Wp = H + 2, W + 2
    m_rows = N * Hp * Wp
    # top/bottom zero-extension so every tap offset is an in-bounds row slice;
    # multiple of 8 keeps the interior writes sublane-aligned.
    pad_rows = -(-(Wp + 1) // 8) * 8
    rows_ext = m_rows + 2 * pad_rows
    offs = tuple(pad_rows + (dh - 1) * Wp + (dw - 1)
                 for dh in range(3) for dw in range(3))

    # Only wrapper-side prep: NCHW -> (N*H*W, C) with channels on the 128-lane axis.
    x_rows = jnp.transpose(x_nchw, (0, 2, 3, 1)).reshape(N * H * W, Cin)

    kernel = functools.partial(
        _fused_conv_bn_kernel,
        N=N, H=H, W=W, C=C, offs=offs, pad_rows=pad_rows,
        inv_count=1.0 / float(N * H * W))

    out_flat = pl.pallas_call(
        kernel,
        grid=(1,),
        in_specs=[
            pl.BlockSpec((N * H * W, Cin), lambda i: (0, 0)),
            pl.BlockSpec((9 * C, C), lambda i: (0, 0)),
            pl.BlockSpec((9 * C, C), lambda i: (0, 0)),
            pl.BlockSpec((4, C), lambda i: (0, 0)),
        ],
        out_specs=pl.BlockSpec((m_rows, C), lambda i: (0, 0)),
        out_shape=jax.ShapeDtypeStruct((m_rows, C), jnp.float32),
        scratch_shapes=[pltpu.VMEM((rows_ext, C), jnp.float32)],
        compiler_params=pltpu.CompilerParams(
            dimension_semantics=("arbitrary",)),
    )(x_rows, packed["w1p"], packed["w2p"], packed["bn"])

    out = out_flat.reshape(N, Hp, Wp, C)[:, 1:H + 1, 1:W + 1, :]
    return jnp.transpose(out, (0, 3, 1, 2))                       # back to NCHW


def reference_forward(x_nchw, params, matmul_dtype=jnp.float32):
    """Pure-JAX reference. matmul_dtype=bfloat16 matches the kernel's MXU precision."""

    def conv_bn(x, w, g, b):
        y = jax.lax.conv_general_dilated(
            x.astype(matmul_dtype), w.astype(matmul_dtype),
            window_strides=(1, 1), padding=((1, 1), (1, 1)),
            dimension_numbers=("NCHW", "OIHW", "NCHW"),
            preferred_element_type=jnp.float32)
        mean = y.mean(axis=(0, 2, 3), keepdims=True)
        var = jnp.mean((y - mean) ** 2, axis=(0, 2, 3), keepdims=True)  # biased (training BN)
        return (y - mean) * jax.lax.rsqrt(var + EPS) * g.reshape(1, -1, 1, 1) \
            + b.reshape(1, -1, 1, 1)

    y = conv_bn(x_nchw, params["w1"], params["g1"], params["b1"])
    return conv_bn(y, params["w2"], params["g2"], params["b2"])


def init_params(key, c=64):
    k1, k2, k3, k4, k5, k6 = jax.random.split(key, 6)
    fan_in = c * 3 * 3
    scale = 1.0 / jnp.sqrt(fan_in)
    return {
        "w1": jax.random.normal(k1, (c, c, 3, 3), jnp.float32) * scale,  # OIHW
        "g1": 1.0 + 0.1 * jax.random.normal(k2, (c,), jnp.float32),
        "b1": 0.1 * jax.random.normal(k3, (c,), jnp.float32),
        "w2": jax.random.normal(k4, (c, c, 3, 3), jnp.float32) * scale,  # OIHW
        "g2": 1.0 + 0.1 * jax.random.normal(k5, (c,), jnp.float32),
        "b2": 0.1 * jax.random.normal(k6, (c,), jnp.float32),
    }


if __name__ == "__main__":
    key = jax.random.PRNGKey(0)
    kx, kp = jax.random.split(key)

    # Matches the module's example input: (1, 64, 10, 10) NCHW
    x = jax.random.normal(kx, (1, 64, 10, 10), jnp.float32)
    params = init_params(kp, c=64)

    # One-time packing (constant at inference; outside the jitted per-call path).
    packed = jax.tree_util.tree_map(jax.block_until_ready, pack_params(params))

    fwd = jax.jit(model_forward)
    out = jax.block_until_ready(fwd(x, packed))
    assert out.shape == (1, 64, 10, 10)

    # Matched-precision reference (bf16 MXU operands, f32 accumulation/BN): tight check.
    ref_bf16 = jax.block_until_ready(
        reference_forward(x, params, matmul_dtype=jnp.bfloat16))
    assert jnp.allclose(out, ref_bf16, rtol=3e-3, atol=3e-3), (
        float(jnp.max(jnp.abs(out - ref_bf16))))

    # Full-f32 reference: loose check (bf16 operand rounding in the kernel's matmuls).
    ref_f32 = jax.block_until_ready(reference_forward(x, params))
    assert jnp.allclose(out, ref_f32, rtol=3e-2, atol=3e-2), (
        float(jnp.max(jnp.abs(out - ref_f32))))

    print("KERNEL_OK")
</pallas_src>

<mosaic_0001>
module attributes {stable_mosaic.version = 11 : i64} {
  func.func @_fused_conv_bn_kernel(%arg0: i32, %arg1: memref<100x64xf32, #tpu.memory_space<vmem>>, %arg2: memref<576x64xbf16, #tpu.memory_space<vmem>>, %arg3: memref<576x64xbf16, #tpu.memory_space<vmem>>, %arg4: memref<4x64xf32, #tpu.memory_space<vmem>>, %arg5: memref<144x64xf32, #tpu.memory_space<vmem>>, %arg6: memref<176x64xf32, #tpu.memory_space<vmem>>) attributes {dimension_semantics = [#tpu.dimension_semantics<arbitrary>], iteration_bounds = array<i64: 1>, scalar_prefetch = 0 : i64, scratch_operands = 1 : i64, tpu.core_type = #tpu.core_type<tc>, window_params = [{pipeline_mode = #tpu.pipeline_mode<synchronous>, transform_indices = @transform_0, window_bounds = array<i64: 100, 64>}, {pipeline_mode = #tpu.pipeline_mode<synchronous>, transform_indices = @transform_1, window_bounds = array<i64: 576, 64>}, {pipeline_mode = #tpu.pipeline_mode<synchronous>, transform_indices = @transform_2, window_bounds = array<i64: 576, 64>}, {pipeline_mode = #tpu.pipeline_mode<synchronous>, transform_indices = @transform_3, window_bounds = array<i64: 4, 64>}, {pipeline_mode = #tpu.pipeline_mode<synchronous>, transform_indices = @transform_4, window_bounds = array<i64: 144, 64>}]} {
    %0 = tpu.iota {dimensions = array<i32: 0>} : vector<144x64xi32>
    %false = arith.constant false
    %1 = vector.broadcast %false : i1 to vector<144x64xi1>
    %c13_i32 = arith.constant 13 : i32
    %2 = vector.broadcast %c13_i32 : i32 to vector<144x64xi32>
    %3 = arith.cmpi sge, %0, %2 : vector<144x64xi32>
    %c23_i32 = arith.constant 23 : i32
    %4 = vector.broadcast %c23_i32 : i32 to vector<144x64xi32>
    %5 = arith.cmpi slt, %0, %4 : vector<144x64xi32>
    %6 = arith.andi %3, %5 : vector<144x64xi1>
    %7 = arith.ori %1, %6 : vector<144x64xi1>
    %c25_i32 = arith.constant 25 : i32
    %8 = vector.broadcast %c25_i32 : i32 to vector<144x64xi32>
    %9 = arith.cmpi sge, %0, %8 : vector<144x64xi32>
    %c35_i32 = arith.constant 35 : i32
    %10 = vector.broadcast %c35_i32 : i32 to vector<144x64xi32>
    %11 = arith.cmpi slt, %0, %10 : vector<144x64xi32>
    %12 = arith.andi %9, %11 : vector<144x64xi1>
    %13 = arith.ori %7, %12 : vector<144x64xi1>
    %c37_i32 = arith.constant 37 : i32
    %14 = vector.broadcast %c37_i32 : i32 to vector<144x64xi32>
    %15 = arith.cmpi sge, %0, %14 : vector<144x64xi32>
    %c47_i32 = arith.constant 47 : i32
    %16 = vector.broadcast %c47_i32 : i32 to vector<144x64xi32>
    %17 = arith.cmpi slt, %0, %16 : vector<144x64xi32>
    %18 = arith.andi %15, %17 : vector<144x64xi1>
    %19 = arith.ori %13, %18 : vector<144x64xi1>
    %c49_i32 = arith.constant 49 : i32
    %20 = vector.broadcast %c49_i32 : i32 to vector<144x64xi32>
    %21 = arith.cmpi sge, %0, %20 : vector<144x64xi32>
    %c59_i32 = arith.constant 59 : i32
    %22 = vector.broadcast %c59_i32 : i32 to vector<144x64xi32>
    %23 = arith.cmpi slt, %0, %22 : vector<144x64xi32>
    %24 = arith.andi %21, %23 : vector<144x64xi1>
    %25 = arith.ori %19, %24 : vector<144x64xi1>
    %c61_i32 = arith.constant 61 : i32
    %26 = vector.broadcast %c61_i32 : i32 to vector<144x64xi32>
    %27 = arith.cmpi sge, %0, %26 : vector<144x64xi32>
    %c71_i32 = arith.constant 71 : i32
    %28 = vector.broadcast %c71_i32 : i32 to vector<144x64xi32>
    %29 = arith.cmpi slt, %0, %28 : vector<144x64xi32>
    %30 = arith.andi %27, %29 : vector<144x64xi1>
    %31 = arith.ori %25, %30 : vector<144x64xi1>
    %c73_i32 = arith.constant 73 : i32
    %32 = vector.broadcast %c73_i32 : i32 to vector<144x64xi32>
    %33 = arith.cmpi sge, %0, %32 : vector<144x64xi32>
    %c83_i32 = arith.constant 83 : i32
    %34 = vector.broadcast %c83_i32 : i32 to vector<144x64xi32>
    %35 = arith.cmpi slt, %0, %34 : vector<144x64xi32>
    %36 = arith.andi %33, %35 : vector<144x64xi1>
    %37 = arith.ori %31, %36 : vector<144x64xi1>
    %c85_i32 = arith.constant 85 : i32
    %38 = vector.broadcast %c85_i32 : i32 to vector<144x64xi32>
    %39 = arith.cmpi sge, %0, %38 : vector<144x64xi32>
    %c95_i32 = arith.constant 95 : i32
    %40 = vector.broadcast %c95_i32 : i32 to vector<144x64xi32>
    %41 = arith.cmpi slt, %0, %40 : vector<144x64xi32>
    %42 = arith.andi %39, %41 : vector<144x64xi1>
    %43 = arith.ori %37, %42 : vector<144x64xi1>
    %c97_i32 = arith.constant 97 : i32
    %44 = vector.broadcast %c97_i32 : i32 to vector<144x64xi32>
    %45 = arith.cmpi sge, %0, %44 : vector<144x64xi32>
    %c107_i32 = arith.constant 107 : i32
    %46 = vector.broadcast %c107_i32 : i32 to vector<144x64xi32>
    %47 = arith.cmpi slt, %0, %46 : vector<144x64xi32>
    %48 = arith.andi %45, %47 : vector<144x64xi1>
    %49 = arith.ori %43, %48 : vector<144x64xi1>
    %c109_i32 = arith.constant 109 : i32
    %50 = vector.broadcast %c109_i32 : i32 to vector<144x64xi32>
    %51 = arith.cmpi sge, %0, %50 : vector<144x64xi32>
    %c119_i32 = arith.constant 119 : i32
    %52 = vector.broadcast %c119_i32 : i32 to vector<144x64xi32>
    %53 = arith.cmpi slt, %0, %52 : vector<144x64xi32>
    %54 = arith.andi %51, %53 : vector<144x64xi1>
    %55 = arith.ori %49, %54 : vector<144x64xi1>
    %c121_i32 = arith.constant 121 : i32
    %56 = vector.broadcast %c121_i32 : i32 to vector<144x64xi32>
    %57 = arith.cmpi sge, %0, %56 : vector<144x64xi32>
    %c131_i32 = arith.constant 131 : i32
    %58 = vector.broadcast %c131_i32 : i32 to vector<144x64xi32>
    %59 = arith.cmpi slt, %0, %58 : vector<144x64xi32>
    %60 = arith.andi %57, %59 : vector<144x64xi1>
    %61 = arith.ori %55, %60 : vector<144x64xi1>
    %62 = arith.extui %61 : vector<144x64xi1> to vector<144x64xi32>
    %63 = arith.sitofp %62 : vector<144x64xi32> to vector<144x64xf32>
    %c0 = arith.constant 0 : index
    %c0_0 = arith.constant 0 : index
    %64 = vector.load %arg4[%c0, %c0_0] : memref<4x64xf32, #tpu.memory_space<vmem>>, vector<1x64xf32>
    %c1 = arith.constant 1 : index
    %c0_1 = arith.constant 0 : index
    %65 = vector.load %arg4[%c1, %c0_1] : memref<4x64xf32, #tpu.memory_space<vmem>>, vector<1x64xf32>
    %c2 = arith.constant 2 : index
    %c0_2 = arith.constant 0 : index
    %66 = vector.load %arg4[%c2, %c0_2] : memref<4x64xf32, #tpu.memory_space<vmem>>, vector<1x64xf32>
    %c3 = arith.constant 3 : index
    %c0_3 = arith.constant 0 : index
    %67 = vector.load %arg4[%c3, %c0_3] : memref<4x64xf32, #tpu.memory_space<vmem>>, vector<1x64xf32>
    %cst = arith.constant 0.000000e+00 : f32
    %68 = vector.broadcast %cst : f32 to vector<176x64xf32>
    %c0_4 = arith.constant 0 : index
    %c0_5 = arith.constant 0 : index
    %69 = vector.load %arg6[%c0_4, %c0_5] : memref<176x64xf32, #tpu.memory_space<vmem>>, vector<176x64xf32>
    tpu.vector_store %arg6[%c0_4, %c0_5], %68 {strides = array<i32>} : memref<176x64xf32, #tpu.memory_space<vmem>>, vector<176x64xf32>,
    %c0_6 = arith.constant 0 : index
    %c0_7 = arith.constant 0 : index
    %70 = vector.load %arg1[%c0_6, %c0_7] : memref<100x64xf32, #tpu.memory_space<vmem>>, vector<10x64xf32>
    %c29 = arith.constant 29 : index
    %c0_8 = arith.constant 0 : index
    %71 = vector.load %arg6[%c29, %c0_8] : memref<176x64xf32, #tpu.memory_space<vmem>>, vector<10x64xf32>
    tpu.vector_store %arg6[%c29, %c0_8], %70 {strides = array<i32>} : memref<176x64xf32, #tpu.memory_space<vmem>>, vector<10x64xf32>,
    %c10 = arith.constant 10 : index
    %c0_9 = arith.constant 0 : index
    %72 = vector.load %arg1[%c10, %c0_9] : memref<100x64xf32, #tpu.memory_space<vmem>>, vector<10x64xf32>
    %c41 = arith.constant 41 : index
    %c0_10 = arith.constant 0 : index
    %73 = vector.load %arg6[%c41, %c0_10] : memref<176x64xf32, #tpu.memory_space<vmem>>, vector<10x64xf32>
    tpu.vector_store %arg6[%c41, %c0_10], %72 {strides = array<i32>} : memref<176x64xf32, #tpu.memory_space<vmem>>, vector<10x64xf32>,
    %c20 = arith.constant 20 : index
    %c0_11 = arith.constant 0 : index
    %74 = vector.load %arg1[%c20, %c0_11] : memref<100x64xf32, #tpu.memory_space<vmem>>, vector<10x64xf32>
    %c53 = arith.constant 53 : index
    %c0_12 = arith.constant 0 : index
    %75 = vector.load %arg6[%c53, %c0_12] : memref<176x64xf32, #tpu.memory_space<vmem>>, vector<10x64xf32>
    tpu.vector_store %arg6[%c53, %c0_12], %74 {strides = array<i32>} : memref<176x64xf32, #tpu.memory_space<vmem>>, vector<10x64xf32>,
    %c30 = arith.constant 30 : index
    %c0_13 = arith.constant 0 : index
    %76 = vector.load %arg1[%c30, %c0_13] : memref<100x64xf32, #tpu.memory_space<vmem>>, vector<10x64xf32>
    %c65 = arith.constant 65 : index
    %c0_14 = arith.constant 0 : index
    %77 = vector.load %arg6[%c65, %c0_14] : memref<176x64xf32, #tpu.memory_space<vmem>>, vector<10x64xf32>
    tpu.vector_store %arg6[%c65, %c0_14], %76 {strides = array<i32>} : memref<176x64xf32, #tpu.memory_space<vmem>>, vector<10x64xf32>,
    %c40 = arith.constant 40 : index
    %c0_15 = arith.constant 0 : index
    %78 = vector.load %arg1[%c40, %c0_15] : memref<100x64xf32, #tpu.memory_space<vmem>>, vector<10x64xf32>
    %c77 = arith.constant 77 : index
    %c0_16 = arith.constant 0 : index
    %79 = vector.load %arg6[%c77, %c0_16] : memref<176x64xf32, #tpu.memory_space<vmem>>, vector<10x64xf32>
    tpu.vector_store %arg6[%c77, %c0_16], %78 {strides = array<i32>} : memref<176x64xf32, #tpu.memory_space<vmem>>, vector<10x64xf32>,
    %c50 = arith.constant 50 : index
    %c0_17 = arith.constant 0 : index
    %80 = vector.load %arg1[%c50, %c0_17] : memref<100x64xf32, #tpu.memory_space<vmem>>, vector<10x64xf32>
    %c89 = arith.constant 89 : index
    %c0_18 = arith.constant 0 : index
    %81 = vector.load %arg6[%c89, %c0_18] : memref<176x64xf32, #tpu.memory_space<vmem>>, vector<10x64xf32>
    tpu.vector_store %arg6[%c89, %c0_18], %80 {strides = array<i32>} : memref<176x64xf32, #tpu.memory_space<vmem>>, vector<10x64xf32>,
    %c60 = arith.constant 60 : index
    %c0_19 = arith.constant 0 : index
    %82 = vector.load %arg1[%c60, %c0_19] : memref<100x64xf32, #tpu.memory_space<vmem>>, vector<10x64xf32>
    %c101 = arith.constant 101 : index
    %c0_20 = arith.constant 0 : index
    %83 = vector.load %arg6[%c101, %c0_20] : memref<176x64xf32, #tpu.memory_space<vmem>>, vector<10x64xf32>
    tpu.vector_store %arg6[%c101, %c0_20], %82 {strides = array<i32>} : memref<176x64xf32, #tpu.memory_space<vmem>>, vector<10x64xf32>,
    %c70 = arith.constant 70 : index
    %c0_21 = arith.constant 0 : index
    %84 = vector.load %arg1[%c70, %c0_21] : memref<100x64xf32, #tpu.memory_space<vmem>>, vector<10x64xf32>
    %c113 = arith.constant 113 : index
    %c0_22 = arith.constant 0 : index
    %85 = vector.load %arg6[%c113, %c0_22] : memref<176x64xf32, #tpu.memory_space<vmem>>, vector<10x64xf32>
    tpu.vector_store %arg6[%c113, %c0_22], %84 {strides = array<i32>} : memref<176x64xf32, #tpu.memory_space<vmem>>, vector<10x64xf32>,
    %c80 = arith.constant 80 : index
    %c0_23 = arith.constant 0 : index
    %86 = vector.load %arg1[%c80, %c0_23] : memref<100x64xf32, #tpu.memory_space<vmem>>, vector<10x64xf32>
    %c125 = arith.constant 125 : index
    %c0_24 = arith.constant 0 : index
    %87 = vector.load %arg6[%c125, %c0_24] : memref<176x64xf32, #tpu.memory_space<vmem>>, vector<10x64xf32>
    tpu.vector_store %arg6[%c125, %c0_24], %86 {strides = array<i32>} : memref<176x64xf32, #tpu.memory_space<vmem>>, vector<10x64xf32>,
    %c90 = arith.constant 90 : index
    %c0_25 = arith.constant 0 : index
    %88 = vector.load %arg1[%c90, %c0_25] : memref<100x64xf32, #tpu.memory_space<vmem>>, vector<10x64xf32>
    %c137 = arith.constant 137 : index
    %c0_26 = arith.constant 0 : index
    %89 = vector.load %arg6[%c137, %c0_26] : memref<176x64xf32, #tpu.memory_space<vmem>>, vector<10x64xf32>
    tpu.vector_store %arg6[%c137, %c0_26], %88 {strides = array<i32>} : memref<176x64xf32, #tpu.memory_space<vmem>>, vector<10x64xf32>,
    %c3_27 = arith.constant 3 : index
    %c0_28 = arith.constant 0 : index
    %90 = vector.load %arg6[%c3_27, %c0_28] : memref<176x64xf32, #tpu.memory_space<vmem>>, vector<144x64xf32>
    %91 = arith.truncf %90 : vector<144x64xf32> to vector<144x64xbf16>
    %c4 = arith.constant 4 : index
    %c0_29 = arith.constant 0 : index
    %92 = vector.load %arg6[%c4, %c0_29] : memref<176x64xf32, #tpu.memory_space<vmem>>, vector<144x64xf32>
    %93 = arith.truncf %92 : vector<144x64xf32> to vector<144x64xbf16>
    %c5 = arith.constant 5 : index
    %c0_30 = arith.constant 0 : index
    %94 = vector.load %arg6[%c5, %c0_30] : memref<176x64xf32, #tpu.memory_space<vmem>>, vector<144x64xf32>
    %95 = arith.truncf %94 : vector<144x64xf32> to vector<144x64xbf16>
    %c15 = arith.constant 15 : index
    %c0_31 = arith.constant 0 : index
    %96 = vector.load %arg6[%c15, %c0_31] : memref<176x64xf32, #tpu.memory_space<vmem>>, vector<144x64xf32>
    %97 = arith.truncf %96 : vector<144x64xf32> to vector<144x64xbf16>
    %c16 = arith.constant 16 : index
    %c0_32 = arith.constant 0 : index
    %98 = vector.load %arg6[%c16, %c0_32] : memref<176x64xf32, #tpu.memory_space<vmem>>, vector<144x64xf32>
    %99 = arith.truncf %98 : vector<144x64xf32> to vector<144x64xbf16>
    %c17 = arith.constant 17 : index
    %c0_33 = arith.constant 0 : index
    %100 = vector.load %arg6[%c17, %c0_33] : memref<176x64xf32, #tpu.memory_space<vmem>>, vector<144x64xf32>
    %101 = arith.truncf %100 : vector<144x64xf32> to vector<144x64xbf16>
    %c27 = arith.constant 27 : index
    %c0_34 = arith.constant 0 : index
    %102 = vector.load %arg6[%c27, %c0_34] : memref<176x64xf32, #tpu.memory_space<vmem>>, vector<144x64xf32>
    %103 = arith.truncf %102 : vector<144x64xf32> to vector<144x64xbf16>
    %c28 = arith.constant 28 : index
    %c0_35 = arith.constant 0 : index
    %104 = vector.load %arg6[%c28, %c0_35] : memref<176x64xf32, #tpu.memory_space<vmem>>, vector<144x64xf32>
    %105 = arith.truncf %104 : vector<144x64xf32> to vector<144x64xbf16>
    %c29_36 = arith.constant 29 : index
    %c0_37 = arith.constant 0 : index
    %106 = vector.load %arg6[%c29_36, %c0_37] : memref<176x64xf32, #tpu.memory_space<vmem>>, vector<144x64xf32>
    %107 = arith.truncf %106 : vector<144x64xf32> to vector<144x64xbf16>
    %108 = tpu.concatenate %91, %93, %95, %97, %99, %101, %103, %105, %107 in 1 : vector<144x64xbf16>, vector<144x64xbf16>, vector<144x64xbf16>, vector<144x64xbf16>, vector<144x64xbf16>, vector<144x64xbf16>, vector<144x64xbf16>, vector<144x64xbf16>, vector<144x64xbf16> -> vector<144x576xbf16>
    %c0_38 = arith.constant 0 : index
    %c0_39 = arith.constant 0 : index
    %109 = vector.load %arg2[%c0_38, %c0_39] : memref<576x64xbf16, #tpu.memory_space<vmem>>, vector<576x64xbf16>
    %cst_40 = arith.constant dense<0.000000e+00> : vector<144x64xf32>
    %110 = tpu.matmul %108, %109, %cst_40 {dimension_numbers = #tpu.dot_dimension_numbers<[1], [0], [0], [1], [0, 0, 1, 1], [], []>} : vector<144x576xbf16>, vector<576x64xbf16>, vector<144x64xf32> -> vector<144x64xf32>
    %111 = arith.mulf %110, %63 : vector<144x64xf32>
    %cst_41 = arith.constant dense<0.000000e+00> : vector<64xf32>
    %112 = vector.multi_reduction <add>, %111, %cst_41 [0] : vector<144x64xf32> to vector<64xf32>
    %113 = vector.shape_cast %112 : vector<64xf32> to vector<1x64xf32>
    %cst_42 = arith.constant 0.00999999977 : f32
    %114 = vector.broadcast %cst_42 : f32 to vector<1x64xf32>
    %115 = arith.mulf %113, %114 : vector<1x64xf32>
    %116 = vector.broadcast %115 : vector<1x64xf32> to vector<144x64xf32>
    %117 = arith.subf %110, %116 : vector<144x64xf32>
    %118 = arith.mulf %117, %63 : vector<144x64xf32>
    %119 = arith.mulf %118, %118 : vector<144x64xf32>
    %cst_43 = arith.constant dense<0.000000e+00> : vector<64xf32>
    %120 = vector.multi_reduction <add>, %119, %cst_43 [0] : vector<144x64xf32> to vector<64xf32>
    %121 = vector.shape_cast %120 : vector<64xf32> to vector<1x64xf32>
    %cst_44 = arith.constant 0.00999999977 : f32
    %122 = vector.broadcast %cst_44 : f32 to vector<1x64xf32>
    %123 = arith.mulf %121, %122 : vector<1x64xf32>
    %cst_45 = arith.constant 9.99999974E-6 : f32
    %124 = vector.broadcast %cst_45 : f32 to vector<1x64xf32>
    %125 = arith.addf %123, %124 : vector<1x64xf32>
    %126 = math.rsqrt %125 : vector<1x64xf32>
    %127 = arith.mulf %64, %126 : vector<1x64xf32>
    %128 = arith.mulf %115, %127 : vector<1x64xf32>
    %129 = arith.subf %65, %128 : vector<1x64xf32>
    %130 = vector.broadcast %127 : vector<1x64xf32> to vector<144x64xf32>
    %131 = arith.mulf %110, %130 : vector<144x64xf32>
    %132 = vector.broadcast %129 : vector<1x64xf32> to vector<144x64xf32>
    %133 = arith.addf %131, %132 : vector<144x64xf32>
    %134 = arith.mulf %133, %63 : vector<144x64xf32>
    %c16_46 = arith.constant 16 : index
    %c0_47 = arith.constant 0 : index
    %135 = vector.load %arg6[%c16_46, %c0_47] : memref<176x64xf32, #tpu.memory_space<vmem>>, vector<144x64xf32>
    tpu.vector_store %arg6[%c16_46, %c0_47], %134 {strides = array<i32>} : memref<176x64xf32, #tpu.memory_space<vmem>>, vector<144x64xf32>,
    %c3_48 = arith.constant 3 : index
    %c0_49 = arith.constant 0 : index
    %136 = vector.load %arg6[%c3_48, %c0_49] : memref<176x64xf32, #tpu.memory_space<vmem>>, vector<144x64xf32>
    %137 = arith.truncf %136 : vector<144x64xf32> to vector<144x64xbf16>
    %c4_50 = arith.constant 4 : index
    %c0_51 = arith.constant 0 : index
    %138 = vector.load %arg6[%c4_50, %c0_51] : memref<176x64xf32, #tpu.memory_space<vmem>>, vector<144x64xf32>
    %139 = arith.truncf %138 : vector<144x64xf32> to vector<144x64xbf16>
    %c5_52 = arith.constant 5 : index
    %c0_53 = arith.constant 0 : index
    %140 = vector.load %arg6[%c5_52, %c0_53] : memref<176x64xf32, #tpu.memory_space<vmem>>, vector<144x64xf32>
    %141 = arith.truncf %140 : vector<144x64xf32> to vector<144x64xbf16>
    %c15_54 = arith.constant 15 : index
    %c0_55 = arith.constant 0 : index
    %142 = vector.load %arg6[%c15_54, %c0_55] : memref<176x64xf32, #tpu.memory_space<vmem>>, vector<144x64xf32>
    %143 = arith.truncf %142 : vector<144x64xf32> to vector<144x64xbf16>
    %c16_56 = arith.constant 16 : index
    %c0_57 = arith.constant 0 : index
    %144 = vector.load %arg6[%c16_56, %c0_57] : memref<176x64xf32, #tpu.memory_space<vmem>>, vector<144x64xf32>
    %145 = arith.truncf %144 : vector<144x64xf32> to vector<144x64xbf16>
    %c17_58 = arith.constant 17 : index
    %c0_59 = arith.constant 0 : index
    %146 = vector.load %arg6[%c17_58, %c0_59] : memref<176x64xf32, #tpu.memory_space<vmem>>, vector<144x64xf32>
    %147 = arith.truncf %146 : vector<144x64xf32> to vector<144x64xbf16>
    %c27_60 = arith.constant 27 : index
    %c0_61 = arith.constant 0 : index
    %148 = vector.load %arg6[%c27_60, %c0_61] : memref<176x64xf32, #tpu.memory_space<vmem>>, vector<144x64xf32>
    %149 = arith.truncf %148 : vector<144x64xf32> to vector<144x64xbf16>
    %c28_62 = arith.constant 28 : index
    %c0_63 = arith.constant 0 : index
    %150 = vector.load %arg6[%c28_62, %c0_63] : memref<176x64xf32, #tpu.memory_space<vmem>>, vector<144x64xf32>
    %151 = arith.truncf %150 : vector<144x64xf32> to vector<144x64xbf16>
    %c29_64 = arith.constant 29 : index
    %c0_65 = arith.constant 0 : index
    %152 = vector.load %arg6[%c29_64, %c0_65] : memref<176x64xf32, #tpu.memory_space<vmem>>, vector<144x64xf32>
    %153 = arith.truncf %152 : vector<144x64xf32> to vector<144x64xbf16>
    %154 = tpu.concatenate %137, %139, %141, %143, %145, %147, %149, %151, %153 in 1 : vector<144x64xbf16>, vector<144x64xbf16>, vector<144x64xbf16>, vector<144x64xbf16>, vector<144x64xbf16>, vector<144x64xbf16>, vector<144x64xbf16>, vector<144x64xbf16>, vector<144x64xbf16> -> vector<144x576xbf16>
    %c0_66 = arith.constant 0 : index
    %c0_67 = arith.constant 0 : index
    %155 = vector.load %arg3[%c0_66, %c0_67] : memref<576x64xbf16, #tpu.memory_space<vmem>>, vector<576x64xbf16>
    %cst_68 = arith.constant dense<0.000000e+00> : vector<144x64xf32>
    %156 = tpu.matmul %154, %155, %cst_68 {dimension_numbers = #tpu.dot_dimension_numbers<[1], [0], [0], [1], [0, 0, 1, 1], [], []>} : vector<144x576xbf16>, vector<576x64xbf16>, vector<144x64xf32> -> vector<144x64xf32>
    %157 = arith.mulf %156, %63 : vector<144x64xf32>
    %cst_69 = arith.constant dense<0.000000e+00> : vector<64xf32>
    %158 = vector.multi_reduction <add>, %157, %cst_69 [0] : vector<144x64xf32> to vector<64xf32>
    %159 = vector.shape_cast %158 : vector<64xf32> to vector<1x64xf32>
    %cst_70 = arith.constant 0.00999999977 : f32
    %160 = vector.broadcast %cst_70 : f32 to vector<1x64xf32>
    %161 = arith.mulf %159, %160 : vector<1x64xf32>
    %162 = vector.broadcast %161 : vector<1x64xf32> to vector<144x64xf32>
    %163 = arith.subf %156, %162 : vector<144x64xf32>
    %164 = arith.mulf %163, %63 : vector<144x64xf32>
    %165 = arith.mulf %164, %164 : vector<144x64xf32>
    %cst_71 = arith.constant dense<0.000000e+00> : vector<64xf32>
    %166 = vector.multi_reduction <add>, %165, %cst_71 [0] : vector<144x64xf32> to vector<64xf32>
    %167 = vector.shape_cast %166 : vector<64xf32> to vector<1x64xf32>
    %cst_72 = arith.constant 0.00999999977 : f32
    %168 = vector.broadcast %cst_72 : f32 to vector<1x64xf32>
    %169 = arith.mulf %167, %168 : vector<1x64xf32>
    %cst_73 = arith.constant 9.99999974E-6 : f32
    %170 = vector.broadcast %cst_73 : f32 to vector<1x64xf32>
    %171 = arith.addf %169, %170 : vector<1x64xf32>
    %172 = math.rsqrt %171 : vector<1x64xf32>
    %173 = arith.mulf %66, %172 : vector<1x64xf32>
    %174 = arith.mulf %161, %173 : vector<1x64xf32>
    %175 = arith.subf %67, %174 : vector<1x64xf32>
    %176 = vector.broadcast %173 : vector<1x64xf32> to vector<144x64xf32>
    %177 = arith.mulf %156, %176 : vector<144x64xf32>
    %178 = vector.broadcast %175 : vector<1x64xf32> to vector<144x64xf32>
    %179 = arith.addf %177, %178 : vector<144x64xf32>
    %c0_74 = arith.constant 0 : index
    %c0_75 = arith.constant 0 : index
    %180 = vector.load %arg5[%c0_74, %c0_75] : memref<144x64xf32, #tpu.memory_space<vmem>>, vector<144x64xf32>
    tpu.vector_store %arg5[%c0_74, %c0_75], %179 {strides = array<i32>} : memref<144x64xf32, #tpu.memory_space<vmem>>, vector<144x64xf32>,
    return
  }
  func.func @transform_0(%arg0: i32) -> (i32, i32) {
    %c0_i32 = arith.constant 0 : i32
    %c0_i32_0 = arith.constant 0 : i32
    %c0_i32_1 = arith.constant 0 : i32
    return %c0_i32, %c0_i32_0 : i32, i32
  }
  func.func @transform_1(%arg0: i32) -> (i32, i32) {
    %c0_i32 = arith.constant 0 : i32
    %c0_i32_0 = arith.constant 0 : i32
    %c0_i32_1 = arith.constant 0 : i32
    return %c0_i32, %c0_i32_0 : i32, i32
  }
  func.func @transform_2(%arg0: i32) -> (i32, i32) {
    %c0_i32 = arith.constant 0 : i32
    %c0_i32_0 = arith.constant 0 : i32
    %c0_i32_1 = arith.constant 0 : i32
    return %c0_i32, %c0_i32_0 : i32, i32
  }
  func.func @transform_3(%arg0: i32) -> (i32, i32) {
    %c0_i32 = arith.constant 0 : i32
    %c0_i32_0 = arith.constant 0 : i32
    %c0_i32_1 = arith.constant 0 : i32
    return %c0_i32, %c0_i32_0 : i32, i32
  }
  func.func @transform_4(%arg0: i32) -> (i32, i32) {
    %c0_i32 = arith.constant 0 : i32
    %c0_i32_0 = arith.constant 0 : i32
    %c0_i32_1 = arith.constant 0 : i32
    return %c0_i32, %c0_i32_0 : i32, i32
  }
}

</mosaic_0001>

<bundles_post_ra>
// kernel: model_forward.1
= control target key start
LH: loop header
LB: loop body
LE: loop exit
PB: predicated region body
PF: predicated region fallthrough
CT: control target
= control target key end

     0   :  { %vm779_vm0 = vcmask 523264   ;;  %v4433_v0 = vmov 0.0   ;;  %s4434_s15 = smov 64   ;;  %vm805_vm1 = vcmask 517120   ;;  %s6065_s0 = inlined_call_operand.vmem [shape: f32[100,64], index: 0, kind: input, shape index: {}]   ;;  %s6066_s1 = inlined_call_operand.vmem [shape: bf16[576,64], index: 1, kind: input, shape index: {}]   ;;  %s6067_s3 = inlined_call_operand.vmem [shape: f32[4,64], index: 3, kind: input, shape index: {}]   ;;  %s6068_s2 = inlined_call_operand.vmem [shape: bf16[576,64], index: 2, kind: input, shape index: {}]   ;;  %s6069_s4 = inlined_call_operand.vmem [shape: f32[144,64], index: 4, kind: output, shape index: {}]  }
   0x1   :  { %780 = vst.msk [vmem:[#allocation2] sm:$0xff] %vm779_vm0, %v4433_v0  ;;  %v823_v8 = vld [vmem:[%s6065_s0 + $0x32] sm:$0xff]  ;;  %v824_v9 = vld [vmem:[%s6065_s0 + $0x3a] sm:$0x3]  ;;  %v827_v10 = vld [vmem:[%s6065_s0 + $0x3c] sm:$0xff] }
   0x2   :  { %781 = vst.msk [vmem:[#allocation2 + $0x8] sm:$0xff] %vm779_vm0, %v4433_v0  ;;  %v828_v11 = vld [vmem:[%s6065_s0 + $0x44] sm:$0x3]  ;;  %v819_v12 = vld [vmem:[%s6065_s0 + $0x28] sm:$0xff]  ;;  %v820_v13 = vld [vmem:[%s6065_s0 + $0x30] sm:$0x3] }
   0x3   :  { %782 = vst.msk [vmem:[#allocation2 + $0x10] sm:$0xff] %vm779_vm0, %v4433_v0  ;;  %v802_v14 = vld [vmem:[%s6065_s0] sm:$0xff]  ;;  %v803_v15 = vld [vmem:[%s6065_s0 + $0x8] sm:$0x3]  ;;  %v807_v16 = vld [vmem:[%s6065_s0 + $0xa] sm:$0xff] }
   0x4   :  { %783 = vst.msk [vmem:[#allocation2 + $0x18] sm:$0xff] %vm779_vm0, %v4433_v0  ;;  %v808_v17 = vld [vmem:[%s6065_s0 + $0x12] sm:$0x3]  ;;  %v811_v18 = vld [vmem:[%s6065_s0 + $0x14] sm:$0xff]  ;;  %v812_v20 = vld [vmem:[%s6065_s0 + $0x1c] sm:$0x3] }
   0x5   :  { %784 = vst.msk [vmem:[#allocation2 + $0x20] sm:$0xff] %vm779_vm0, %v4433_v0  ;;  %v815_v23 = vld [vmem:[%s6065_s0 + $0x1e] sm:$0xff]  ;;  %v816_v27 = vld [vmem:[%s6065_s0 + $0x26] sm:$0x3]  ;;  %v832_v32 = vld [vmem:[%s6065_s0 + $0x4e] sm:$0x3] }
   0x6   :  { %785 = vst.msk [vmem:[#allocation2 + $0x28] sm:$0xff] %vm779_vm0, %v4433_v0  ;;  %v831_v29 = vld [vmem:[%s6065_s0 + $0x46] sm:$0xff]  ;;  %v835_v38 = vld [vmem:[%s6065_s0 + $0x50] sm:$0xff] }
   0x7   :  { %786 = vst.msk [vmem:[#allocation2 + $0x30] sm:$0xff] %vm779_vm0, %v4433_v0 }
   0x8   :  { %787 = vst.msk [vmem:[#allocation2 + $0x38] sm:$0xff] %vm779_vm0, %v4433_v0 }
   0x9   :  { %v879_v1 = vld [vmem:[#allocation2 + $0x4] sm:$0xff]  ;;  %788 = vst.msk [vmem:[#allocation2 + $0x40] sm:$0xff] %vm779_vm0, %v4433_v0 }
   0xa   :  { %v880_v2 = vld [vmem:[#allocation2 + $0xc] sm:$0xff]  ;;  %v897_v3 = vpack.c.bf16 %v879_v1, %v879_v1  ;;  %789 = vst.msk [vmem:[#allocation2 + $0x48] sm:$0xff] %vm779_vm0, %v4433_v0 }
   0xb   :  { %v898_v4 = vpack.c.bf16 %v880_v2, %v880_v2  ;;  %790 = vst.msk [vmem:[#allocation2 + $0x50] sm:$0xff] %vm779_vm0, %v4433_v0  ;;  %v881_v26 = vld [vmem:[#allocation2 + $0x14] sm:$0xff] }
   0xc   :  { %v1140_v5 = vunpack.c.l.b16 %v897_v3  ;;  %791 = vst.msk [vmem:[#allocation2 + $0x58] sm:$0xff] %vm779_vm0, %v4433_v0  ;;  %v899_v37 = vpack.c.bf16 %v881_v26, %v881_v26 }
   0xd   :  { %v1141_v6 = vunpack.c.l.b16 %v898_v4  ;;  %792 = vst.msk [vmem:[#allocation2 + $0x60] sm:$0xff] %vm779_vm0, %v4433_v0 }
   0xe   :  { %793 = vst.msk [vmem:[#allocation2 + $0x68] sm:$0xff] %vm779_vm0, %v4433_v0  ;;  %v1142_v48 = vunpack.c.l.b16 %v899_v37 }
   0xf   :  { %v1158_v7 = vpack.c.b16 %v1141_v6, %v1140_v5  ;;  %794 = vst.msk [vmem:[#allocation2 + $0x70] sm:$0xff] %vm779_vm0, %v4433_v0 }
  0x10   :  { %795 = vst.msk [vmem:[#allocation2 + $0x78] sm:$0xff] %vm779_vm0, %v4433_v0 }
  0x11   :  { %1167 = vrot.lane.b32.xlu0 %v1158_v7, %s4434_s15  ;;  %796 = vst.msk [vmem:[#allocation2 + $0x80] sm:$0xff] %vm779_vm0, %v4433_v0 }
  0x12   :  { %797 = vst.msk [vmem:[#allocation2 + $0x88] sm:$0xff] %vm779_vm0, %v4433_v0 }
  0x13   :  { %798 = vst.msk [vmem:[#allocation2 + $0x90] sm:$0xff] %vm779_vm0, %v4433_v0 }
  0x14   :  { %799 = vst.msk [vmem:[#allocation2 + $0x98] sm:$0xff] %vm779_vm0, %v4433_v0 }
  0x15   :  { %800 = vst.msk [vmem:[#allocation2 + $0xa0] sm:$0xff] %vm779_vm0, %v4433_v0 }
  0x16   :  { %801 = vst.msk [vmem:[#allocation2 + $0xa8] sm:$0xff] %vm779_vm0, %v4433_v0 }
  0x17   :  { %825 = vst.msk [vmem:[#allocation2 + $0x59] sm:$0xff] %vm779_vm0, %v823_v8  ;;  %v836_v8 = vld [vmem:[%s6065_s0 + $0x58] sm:$0x3] }
  0x18   :  { %826 = vst.msk [vmem:[#allocation2 + $0x61] sm:$0x3] %vm805_vm1, %v824_v9  ;;  %v839_v9 = vld [vmem:[%s6065_s0 + $0x5a] sm:$0xff] }
  0x19   :  { %829 = vst.msk [vmem:[#allocation2 + $0x65] sm:$0xff] %vm779_vm0, %v827_v10  ;;  %v840_v10 = vld [vmem:[%s6065_s0 + $0x62] sm:$0x3] }
  0x1a   :  { %830 = vst.msk [vmem:[#allocation2 + $0x6d] sm:$0x3] %vm805_vm1, %v828_v11 }
  0x1b   :  { %821 = vst.msk [vmem:[#allocation2 + $0x4d] sm:$0xff] %vm779_vm0, %v819_v12 }
  0x1c   :  { %822 = vst.msk [vmem:[#allocation2 + $0x55] sm:$0x3] %vm805_vm1, %v820_v13 }
  0x1d   :  { %804 = vst.msk [vmem:[#allocation2 + $0x1d] sm:$0xff] %vm779_vm0, %v802_v14 }
  0x1e   :  { %806 = vst.msk [vmem:[#allocation2 + $0x25] sm:$0x3] %vm805_vm1, %v803_v15 }
  0x1f   :  { %v890_v19 = vld [vmem:[#allocation2 + $0x5c] sm:$0xff]  ;;  %809 = vst.msk [vmem:[#allocation2 + $0x29] sm:$0xff] %vm779_vm0, %v807_v16 }
  0x20   :  { %v961_v21 = vld [vmem:[#allocation2 + $0x5f] sm:$0xff]  ;;  %v908_v22 = vpack.c.bf16 %v890_v19, %v890_v19  ;;  %810 = vst.msk [vmem:[#allocation2 + $0x31] sm:$0x3] %vm805_vm1, %v808_v17 }
  0x21   :  { %v962_v24 = vld [vmem:[#allocation2 + $0x67] sm:$0xff]  ;;  %v979_v25 = vpack.c.bf16 %v961_v21, %v961_v21  ;;  %813 = vst.msk [vmem:[#allocation2 + $0x35] sm:$0xff] %vm779_vm0, %v811_v18 }
  0x22   :  { %v980_v28 = vpack.c.bf16 %v962_v24, %v962_v24  ;;  %814 = vst.msk [vmem:[#allocation2 + $0x3d] sm:$0x3] %vm805_vm1, %v812_v20  ;;  %v4566_v35 = vunpack.c.l.b16 %v908_v22  ;;  %v891_v43 = vld [vmem:[#allocation2 + $0x64] sm:$0xff]  ;;  %v888_v16 = vld [vmem:[#allocation2 + $0x4c] sm:$0xff] }
  0x23   :  { %v1258_v30 = vunpack.c.l.b16 %v979_v25  ;;  %v889_v31 = vld [vmem:[#allocation2 + $0x54] sm:$0xff]  ;;  %817 = vst.msk [vmem:[#allocation2 + $0x41] sm:$0xff] %vm779_vm0, %v815_v23  ;;  %v909_v50 = vpack.c.bf16 %v891_v43, %v891_v43  ;;  %v906_v21 = vpack.c.bf16 %v888_v16, %v888_v16 }
  0x24   :  { %v1259_v33 = vunpack.c.l.b16 %v980_v28  ;;  %v907_v34 = vpack.c.bf16 %v889_v31, %v889_v31  ;;  %v882_v36 = vld [vmem:[#allocation2 + $0x1c] sm:$0xff]  ;;  %818 = vst.msk [vmem:[#allocation2 + $0x49] sm:$0x3] %vm805_vm1, %v816_v27 }
  0x25   :  { %v900_v39 = vpack.c.bf16 %v882_v36, %v882_v36  ;;  %833 = vst.msk [vmem:[#allocation2 + $0x71] sm:$0xff] %vm779_vm0, %v831_v29  ;;  %v4588_v59 = vunpack.c.l.b16 %v909_v50  ;;  %v4624_v26 = vunpack.c.l.b16 %v906_v21  ;;  %v1025_v36 = vld [vmem:[#allocation2 + $0x21] sm:$0xff]  ;;  %v952_v16 = vld [vmem:[#allocation2 + $0x17] sm:$0xff] }
  0x26   :  { %v1271_v40 = vpack.c.b16 %v1259_v33, %v1258_v30  ;;  %v4573_v41 = vunpack.c.l.b16 %v907_v34  ;;  %v883_v42 = vld [vmem:[#allocation2 + $0x24] sm:$0xff]  ;;  %834 = vst.msk [vmem:[#allocation2 + $0x79] sm:$0x3] %vm805_vm1, %v832_v32 }
  0x27   :  { %v884_v44 = vld [vmem:[#allocation2 + $0x2c] sm:$0xff]  ;;  %v901_v45 = vpack.c.bf16 %v883_v42, %v883_v42  ;;  %837 = vst.msk [vmem:[#allocation2 + $0x7d] sm:$0xff] %vm779_vm0, %v835_v38  ;;  %v4580_v49 = vunpack.c.l.b16 %v900_v39 }
  0x28   :  { %1285 = vrot.lane.b32.xlu1 %v1271_v40, %s4434_s15  ;;  %v1163_v46 = vpack.c.b16 %v4566_v35, %v4573_v41  ;;  %v902_v47 = vpack.c.bf16 %v884_v44, %v884_v44  ;;  %v885_v53 = vld [vmem:[#allocation2 + $0x34] sm:$0xff]  ;;  %838 = vst.msk [vmem:[#allocation2 + $0x85] sm:$0x3] %vm805_vm1, %v836_v8  ;;  %v1026_v37 = vld [vmem:[#allocation2 + $0x29] sm:$0xff]  ;;  %v1043_v44 = vpack.c.bf16 %v1025_v36, %v1025_v36 }
  0x29   :  { %v4583_v51 = vunpack.c.l.b16 %v901_v45  ;;  %v1159_v55 = vpack.c.b16 %v4580_v49, %v1142_v48  ;;  %v903_v62 = vpack.c.bf16 %v885_v53, %v885_v53  ;;  %841 = vst.msk [vmem:[#allocation2 + $0x89] sm:$0xff] %vm779_vm0, %v839_v9  ;;  %v1044_v45 = vpack.c.bf16 %v1026_v37, %v1026_v37  ;;  %v1023_v53 = vld [vmem:[#allocation2 + $0x11] sm:$0xff] }
  0x2a   :  { %1177 = vrot.lane.b32.xlu0 %v1163_v46, %s4434_s15  ;;  %v4585_v52 = vunpack.c.l.b16 %v902_v47  ;;  %v886_v54 = vld [vmem:[#allocation2 + $0x3c] sm:$0xff]  ;;  %842 = vst.msk [vmem:[#allocation2 + $0x91] sm:$0x3] %vm805_vm1, %v840_v10  ;;  %v1358_v48 = vunpack.c.l.b16 %v1043_v44  ;;  %v4345_v9 = vld [vmem:[%s6066_s1 + $0x30] sm:$0xff] }
  0x2b   :  { %v904_v63 = vpack.c.bf16 %v886_v54, %v886_v54  ;;  %v4613_v14 = vunpack.c.l.b16 %v903_v62  ;;  %v887_v17 = vld [vmem:[#allocation2 + $0x44] sm:$0xff]  ;;  %v1359_v50 = vunpack.c.l.b16 %v1044_v45  ;;  %v1024_v54 = vld [vmem:[#allocation2 + $0x19] sm:$0xff]  ;;  %v4353_v10 = vld [vmem:[%s6066_s1 + $0x70] sm:$0xff] }
  0x2c   :  { %v892_v56 = vld [vmem:[#allocation2 + $0x6c] sm:$0xff]  ;;  %v1160_v61 = vpack.c.b16 %v4585_v52, %v4583_v51  ;;  %v905_v23 = vpack.c.bf16 %v887_v17, %v887_v17  ;;  %v4354_v62 = vld [vmem:[%s6066_s1 + $0x78] sm:$0xff] }
  0x2d   :  { %v963_v57 = vld [vmem:[#allocation2 + $0x6f] sm:$0xff]  ;;  %v910_v58 = vpack.c.bf16 %v892_v56, %v892_v56  ;;  %v4615_v15 = vunpack.c.l.b16 %v904_v63  ;;  %v1041_v56 = vpack.c.bf16 %v1023_v53, %v1023_v53  ;;  %4419 = vmatpush.bf16.msra.mxu3 %v4354_v62  ;;  %1977 = vmatpush.bf16.msra.mxu1 %v4354_v62  ;;  %v956_v37 = vld [vmem:[#allocation2 + $0x37] sm:$0xff]  ;;  %v958_v53 = vld [vmem:[#allocation2 + $0x47] sm:$0xff] }
  0x2e   :  { %v893_v60 = vld [vmem:[#allocation2 + $0x74] sm:$0xff]  ;;  %v894_v1 = vld [vmem:[#allocation2 + $0x7c] sm:$0xff]  ;;  %v981_v6 = vpack.c.bf16 %v963_v57, %v963_v57  ;;  %v4627_v31 = vunpack.c.l.b16 %v905_v23  ;;  %v1042_v57 = vpack.c.bf16 %v1024_v54, %v1024_v54  ;;  %v4344_v17 = vld [vmem:[%s6066_s1 + $0x28] sm:$0xff]  ;;  %v1422_v23 = vpack.c.b16 %v4583_v51, %v4580_v49 }
  0x2f   :  { %v911_v2 = vpack.c.bf16 %v893_v60, %v893_v60  ;;  %v964_v3 = vld [vmem:[#allocation2 + $0x77] sm:$0xff]  ;;  %v4592_v4 = vunpack.c.l.b16 %v910_v58  ;;  %v912_v5 = vpack.c.bf16 %v894_v1, %v894_v1  ;;  %v1161_v22 = vpack.c.b16 %v4615_v15, %v4613_v14  ;;  %v965_v29 = vld [vmem:[#allocation2 + $0x7f] sm:$0xff]  ;;  %v954_v49 = vld [vmem:[#allocation2 + $0x27] sm:$0xff] }
  0x30   :  { %v982_v7 = vpack.c.bf16 %v964_v3, %v964_v3  ;;  %1169 = vrot.lane.b32.xlu1 %v1159_v55, %s4434_s15  ;;  %v1260_v18 = vunpack.c.l.b16 %v981_v6  ;;  %v895_v25 = vld [vmem:[#allocation2 + $0x84] sm:$0xff]  ;;  %v983_v33 = vpack.c.bf16 %v965_v29, %v965_v29  ;;  %v1162_v43 = vpack.c.b16 %v4624_v26, %v4627_v31  ;;  %v968_v58 = vld [vmem:[#allocation2 + $0x97] sm:$0xff]  ;;  %v955_v36 = vld [vmem:[#allocation2 + $0x2f] sm:$0xff] }
  0x31   :  { %v4604_v11 = vunpack.c.l.b16 %v911_v2  ;;  %v1164_v12 = vpack.c.b16 %v4592_v4, %v4588_v59  ;;  %v4609_v13 = vunpack.c.l.b16 %v912_v5  ;;  %v896_v27 = vld [vmem:[#allocation2 + $0x8c] sm:$0xff]  ;;  %v913_v28 = vpack.c.bf16 %v895_v25, %v895_v25  ;;  %4420 = vmatpush.bf16.msra.mxu3 %v4353_v10  ;;  %1978 = vmatpush.bf16.msra.mxu1 %v4353_v10  ;;  %v953_v25 = vld [vmem:[#allocation2 + $0x1f] sm:$0xff] }
  0x32   :  { %1171 = vrot.lane.b32.xlu0 %v1160_v61, %s4434_s15  ;;  %v1261_v19 = vunpack.c.l.b16 %v982_v7  ;;  %v966_v30 = vld [vmem:[#allocation2 + $0x87] sm:$0xff]  ;;  %v914_v32 = vpack.c.bf16 %v896_v27, %v896_v27  ;;  %v1262_v40 = vunpack.c.l.b16 %v983_v33  ;;  %v967_v55 = vld [vmem:[#allocation2 + $0x8f] sm:$0xff]  ;;  %v4346_v61 = vld [vmem:[%s6066_s1 + $0x38] sm:$0xff]  ;;  %v986_v63 = vpack.c.bf16 %v968_v58, %v968_v58 }
  0x33   :  { %1179 = vrot.lane.b32.xlu2 %v1164_v12, %s4434_s15  ;;  %v1165_v20 = vpack.c.b16 %v4609_v13, %v4604_v11  ;;  %v984_v34 = vpack.c.bf16 %v966_v30, %v966_v30  ;;  %v4630_v38 = vunpack.c.l.b16 %v913_v28  ;;  %v985_v60 = vpack.c.bf16 %v967_v55, %v967_v55  ;;  %1923 = vmatpush.bf16.msra.mxu0 %v4346_v61  ;;  %v951_v12 = vld [vmem:[#allocation2 + $0xf] sm:$0xff]  ;;  %v4342_v51 = vld [vmem:[%s6066_s1 + $0x18] sm:$0xff]  ;;  %v4347_v54 = vld [vmem:[%s6066_s1 + $0x40] sm:$0xff] }
  0x34   :  { %v1272_v24 = vpack.c.b16 %v1261_v19, %v1260_v18  ;;  %v4632_v39 = vunpack.c.l.b16 %v914_v32  ;;  %v1356_v1 = vunpack.c.l.b16 %v1041_v56  ;;  %v1357_v2 = vunpack.c.l.b16 %v1042_v57  ;;  %4411 = vmatpush.bf16.msra.mxu2 %v4346_v61  ;;  %v4352_v18 = vld [vmem:[%s6066_s1 + $0x68] sm:$0xff]  ;;  %v4350_v27 = vld [vmem:[%s6066_s1 + $0x58] sm:$0xff]  ;;  %v4349_v32 = vld [vmem:[%s6066_s1 + $0x50] sm:$0xff] }
  0x35   :  { %v1263_v42 = vunpack.c.l.b16 %v984_v34  ;;  %v1264_v3 = vunpack.c.l.b16 %v985_v60  ;;  %v1375_v5 = vpack.c.b16 %v1359_v50, %v1358_v48  ;;  %v1265_v6 = vunpack.c.l.b16 %v986_v63  ;;  %4421 = vmatpush.bf16.msra.mxu3 %v4352_v18  ;;  %1979 = vmatpush.bf16.msra.mxu1 %v4352_v18  ;;  %v957_v50 = vld [vmem:[#allocation2 + $0x3f] sm:$0xff]  ;;  %v844_v63 = vld [vmem:[#allocation2 + $0xb] sm:$0xff] }
  0x36   :  { %v1166_v46 = vpack.c.b16 %v4632_v39, %v4630_v38  ;;  %v1374_v7 = vpack.c.b16 %v1357_v2, %v1356_v1  ;;  %v1423_v19 = vpack.c.b16 %v4613_v14, %v4585_v52  ;;  %v969_v21 = vpack.c.bf16 %v951_v12, %v951_v12  ;;  %v4351_v52 = vld [vmem:[%s6066_s1 + $0x60] sm:$0xff]  ;;  %v959_v2 = vld [vmem:[#allocation2 + $0x4f] sm:$0xff] }
  0x37   :  { %v1273_v47 = vpack.c.b16 %v1263_v42, %v1262_v40  ;;  %v1274_v8 = vpack.c.b16 %v1265_v6, %v1264_v3  ;;  %1924 = vmatpush.bf16.msra.mxu0 %v4345_v9  ;;  %v971_v29 = vpack.c.bf16 %v953_v25, %v953_v25  ;;  %v972_v30 = vpack.c.bf16 %v954_v49, %v954_v49  ;;  %v4340_v40 = vld [vmem:[%s6066_s1 + $0x8] sm:$0xff]  ;;  %v960_v3 = vld [vmem:[#allocation2 + $0x57] sm:$0xff] }
  0x38   :  { %1181 = vrot.lane.b32.xlu1 %v1165_v20, %s4434_s15  ;;  %4412 = vmatpush.bf16.msra.mxu2 %v4345_v9  ;;  %v1424_v20 = vpack.c.b16 %v4627_v31, %v4615_v15  ;;  %v1248_v14 = vunpack.c.l.b16 %v969_v21  ;;  %v4341_v31 = vld [vmem:[%s6066_s1 + $0x10] sm:$0xff]  ;;  %v4348_v42 = vld [vmem:[%s6066_s1 + $0x48] sm:$0xff]  ;;  %v973_v44 = vpack.c.bf16 %v955_v36, %v955_v36  ;;  %v974_v45 = vpack.c.bf16 %v956_v37, %v956_v37  ;;  %v1028_v25 = vld [vmem:[#allocation2 + $0x39] sm:$0xff] }
  0x39   :  { %4422 = vmatpush.bf16.msra.mxu3 %v4351_v52  ;;  %1980 = vmatpush.bf16.msra.mxu1 %v4351_v52  ;;  %v1250_v33 = vunpack.c.l.b16 %v971_v29  ;;  %v1251_v34 = vunpack.c.l.b16 %v972_v30  ;;  %v975_v56 = vpack.c.bf16 %v957_v50, %v957_v50  ;;  %v976_v57 = vpack.c.bf16 %v958_v53, %v958_v53  ;;  %v843_v62 = vld [vmem:[#allocation2 + $0x3] sm:$0xff]  ;;  %v1032_v36 = vld [vmem:[#allocation2 + $0x59] sm:$0xff] }
  0x3a   :  { %1173 = vrot.lane.b32.xlu0 %v1161_v22, %s4434_s15  ;;  %v970_v22 = vpack.c.bf16 %v952_v16, %v952_v16  ;;  %v1253_v48 = vunpack.c.l.b16 %v974_v45  ;;  %v861_v1 = vpack.c.bf16 %v843_v62, %v843_v62  ;;  %v862_v6 = vpack.c.bf16 %v844_v63, %v844_v63  ;;  %v1030_v9 = vld [vmem:[#allocation2 + $0x49] sm:$0xff]  ;;  %v926_v45 = vld [vmem:[#allocation2 + $0x5d] sm:$0xff]  ;;  %v853_v53 = vld [vmem:[#allocation2 + $0x53] sm:$0xff] }
  0x3b   :  { %1287 = vrot.lane.b32.xlu2 %v1272_v24, %s4434_s15  ;;  %1925 = vmatpush.bf16.msra.mxu0 %v4344_v17  ;;  %v4343_v24 = vld [vmem:[%s6066_s1 + $0x20] sm:$0xff]  ;;  %v1254_v58 = vunpack.c.l.b16 %v975_v56  ;;  %v1255_v60 = vunpack.c.l.b16 %v976_v57  ;;  %v1048_v12 = vpack.c.bf16 %v1030_v9, %v1030_v9  ;;  %v1425_v50 = vpack.c.b16 %v4573_v41, %v4624_v26  ;;  %v4368_v56 = vld [vmem:[%s6066_s1 + $0xe8] sm:$0xff]  ;;  %v845_v62 = vld [vmem:[#allocation2 + $0x13] sm:$0xff] }
  0x3c   :  { %4413 = vmatpush.bf16.msra.mxu2 %v4344_v17  ;;  %v1249_v15 = vunpack.c.l.b16 %v970_v22  ;;  %v1096_v21 = vunpack.c.l.b16 %v862_v6  ;;  %v4374_v22 = vld [vmem:[%s6066_s1 + $0x118] sm:$0xff]  ;;  %v871_v41 = vpack.c.bf16 %v853_v53, %v853_v53  ;;  %v863_v6 = vpack.c.bf16 %v845_v62, %v845_v62  ;;  %v1034_v9 = vld [vmem:[#allocation2 + $0x69] sm:$0xff] }
  0x3d   :  { %4423 = vmatpush.bf16.msra.mxu3 %v4350_v27  ;;  %1981 = vmatpush.bf16.msra.mxu1 %v4350_v27  ;;  %v1269_v61 = vpack.c.b16 %v1255_v60, %v1254_v58  ;;  %v944_v58 = vpack.c.bf16 %v926_v45, %v926_v45  ;;  %v846_v63 = vld [vmem:[#allocation2 + $0x1b] sm:$0xff] }
  0x3e   :  { %v1266_v28 = vpack.c.b16 %v1249_v15, %v1248_v14  ;;  %v4370_v14 = vld [vmem:[%s6066_s1 + $0xf8] sm:$0xff] }
  0x3f   :  { %1926 = vmatpush.bf16.msra.mxu0 %v4343_v24  ;;  %v1027_v15 = vld [vmem:[#allocation2 + $0x31] sm:$0xff] }
  0x40   :  { %1183 = vrot.lane.b32.xlu1 %v1166_v46, %s4434_s15  ;;  %4414 = vmatpush.bf16.msra.mxu2 %v4343_v24  ;;  %v4339_v46 = vld [vmem:[%s6066_s1] sm:$0xff]  ;;  %v4362_v24 = vld [vmem:[%s6066_s1 + $0xb8] sm:$0xff]  ;;  %v1045_v49 = vpack.c.bf16 %v1027_v15, %v1027_v15 }
  0x41   :  { %4424 = vmatpush.bf16.msra.mxu3 %v4349_v32  ;;  %1982 = vmatpush.bf16.msra.mxu1 %v4349_v32  ;;  %v4367_v15 = vld [vmem:[%s6066_s1 + $0xe0] sm:$0xff] }
  0x42   :  { %1175 = vrot.lane.b32.xlu0 %v1162_v43, %s4434_s15  ;;  %v1267_v43 = vpack.c.b16 %v1251_v34, %v1250_v33  ;;  %v4361_v33 = vld [vmem:[%s6066_s1 + $0xb0] sm:$0xff] }
  0x43   :  { %1289 = vrot.lane.b32.xlu2 %v1273_v47, %s4434_s15  ;;  %1927 = vmatpush.bf16.msra.mxu0 %v4342_v51  ;;  %v1252_v47 = vunpack.c.l.b16 %v973_v44  ;;  %v1031_v34 = vld [vmem:[#allocation2 + $0x51] sm:$0xff] }
  0x44   :  { %4415 = vmatpush.bf16.msra.mxu2 %v4342_v51  ;;  %v1046_v51 = vpack.c.bf16 %v1028_v25, %v1028_v25  ;;  %v1049_v37 = vpack.c.bf16 %v1031_v34, %v1031_v34  ;;  %v925_v44 = vld [vmem:[#allocation2 + $0x55] sm:$0xff] }
  0x45   :  { %4425 = vmatpush.bf16.msra.mxu3 %v4348_v42  ;;  %1983 = vmatpush.bf16.msra.mxu1 %v4348_v42  ;;  %v1268_v55 = vpack.c.b16 %v1253_v48, %v1252_v47  ;;  %v4373_v48 = vld [vmem:[%s6066_s1 + $0x110] sm:$0xff]  ;;  %v943_v57 = vpack.c.bf16 %v925_v44, %v925_v44 }
  0x46   :  { %v1361_v29 = vunpack.c.l.b16 %v1046_v51  ;;  %v1364_v42 = vunpack.c.l.b16 %v1049_v37 }
  0x47   :  { %1928 = vmatpush.bf16.msra.mxu0 %v4341_v31  ;;  %v4737_v60 = vunpack.c.l.b16 %v943_v57  ;;  %v1036_v57 = vld [vmem:[#allocation2 + $0x79] sm:$0xff] }
  0x48   :  { %1383 = vrot.lane.b32.xlu1 %v1374_v7, %s4434_s15  ;;  %4416 = vmatpush.bf16.msra.mxu2 %v4341_v31  ;;  %v977_v7 = vpack.c.bf16 %v959_v2, %v959_v2  ;;  %v4744_v2 = vunpack.c.l.b16 %v871_v41  ;;  %v1054_v41 = vpack.c.bf16 %v1036_v57, %v1036_v57 }
  0x49   :  { %4426 = vmatpush.bf16.msra.mxu3 %v4347_v54  ;;  %1984 = vmatpush.bf16.msra.mxu1 %v4347_v54  ;;  %v854_v54 = vld [vmem:[#allocation2 + $0x5b] sm:$0xff] }
  0x4a   :  { %1385 = vrot.lane.b32.xlu0 %v1375_v5, %s4434_s15  ;;  %v1029_v5 = vld [vmem:[#allocation2 + $0x41] sm:$0xff]  ;;  %v1256_v16 = vunpack.c.l.b16 %v977_v7  ;;  %v872_v26 = vpack.c.bf16 %v854_v54, %v854_v54  ;;  %v864_v7 = vpack.c.bf16 %v846_v63, %v846_v63 }
  0x4b   :  { %1291 = vrot.lane.b32.xlu2 %v1274_v8, %s4434_s15  ;;  %1929 = vmatpush.bf16.msra.mxu0 %v4340_v40  ;;  %v978_v8 = vpack.c.bf16 %v960_v3, %v960_v3  ;;  %v1047_v10 = vpack.c.bf16 %v1029_v5, %v1029_v5 }
  0x4c   :  { %4417 = vmatpush.bf16.msra.mxu2 %v4340_v40  ;;  %v1050_v40 = vpack.c.bf16 %v1032_v36, %v1032_v36  ;;  %v4746_v3 = vunpack.c.l.b16 %v872_v26 }
  0x4d   :  { %v1257_v17 = vunpack.c.l.b16 %v978_v8  ;;  %v1362_v18 = vunpack.c.l.b16 %v1047_v10  ;;  %2085 = vmatpush.bf16.msrb.mxu3 %v4370_v14  ;;  %v1033_v8 = vld [vmem:[#allocation2 + $0x61] sm:$0xff] }
  0x4e   :  { %v1051_v10 = vpack.c.bf16 %v1033_v8, %v1033_v8  ;;  %v1369_v8 = vunpack.c.l.b16 %v1054_v41 }
  0x4f   :  { %1930 = vmatpush.bf16.msra.mxu0 %v4339_v46 }
  0x50   :  { %1433 = vrot.lane.b32.xlu1 %v1423_v19, %s4434_s15  ;;  %4418 = vmatpush.bf16.msra.mxu2 %v4339_v46  ;;  %v1363_v19 = vunpack.c.l.b16 %v1048_v12  ;;  %v4369_v46 = vld [vmem:[%s6066_s1 + $0xf0] sm:$0xff]  ;;  %v1052_v12 = vpack.c.bf16 %v1034_v9, %v1034_v9 }
  0x51   :  { %2086 = vmatpush.bf16.msrb.mxu3 %v4369_v46 }
  0x52   :  { %1435 = vrot.lane.b32.xlu0 %v1424_v20, %s4434_s15  ;;  %v1095_v20 = vunpack.c.l.b16 %v861_v1  ;;  %v1377_v52 = vpack.c.b16 %v1363_v19, %v1362_v18  ;;  %v4359_v1 = vld [vmem:[%s6066_s1 + $0xa0] sm:$0xff]  ;;  %v928_v19 = vld [vmem:[#allocation2 + $0x6d] sm:$0xff] }
  0x53   :  { %1431 = vrot.lane.b32.xlu2 %v1422_v23, %s4434_s15  ;;  %v1270_v23 = vpack.c.b16 %v1257_v17, %v1256_v16  ;;  %2143 = vmatpush.bf16.msrb.mxu0 %v4374_v22  ;;  %v1118_v16 = vpack.c.b16 %v4746_v3, %v4744_v2  ;;  %v927_v18 = vld [vmem:[#allocation2 + $0x65] sm:$0xff] }
  0x54   :  { %2031 = vmatpush.bf16.msrb.mxu2 %v4362_v24  ;;  %v1113_v27 = vpack.c.b16 %v1096_v21, %v1095_v20  ;;  %v1366_v20 = vunpack.c.l.b16 %v1051_v10  ;;  %v1367_v21 = vunpack.c.l.b16 %v1052_v12  ;;  %v4753_v24 = vunpack.c.l.b16 %v864_v7  ;;  %v857_v10 = vld [vmem:[#allocation2 + $0x73] sm:$0xff]  ;;  %v858_v12 = vld [vmem:[#allocation2 + $0x7b] sm:$0xff] }
  0x55   :  { %2087 = vmatpush.bf16.msrb.mxu3 %v4368_v56  ;;  %v1035_v56 = vld [vmem:[#allocation2 + $0x71] sm:$0xff] }
  0x56   :  { %v1379_v25 = vpack.c.b16 %v1367_v21, %v1366_v20 }
  0x57   :  { %2144 = vmatpush.bf16.msrb.mxu0 %v4373_v48 }
  0x58   :  { %1389 = vrot.lane.b32.xlu1 %v1377_v52, %s4434_s15  ;;  %2032 = vmatpush.bf16.msrb.mxu2 %v4361_v33 }
  0x59   :  { %2088 = vmatpush.bf16.msrb.mxu3 %v4367_v15  ;;  %v4355_v15 = vld [vmem:[%s6066_s1 + $0x80] sm:$0xff] }
  0x5a   :  { %1275 = vrot.lane.b32.xlu0 %v1266_v28, %s4434_s15  ;;  %v1360_v28 = vunpack.c.l.b16 %v1045_v49  ;;  %v1426_v49 = vpack.c.b16 %v4588_v59, %v4566_v35  ;;  %v4372_v35 = vld [vmem:[%s6066_s1 + $0x108] sm:$0xff] }
  0x5b   :  { %2145 = vmatpush.bf16.msrb.mxu0 %v4372_v35 }
  0x5c   :  { %v1376_v31 = vpack.c.b16 %v1361_v29, %v1360_v28  ;;  %v946_v28 = vpack.c.bf16 %v928_v19, %v928_v19  ;;  %v855_v29 = vld [vmem:[#allocation2 + $0x63] sm:$0xff] }
  0x5d   :  { %v873_v33 = vpack.c.bf16 %v855_v29, %v855_v29  ;;  %v4363_v29 = vld [vmem:[%s6066_s1 + $0xc0] sm:$0xff] }
  0x5e   :  { %1387 = vrot.lane.b32.xlu2 %v1376_v31, %s4434_s15  ;;  %v4358_v31 = vld [vmem:[%s6066_s1 + $0x98] sm:$0xff]  ;;  %v4775_v36 = vunpack.c.l.b16 %v946_v28 }
  0x5f   :  { %v4778_v46 = vunpack.c.l.b16 %v873_v33  ;;  %v850_v28 = vld [vmem:[#allocation2 + $0x3b] sm:$0xff] }
  0x60   :  { %v868_v33 = vpack.c.bf16 %v850_v28, %v850_v28 }
  0x62   :  { %1277 = vrot.lane.b32.xlu0 %v1267_v43, %s4434_s15  ;;  %v1365_v43 = vunpack.c.l.b16 %v1050_v40 }
  0x64   :  { %v1378_v47 = vpack.c.b16 %v1365_v43, %v1364_v42  ;;  %v847_v42 = vld [vmem:[#allocation2 + $0x23] sm:$0xff]  ;;  %v848_v43 = vld [vmem:[#allocation2 + $0x2b] sm:$0xff] }
  0x65   :  { %v865_v53 = vpack.c.bf16 %v847_v42, %v847_v42  ;;  %v866_v54 = vpack.c.bf16 %v848_v43, %v848_v43  ;;  %v1037_v42 = vld [vmem:[#allocation2 + $0x81] sm:$0xff]  ;;  %v1038_v43 = vld [vmem:[#allocation2 + $0x89] sm:$0xff] }
  0x66   :  { %1391 = vrot.lane.b32.xlu1 %v1378_v47, %s4434_s15  ;;  %1437 = vrot.lane.b32.xlu2 %v1425_v50, %s4434_s15  ;;  %v4357_v47 = vld [vmem:[%s6066_s1 + $0x90] sm:$0xff] }
  0x67   :  { %v4790_v63 = vunpack.c.l.b16 %v865_v53 }
  0x6a   :  { %1279 = vrot.lane.b32.xlu0 %v1268_v55, %s4434_s15  ;;  %v4360_v55 = vld [vmem:[%s6066_s1 + $0xa8] sm:$0xff] }
  0x6b   :  { %2033 = vmatpush.bf16.msrb.mxu2 %v4360_v55 }
  0x6e   :  { %1393 = vrot.lane.b32.xlu1 %v1379_v25, %s4434_s15  ;;  %1439 = vrot.lane.b32.xlu2 %v1426_v49, %s4434_s15 }
  0x6f   :  { %2034 = vmatpush.bf16.msrb.mxu2 %v4359_v1  ;;  %v4792_v1 = vunpack.c.l.b16 %v866_v54  ;;  %v4839_v54 = vunpack.c.l.b16 %v868_v33  ;;  %v1040_v33 = vld [vmem:[#allocation2 + $0x99] sm:$0xff] }
  0x71   :  { %v1115_v20 = vpack.c.b16 %v4792_v1, %v4790_v63 }
  0x72   :  { %1281 = vrot.lane.b32.xlu0 %v1269_v61, %s4434_s15  ;;  %v4739_v61 = vunpack.c.l.b16 %v944_v58  ;;  %v1053_v58 = vpack.c.bf16 %v1035_v56, %v1035_v56  ;;  %v932_v56 = vld [vmem:[#allocation2 + $0x8d] sm:$0xff] }
  0x73   :  { %2035 = vmatpush.bf16.msrb.mxu2 %v4358_v31 }
  0x74   :  { %v1226_v5 = vpack.c.b16 %v4739_v61, %v4737_v60  ;;  %v1368_v7 = vunpack.c.l.b16 %v1053_v58 }
  0x77   :  { %2036 = vmatpush.bf16.msrb.mxu2 %v4357_v47  ;;  %v1056_v47 = vpack.c.bf16 %v1038_v43, %v1038_v43 }
  0x79   :  { %v1371_v58 = vunpack.c.l.b16 %v1056_v47 }
  0x7a   :  { %1283 = vrot.lane.b32.xlu0 %v1270_v23, %s4434_s15  ;;  %v1097_v23 = vunpack.c.l.b16 %v863_v6  ;;  %v930_v6 = vld [vmem:[#allocation2 + $0x7d] sm:$0xff] }
  0x7c   :  { %v1114_v59 = vpack.c.b16 %v4753_v24, %v1097_v23  ;;  %v4356_v23 = vld [vmem:[%s6066_s1 + $0x88] sm:$0xff] }
  0x7d   :  { %2037 = vmatpush.bf16.msrb.mxu2 %v4356_v23  ;;  %v851_v23 = vld [vmem:[#allocation2 + $0x43] sm:$0xff] }
  0x7e   :  { %v869_v28 = vpack.c.bf16 %v851_v23, %v851_v23 }
  0x81   :  { %2038 = vmatpush.bf16.msrb.mxu2 %v4355_v15 }
  0x83   :  { %v1168_v30 = vpop.permute.xlu0 %1167 }
  0x84   :  { %v1466_v32 = vsel %vm779_vm0, %v1113_v27, %v1168_v30  ;;  %v945_v27 = vpack.c.bf16 %v927_v18, %v927_v18  ;;  %v856_v30 = vld [vmem:[#allocation2 + $0x6b] sm:$0xff]  ;;  %v1427_v18 = vpack.c.b16 %v4604_v11, %v4592_v4  ;;  %v4371_v4 = vld [vmem:[%s6066_s1 + $0x100] sm:$0xff]  ;;  %v875_v11 = vpack.c.bf16 %v857_v10, %v857_v10 }
  0x85   :  { %1931 = vmatmul.bf16.vlgmr.msra.gmra.mxu0 %v1466_v32  ;;  %v4366_v32 = vld [vmem:[%s6066_s1 + $0xd8] sm:$0xff]  ;;  %v874_v37 = vpack.c.bf16 %v856_v30, %v856_v30  ;;  %v1428_v10 = vpack.c.b16 %v4630_v38, %v4609_v13 }
  0x86   :  { %v4773_v34 = vunpack.c.l.b16 %v945_v27  ;;  %2089 = vmatpush.bf16.msrb.mxu3 %v4366_v32  ;;  %1441 = vrot.lane.b32.xlu2 %v1427_v18, %s4434_s15  ;;  %v849_v27 = vld [vmem:[#allocation2 + $0x33] sm:$0xff]  ;;  %v4826_v30 = vunpack.c.l.b16 %v875_v11 }
  0x87   :  { %v4785_v50 = vunpack.c.l.b16 %v874_v37  ;;  %2146 = vmatpush.bf16.msrb.mxu0 %v4371_v4 }
  0x88   :  { %v1227_v48 = vpack.c.b16 %v4775_v36, %v4773_v34 }
  0x89   :  { %v1119_v62 = vpack.c.b16 %v4785_v50, %v4778_v46 }
  0x8d   :  { %v1180_v14 = vpop.permute.xlu2 %1179 }
  0x8e   :  { %v1490_v19 = vsel %vm779_vm0, %v1119_v62, %v1180_v14  ;;  %v876_v14 = vpack.c.bf16 %v858_v12, %v858_v12  ;;  %1443 = vrot.lane.b32.xlu2 %v1428_v10, %s4434_s15 }
  0x90   :  { %v4828_v31 = vunpack.c.l.b16 %v876_v14 }
  0x95   :  { %v1288_v55 = vpop.permute.xlu2 %1287 }
  0x96   :  { %v1526_v26 = vsel %vm779_vm0, %v1227_v48, %v1288_v55  ;;  %v931_v55 = vld [vmem:[#allocation2 + $0x85] sm:$0xff] }
  0x97   :  { %v949_v62 = vpack.c.bf16 %v931_v55, %v931_v55 }
  0x9a   :  { %v1286_v17 = vpop.permute.xlu1 %1285 }
  0x9b   :  { %v1522_v22 = vsel %vm779_vm0, %v1226_v5, %v1286_v17  ;;  %v929_v5 = vld [vmem:[#allocation2 + $0x75] sm:$0xff]  ;;  %v1380_v17 = vpack.c.b16 %v1369_v8, %v1368_v7  ;;  %v860_v7 = vld [vmem:[#allocation2 + $0x8b] sm:$0xff] }
  0x9c   :  { %2010 = vmatmul.bf16.vlgmr.msra.gmra.mxu3 %v1522_v22  ;;  %v1178_v52 = vpop.permute.xlu0 %1177  ;;  %v947_v21 = vpack.c.bf16 %v929_v5, %v929_v5  ;;  %v948_v22 = vpack.c.bf16 %v930_v6, %v930_v6  ;;  %v950_v5 = vpack.c.bf16 %v932_v56, %v932_v56  ;;  %v859_v6 = vld [vmem:[#allocation2 + $0x83] sm:$0xff] }
  0x9d   :  { %v1486_v51 = vsel %vm779_vm0, %v1118_v16, %v1178_v52  ;;  %v4365_v16 = vld [vmem:[%s6066_s1 + $0xd0] sm:$0xff]  ;;  %v4364_v52 = vld [vmem:[%s6066_s1 + $0xc8] sm:$0xff]  ;;  %1395 = vrot.lane.b32.xlu1 %v1380_v17, %s4434_s15  ;;  %v1290_v37 = vpop.permute.xlu2 %1289  ;;  %v877_v18 = vpack.c.bf16 %v859_v6, %v859_v6 }
  0x9e   :  { %1956 = vmatmul.bf16.vlgmr.msra.gmra.mxu2 %v1486_v51  ;;  %2090 = vmatpush.bf16.msrb.mxu3 %v4365_v16  ;;  %v4819_v49 = vunpack.c.l.b16 %v947_v21  ;;  %v4821_v51 = vunpack.c.l.b16 %v948_v22  ;;  %v915_v16 = vld [vmem:[#allocation2 + $0x5] sm:$0xff]  ;;  %v916_v17 = vld [vmem:[#allocation2 + $0xd] sm:$0xff]  ;;  %v4852_v21 = vunpack.c.l.b16 %v950_v5  ;;  %v918_v5 = vld [vmem:[#allocation2 + $0x1d] sm:$0xff] }
  0x9f   :  { %v933_v13 = vpack.c.bf16 %v915_v16, %v915_v16  ;;  %v934_v38 = vpack.c.bf16 %v916_v17, %v916_v17  ;;  %v4856_v4 = vunpack.c.l.b16 %v877_v18  ;;  %v987_v6 = vld [vmem:[#allocation2 + $0x10] sm:$0xff] }
  0xa0   :  { %v1228_v35 = vpack.c.b16 %v4821_v51, %v4819_v49 }
  0xa2   :  { %v1170_v40 = vpop.permute.xlu1 %1169  ;;  %2091 = vmatpush.bf16.msrb.mxu3 %v4364_v52  ;;  %v1530_v48 = vsel %vm779_vm0, %v1228_v35, %v1290_v37  ;;  %v852_v52 = vld [vmem:[#allocation2 + $0x4b] sm:$0xff] }
  0xa3   :  { %v1470_v44 = vsel %vm779_vm0, %v1114_v59, %v1170_v40  ;;  %v867_v59 = vpack.c.bf16 %v849_v27, %v849_v27  ;;  %v1120_v40 = vpack.c.b16 %v4828_v31, %v4826_v30  ;;  %v1204_v27 = vunpack.c.l.b16 %v934_v38 }
  0xa4   :  { %v1172_v45 = vpop.permute.xlu0 %1171  ;;  %1936 = vmatmul.bf16.gmra.mxu0 %v1470_v44 }
  0xa5   :  { %v1474_v25 = vsel %vm779_vm0, %v1115_v20, %v1172_v45  ;;  %v1055_v45 = vpack.c.bf16 %v1037_v42, %v1037_v42  ;;  %v4837_v53 = vunpack.c.l.b16 %v867_v59  ;;  %v4850_v20 = vunpack.c.l.b16 %v949_v62  ;;  %v1292_v35 = vpop.permute.xlu2 %1291  ;;  %v1039_v59 = vld [vmem:[#allocation2 + $0x91] sm:$0xff] }
  0xa6   :  { %2092 = vmatpush.bf16.msrb.mxu3 %v4363_v29  ;;  %v870_v29 = vpack.c.bf16 %v852_v52, %v852_v52  ;;  %v1058_v42 = vpack.c.bf16 %v1040_v33, %v1040_v33 }
  0xa7   :  { %v1370_v57 = vunpack.c.l.b16 %v1055_v45  ;;  %v1116_v12 = vpack.c.b16 %v4839_v54, %v4837_v53  ;;  %v1229_v15 = vpack.c.b16 %v4852_v21, %v4850_v20  ;;  %v4867_v45 = vunpack.c.l.b16 %v869_v28 }
  0xa8   :  { %v4869_v47 = vunpack.c.l.b16 %v870_v29  ;;  %v1373_v56 = vunpack.c.l.b16 %v1058_v42  ;;  %v1067_v42 = vld [vmem:[#allocation2 + $0xa4] sm:$0xff] }
  0xa9   :  { %v1381_v8 = vpack.c.b16 %v1371_v58, %v1370_v57  ;;  %v1534_v43 = vsel %vm779_vm0, %v1229_v15, %v1292_v35 }
  0xaa   :  { %v1182_v44 = vpop.permute.xlu1 %1181  ;;  %v1117_v16 = vpack.c.b16 %v4869_v47, %v4867_v45 }
  0xab   :  { %v1494_v41 = vsel %vm779_vm0, %v1120_v40, %v1182_v44  ;;  %1397 = vrot.lane.b32.xlu1 %v1381_v8, %s4434_s15  ;;  %v1057_v40 = vpack.c.bf16 %v1039_v59, %v1039_v59 }
  0xac   :  { %2015 = vmatmul.bf16.gmra.mxu3 %v1526_v26  ;;  %v4794_v9 = vpop.permute.xlu0 %1173 }
  0xad   :  { %v1478_v22 = vsel %vm779_vm0, %v1116_v12, %v4794_v9  ;;  %v1372_v55 = vunpack.c.l.b16 %v1057_v40  ;;  %v1432_v28 = vpop.permute.xlu2 %1431  ;;  %v1066_v40 = vld [vmem:[#allocation2 + $0x9c] sm:$0xff] }
  0xae   :  { %1961 = vmatmul.bf16.gmra.mxu2 %v1490_v19  ;;  %v878_v19 = vpack.c.bf16 %v860_v7, %v860_v7  ;;  %v988_v7 = vld [vmem:[#allocation2 + $0x18] sm:$0xff] }
  0xaf   :  { %v1382_v8 = vpack.c.b16 %v1373_v56, %v1372_v55  ;;  %v990_v56 = vld [vmem:[#allocation2 + $0x28] sm:$0xff] }
  0xb0   :  { %v4858_v11 = vunpack.c.l.b16 %v878_v19  ;;  %v936_v19 = vpack.c.bf16 %v918_v5, %v918_v5 }
  0xb2   :  { %v1121_v9 = vpack.c.b16 %v4858_v11, %v4856_v4  ;;  %v1184_v37 = vpop.permute.xlu1 %1183  ;;  %v1206_v52 = vunpack.c.l.b16 %v936_v19 }
  0xb3   :  { %1399 = vrot.lane.b32.xlu1 %v1382_v8, %s4434_s15 }
  0xb4   :  { %v4830_v32 = vpop.permute.xlu0 %1175  ;;  %1941 = vmatmul.bf16.gmra.mxu0 %v1474_v25  ;;  %v1203_v25 = vunpack.c.l.b16 %v933_v13  ;;  %v1498_v58 = vsel %vm779_vm0, %v1121_v9, %v1184_v37  ;;  %v1006_v13 = vpack.c.bf16 %v988_v7, %v988_v7 }
  0xb5   :  { %v1482_v38 = vsel %vm779_vm0, %v1117_v16, %v4830_v32  ;;  %v1069_v32 = vpack.c.bf16 %v1066_v40, %v1066_v40  ;;  %v1408_v16 = vpack.c.b16 %v4837_v53, %v4792_v1 }
  0xb6   :  { %v1221_v44 = vpack.c.b16 %v1204_v27, %v1203_v25  ;;  %v1312_v25 = vunpack.c.l.b16 %v1006_v13  ;;  %v1407_v27 = vpack.c.b16 %v4790_v63, %v4753_v24  ;;  %v920_v24 = vld [vmem:[#allocation2 + $0x2d] sm:$0xff]  ;;  %v989_v63 = vld [vmem:[#allocation2 + $0x20] sm:$0xff] }
  0xb7   :  { %v1007_v5 = vpack.c.bf16 %v989_v63, %v989_v63 }
  0xb8   :  { %v1574_v37 = vsel %vm779_vm0, %v1407_v27, %v1432_v28  ;;  %v922_v27 = vld [vmem:[#allocation2 + $0x3d] sm:$0xff] }
  0xb9   :  { %v992_v28 = vld [vmem:[#allocation2 + $0x38] sm:$0xff]  ;;  %v940_v1 = vpack.c.bf16 %v922_v27, %v922_v27  ;;  %v1411_v27 = vpack.c.b16 %v4778_v46, %v4746_v3 }
  0xba   :  { %v1384_v59 = vpop.permute.xlu1 %1383 }
  0xbc   :  { %2020 = vmatmul.bf16.gmra.mxu3 %v1530_v48  ;;  %v4842_v26 = vpop.permute.xlu0 %1385  ;;  %v1065_v48 = vld [vmem:[#allocation2 + $0x94] sm:$0xff] }
  0xbd   :  { %v1068_v57 = vpack.c.bf16 %v1065_v48, %v1065_v48 }
  0xbe   :  { %1966 = vmatmul.bf16.gmra.mxu2 %v1494_v41  ;;  %v917_v41 = vld [vmem:[#allocation2 + $0x15] sm:$0xff] }
  0xbf   :  { %v1419_v10 = vunpack.c.l.b16 %v1068_v57  ;;  %v935_v18 = vpack.c.bf16 %v917_v41, %v917_v41  ;;  %v1420_v57 = vunpack.c.l.b16 %v1069_v32 }
  0xc1   :  { %v1429_v17 = vpack.c.b16 %v1419_v10, %v4632_v39  ;;  %v1205_v23 = vunpack.c.l.b16 %v935_v18  ;;  %v919_v39 = vld [vmem:[#allocation2 + $0x25] sm:$0xff]  ;;  %v1313_v10 = vunpack.c.l.b16 %v1007_v5 }
  0xc2   :  { %v937_v33 = vpack.c.bf16 %v919_v39, %v919_v39  ;;  %v1434_v18 = vpop.permute.xlu1 %1433  ;;  %v991_v39 = vld [vmem:[#allocation2 + $0x30] sm:$0xff] }
  0xc3   :  { %1445 = vrot.lane.b32.xlu2 %v1429_v17, %s4434_s15  ;;  %v1222_v29 = vpack.c.b16 %v1206_v52, %v1205_v23  ;;  %v921_v17 = vld [vmem:[#allocation2 + $0x35] sm:$0xff]  ;;  %v1578_v23 = vsel %vm779_vm0, %v1408_v16, %v1434_v18  ;;  %v1009_v53 = vpack.c.bf16 %v991_v39, %v991_v39 }
  0xc4   :  { %v4860_v14 = vpop.permute.xlu0 %1435  ;;  %1946 = vmatmul.bf16.gmra.mxu0 %v1478_v22  ;;  %v1005_v22 = vpack.c.bf16 %v987_v6, %v987_v6  ;;  %v1207_v55 = vunpack.c.l.b16 %v937_v33  ;;  %v1008_v6 = vpack.c.bf16 %v990_v56, %v990_v56  ;;  %v924_v56 = vld [vmem:[#allocation2 + $0x4d] sm:$0xff] }
  0xc6   :  { %v1311_v15 = vunpack.c.l.b16 %v1005_v22  ;;  %v1455_v7 = vpack.c.b16 %v1207_v55, %v1206_v52 }
  0xc8   :  { %v1329_v35 = vpack.c.b16 %v1312_v25, %v1311_v15 }
  0xca   :  { %v1538_v48 = vsel %vm779_vm0, %v1329_v35, %v1384_v59  ;;  %v1315_v59 = vunpack.c.l.b16 %v1009_v53 }
  0xcc   :  { %2025 = vmatmul.bf16.gmra.mxu3 %v1534_v43  ;;  %v1276_v62 = vpop.permute.xlu0 %1275  ;;  %v1070_v43 = vpack.c.bf16 %v1067_v42, %v1067_v42 }
  0xcd   :  { %v1502_v12 = vsel %vm779_vm0, %v1221_v44, %v1276_v62  ;;  %v938_v62 = vpack.c.bf16 %v920_v24, %v920_v24 }
  0xce   :  { %1971 = vmatmul.bf16.gmra.mxu2 %v1498_v58  ;;  %1985 = vmatmul.bf16.vlgmr.msra.gmra.mxu1 %v1502_v12  ;;  %v1421_v58 = vunpack.c.l.b16 %v1070_v43  ;;  %v1314_v12 = vunpack.c.l.b16 %v1008_v6  ;;  %v1388_v43 = vpop.permute.xlu2 %1387 }
  0xcf   :  { %v1208_v8 = vunpack.c.l.b16 %v938_v62 }
  0xd0   :  { %v1430_v41 = vpack.c.b16 %v1421_v58, %v1420_v57  ;;  %v1330_v22 = vpack.c.b16 %v1314_v12, %v1313_v10  ;;  %v993_v57 = vld [vmem:[#allocation2 + $0x40] sm:$0xff]  ;;  %v994_v58 = vld [vmem:[#allocation2 + $0x48] sm:$0xff] }
  0xd1   :  { %v1223_v19 = vpack.c.b16 %v1208_v8, %v1207_v55 }
  0xd2   :  { %1447 = vrot.lane.b32.xlu2 %v1430_v41, %s4434_s15  ;;  %v1542_v15 = vsel %vm779_vm0, %v1330_v22, %v4842_v26  ;;  %v923_v26 = vld [vmem:[#allocation2 + $0x45] sm:$0xff]  ;;  %v1012_v41 = vpack.c.bf16 %v994_v58, %v994_v58  ;;  %v999_v58 = vld [vmem:[#allocation2 + $0x70] sm:$0xff] }
  0xd4   :  { %1951 = vmatmul.bf16.gmra.mxu0 %v1482_v38  ;;  %v1278_v9 = vpop.permute.xlu0 %1277  ;;  %v939_v38 = vpack.c.bf16 %v921_v17, %v921_v17  ;;  %v1390_v17 = vpop.permute.xlu1 %1389 }
  0xd5   :  { %v1506_v44 = vsel %vm779_vm0, %v1222_v29, %v1278_v9  ;;  %v1010_v29 = vpack.c.bf16 %v992_v28, %v992_v28  ;;  %v1210_v9 = vunpack.c.l.b16 %v940_v1 }
  0xd6   :  { %v1209_v25 = vunpack.c.l.b16 %v939_v38  ;;  %v996_v38 = vld [vmem:[#allocation2 + $0x58] sm:$0xff] }
  0xd7   :  { %v1316_v33 = vunpack.c.l.b16 %v1010_v29 }
  0xd8   :  { %v1456_v35 = vpack.c.b16 %v1209_v25, %v1208_v8  ;;  %v1224_v40 = vpack.c.b16 %v1210_v9, %v1209_v25  ;;  %v1438_v8 = vpop.permute.xlu2 %1437 }
  0xd9   :  { %v1331_v42 = vpack.c.b16 %v1316_v33, %v1315_v59  ;;  %v998_v59 = vld [vmem:[#allocation2 + $0x68] sm:$0xff] }
  0xdb   :  { %v1546_v24 = vsel %vm779_vm0, %v1331_v42, %v1388_v43  ;;  %v1412_v43 = vpack.c.b16 %v4826_v30, %v4785_v50  ;;  %v1460_v30 = vpack.c.b16 %v4819_v49, %v4775_v36 }
  0xdc   :  { %2093 = vmatmul.bf16.vlgmr.msrb.gmra.mxu3 %v1574_v37  ;;  %v1280_v13 = vpop.permute.xlu0 %1279  ;;  %v1409_v37 = vpack.c.b16 %v4867_v45, %v4839_v54  ;;  %v942_v54 = vpack.c.bf16 %v924_v56, %v924_v56  ;;  %v1011_v45 = vpack.c.bf16 %v993_v57, %v993_v57  ;;  %v1392_v53 = vpop.permute.xlu1 %1391 }
  0xdd   :  { %v1510_v52 = vsel %vm779_vm0, %v1223_v19, %v1280_v13  ;;  %v995_v13 = vld [vmem:[#allocation2 + $0x50] sm:$0xff] }
  0xde   :  { %1990 = vmatmul.bf16.gmra.mxu1 %v1506_v44  ;;  %2039 = vmatmul.bf16.vlgmr.msrb.gmra.mxu2 %v1538_v48  ;;  %v941_v44 = vpack.c.bf16 %v923_v26, %v923_v26  ;;  %v1582_v48 = vsel %vm779_vm0, %v1409_v37, %v4860_v14  ;;  %v1212_v5 = vunpack.c.l.b16 %v942_v54  ;;  %v1317_v6 = vunpack.c.l.b16 %v1011_v45  ;;  %v1000_v54 = vld [vmem:[#allocation2 + $0x78] sm:$0xff] }
  0xdf   :  { %v1410_v14 = vpack.c.b16 %v4744_v2, %v4869_v47  ;;  %v1014_v2 = vpack.c.bf16 %v996_v38, %v996_v38  ;;  %v1016_v37 = vpack.c.bf16 %v998_v59, %v998_v59  ;;  %v1459_v26 = vpack.c.b16 %v4773_v34, %v4739_v61  ;;  %v1002_v38 = vld [vmem:[#allocation2 + $0x88] sm:$0xff] }
  0xe0   :  { %v1211_v63 = vunpack.c.l.b16 %v941_v44  ;;  %v1458_v47 = vpack.c.b16 %v4737_v60, %v1212_v5  ;;  %v1440_v39 = vpop.permute.xlu2 %1439  ;;  %v1018_v50 = vpack.c.bf16 %v1000_v54, %v1000_v54 }
  0xe1   :  { %v1586_v18 = vsel %vm779_vm0, %v1410_v14, %v1438_v8  ;;  %v1320_v25 = vunpack.c.l.b16 %v1014_v2  ;;  %v1590_v29 = vsel %vm779_vm0, %v1411_v27, %v1440_v39  ;;  %v1413_v8 = vpack.c.b16 %v4856_v4, %v4828_v31 }
  0xe2   :  { %v1457_v62 = vpack.c.b16 %v1211_v63, %v1210_v9  ;;  %v1225_v10 = vpack.c.b16 %v1212_v5, %v1211_v63  ;;  %v997_v9 = vld [vmem:[#allocation2 + $0x60] sm:$0xff]  ;;  %v1324_v14 = vunpack.c.l.b16 %v1018_v50  ;;  %v1020_v2 = vpack.c.bf16 %v1002_v38, %v1002_v38 }
  0xe3   :  { %v1015_v33 = vpack.c.bf16 %v997_v9, %v997_v9 }
  0xe4   :  { %4177 = vmatmul.msk.bf16.vlgmr.msrb.gmra.mxu0 %vm779_vm0, %v1455_v7  ;;  %v1282_v32 = vpop.permute.xlu0 %1281  ;;  %v1318_v7 = vunpack.c.l.b16 %v1012_v41  ;;  %v1017_v41 = vpack.c.bf16 %v999_v58, %v999_v58 }
  0xe5   :  { %v1514_v55 = vsel %vm779_vm0, %v1224_v40, %v1282_v32  ;;  %v1321_v42 = vunpack.c.l.b16 %v1015_v33  ;;  %v1322_v32 = vunpack.c.l.b16 %v1016_v37 }
  0xe6   :  { %v1332_v12 = vpack.c.b16 %v1318_v7, %v1317_v6  ;;  %v1323_v7 = vunpack.c.l.b16 %v1017_v41 }
  0xe8   :  { %v1550_v22 = vsel %vm779_vm0, %v1332_v12, %v1390_v17  ;;  %v1442_v44 = vpop.permute.xlu2 %1441 }
  0xe9   :  { %v1594_v63 = vsel %vm779_vm0, %v1412_v43, %v1442_v44  ;;  %v1004_v44 = vld [vmem:[#allocation2 + $0x98] sm:$0xff] }
  0xec   :  { %2098 = vmatmul.bf16.gmra.mxu3 %v1578_v23  ;;  %v1284_v16 = vpop.permute.xlu0 %1283 }
  0xed   :  { %v1518_v19 = vsel %vm779_vm0, %v1225_v10, %v1284_v16  ;;  %v1335_v16 = vpack.c.b16 %v1324_v14, %v1323_v7 }
  0xee   :  { %1995 = vmatmul.bf16.gmra.mxu1 %v1510_v52  ;;  %2044 = vmatmul.bf16.gmra.mxu2 %v1542_v15  ;;  %v1013_v52 = vpack.c.bf16 %v995_v13, %v995_v13  ;;  %v1001_v13 = vld [vmem:[#allocation2 + $0x80] sm:$0xff] }
  0xef   :  { %v1019_v4 = vpack.c.bf16 %v1001_v13, %v1001_v13 }
  0xf0   :  { %v1319_v15 = vunpack.c.l.b16 %v1013_v52  ;;  %v1444_v10 = vpop.permute.xlu2 %1443 }
  0xf2   :  { %v1333_v1 = vpack.c.b16 %v1320_v25, %v1319_v15 }
  0xf4   :  { %4178 = vmatmul.msk.bf16.gmra.mxu0 %vm779_vm0, %v1456_v35  ;;  %v1554_v35 = vsel %vm779_vm0, %v1333_v1, %v1392_v53  ;;  %v1325_v1 = vunpack.c.l.b16 %v1019_v4  ;;  %v1326_v53 = vunpack.c.l.b16 %v1020_v2 }
  0xfc   :  { %2103 = vmatmul.bf16.gmra.mxu3 %v1582_v48 }
  0xfe   :  { %2000 = vmatmul.bf16.gmra.mxu1 %v1514_v55  ;;  %2049 = vmatmul.bf16.gmra.mxu2 %v1546_v24  ;;  %v1334_v55 = vpack.c.b16 %v1322_v32, %v1321_v42  ;;  %v1394_v24 = vpop.permute.xlu1 %1393  ;;  %v1061_v42 = vld [vmem:[#allocation2 + $0xa3] sm:$0xff] }
 0x100   :  { %v1558_v57 = vsel %vm779_vm0, %v1334_v55, %v1394_v24  ;;  %v1064_v55 = vpack.c.bf16 %v1061_v42, %v1061_v42 }
 0x102   :  { %v4906_v23 = vpop.f32.mrf.mxu0  ;;  %v1406_v50 = vunpack.c.l.b16 %v1064_v55 }
 0x104   :  { %4179 = vmatmul.msk.bf16.gmra.mxu0 %vm779_vm0, %v1457_v62 }
 0x10a   :  { %v4912_v28 = vpop.f32.mrf.mxu0 }
 0x10c   :  { %2108 = vmatmul.bf16.gmra.mxu3 %v1586_v18  ;;  %v1598_v18 = vsel %vm779_vm0, %v1413_v8, %v1444_v10  ;;  %v1072_v8 = vld [vmem:[#allocation2 + $0x9d] sm:$0xff]  ;;  %v1073_v10 = vld [vmem:[#allocation2 + $0xa5] sm:$0xff] }
 0x10e   :  { %2005 = vmatmul.bf16.gmra.mxu1 %v1518_v19  ;;  %2054 = vmatmul.bf16.gmra.mxu2 %v1550_v22  ;;  %v1059_v19 = vld [vmem:[#allocation2 + $0x93] sm:$0xff] }
 0x10f   :  { %v1396_v17 = vpop.permute.xlu1 %1395  ;;  %v1062_v52 = vpack.c.bf16 %v1059_v19, %v1059_v19 }
 0x110   :  { %v1562_v22 = vsel %vm779_vm0, %v1335_v16, %v1396_v17 }
 0x111   :  { %v1404_v27 = vunpack.c.l.b16 %v1062_v52 }
 0x114   :  { %4180 = vmatmul.msk.bf16.gmra.mxu0 %vm779_vm0, %v1458_v47  ;;  %v1461_v47 = vpack.c.b16 %v4850_v20, %v4821_v51 }
 0x11c   :  { %2113 = vmatmul.bf16.gmra.mxu3 %v1590_v29  ;;  %v1414_v29 = vpack.c.b16 %v1404_v27, %v4858_v11  ;;  %v1003_v11 = vld [vmem:[#allocation2 + $0x90] sm:$0xff] }
 0x11d   :  { %v1446_v9 = vpop.permute.xlu2 %1445  ;;  %v1398_v33 = vpop.permute.xlu1 %1397 }
 0x11e   :  { %2059 = vmatmul.bf16.gmra.mxu2 %v1554_v35  ;;  %v1071_v35 = vld [vmem:[#allocation2 + $0x95] sm:$0xff]  ;;  %v1602_v51 = vsel %vm779_vm0, %v1414_v29, %v1446_v9 }
 0x11f   :  { %v2011_v60 = vpop.f32.mrf.mxu3  ;;  %v1074_v37 = vpack.c.bf16 %v1071_v35, %v1071_v35 }
 0x121   :  { %v1957_v3 = vpop.f32.mrf.mxu2  ;;  %v4918_v46 = vpop.f32.mrf.mxu0  ;;  %v1452_v43 = vunpack.c.l.b16 %v1074_v37 }
 0x122   :  { %v4920_v40 = vadd.f32 %v2011_v60, %v1957_v3  ;;  %v1336_v60 = vpack.c.b16 %v1326_v53, %v1325_v1  ;;  %v1060_v3 = vld [vmem:[#allocation2 + $0x9b] sm:$0xff] }
 0x123   :  { %v1462_v58 = vpack.c.b16 %v1452_v43, %v4852_v21  ;;  %v1075_v21 = vpack.c.bf16 %v1072_v8, %v1072_v8 }
 0x124   :  { %4181 = vmatmul.msk.bf16.gmra.mxu0 %vm779_vm0, %v1459_v26  ;;  %v1566_v32 = vsel %vm779_vm0, %v1336_v60, %v1398_v33 }
 0x125   :  { %v1400_v19 = vpop.permute.xlu1 %1399  ;;  %v1453_v2 = vunpack.c.l.b16 %v1075_v21 }
 0x127   :  { %v2013_v48 = vpop.f32.mrf.mxu3 }
 0x129   :  { %v1959_v56 = vpop.f32.mrf.mxu2  ;;  %v4926_v61 = vpop.f32.mrf.mxu0 }
 0x12a   :  { %v4928_v34 = vadd.f32 %v2013_v48, %v1959_v56  ;;  %v1063_v48 = vpack.c.bf16 %v1060_v3, %v1060_v3  ;;  %v1022_v56 = vpack.c.bf16 %v1004_v44, %v1004_v44 }
 0x12c   :  { %2118 = vmatmul.bf16.gmra.mxu3 %v1594_v63  ;;  %v1021_v63 = vpack.c.bf16 %v1003_v11, %v1003_v11  ;;  %v1405_v41 = vunpack.c.l.b16 %v1063_v48  ;;  %v1328_v7 = vunpack.c.l.b16 %v1022_v56  ;;  %v1448_v16 = vpop.permute.xlu2 %1447 }
 0x12e   :  { %2064 = vmatmul.bf16.gmra.mxu2 %v1558_v57  ;;  %v1415_v14 = vpack.c.b16 %v1406_v50, %v1405_v41 }
 0x12f   :  { %v2016_v45 = vpop.f32.mrf.mxu3 }
 0x130   :  { %v1606_v13 = vsel %vm779_vm0, %v1415_v14, %v1448_v16 }
 0x131   :  { %v1962_v62 = vpop.f32.mrf.mxu2  ;;  %v4933_v5 = vpop.f32.mrf.mxu0 }
 0x132   :  { %v4935_v6 = vadd.f32 %v2016_v45, %v1962_v62  ;;  %v1327_v62 = vunpack.c.l.b16 %v1021_v63 }
 0x134   :  { %4182 = vmatmul.msk.bf16.gmra.mxu0 %vm779_vm0, %v1460_v30 }
 0x137   :  { %v4940_v12 = vpop.f32.mrf.mxu3 }
 0x139   :  { %v4943_v36 = vpop.f32.mrf.mxu2  ;;  %v4945_v49 = vpop.f32.mrf.mxu0 }
 0x13c   :  { %2123 = vmatmul.bf16.gmra.mxu3 %v1598_v18  ;;  %v1337_v18 = vpack.c.b16 %v1328_v7, %v1327_v62 }
 0x13e   :  { %2069 = vmatmul.bf16.gmra.mxu2 %v1562_v22  ;;  %v1076_v22 = vpack.c.bf16 %v1073_v10, %v1073_v10  ;;  %v1570_v4 = vsel %vm779_vm0, %v1337_v18, %v1400_v19 }
 0x13f   :  { %v2021_v31 = vpop.f32.mrf.mxu3 }
 0x141   :  { %v1967_v15 = vpop.f32.mrf.mxu2  ;;  %v4950_v25 = vpop.f32.mrf.mxu0 }
 0x142   :  { %v4952_v39 = vadd.f32 %v2021_v31, %v1967_v15 }
 0x144   :  { %4183 = vmatmul.msk.bf16.gmra.mxu0 %vm779_vm0, %v1461_v47  ;;  %v1454_v47 = vunpack.c.l.b16 %v1076_v22 }
 0x146   :  { %v1463_v1 = vpack.c.b16 %v1454_v47, %v1453_v2 }
 0x147   :  { %v4956_v59 = vpop.f32.mrf.mxu3 }
 0x149   :  { %v4959_v20 = vpop.f32.mrf.mxu2  ;;  %v4961_v26 = vpop.f32.mrf.mxu0 }
 0x14b   :  { %v1986_v57 = vpop.f32.mrf.mxu1 }
 0x14c   :  { %2128 = vmatmul.bf16.gmra.mxu3 %v1602_v51  ;;  %v1987_v27 = vadd.f32 %v1986_v57, %v4906_v23 }
 0x14e   :  { %2074 = vmatmul.bf16.gmra.mxu2 %v1566_v32 }
 0x14f   :  { %v2026_v24 = vpop.f32.mrf.mxu3 }
 0x151   :  { %v1972_v54 = vpop.f32.mrf.mxu2  ;;  %v4965_v45 = vpop.f32.mrf.mxu0 }
 0x152   :  { %v4967_v30 = vadd.f32 %v2026_v24, %v1972_v54 }
 0x153   :  { %v4977_v31 = vpop.f32.mrf.mxu1 }
 0x154   :  { %4184 = vmatmul.msk.bf16.gmra.mxu0 %vm779_vm0, %v1462_v58 }
 0x157   :  { %v4970_v17 = vpop.f32.mrf.mxu3 }
 0x159   :  { %v4973_v38 = vpop.f32.mrf.mxu2  ;;  %v4975_v52 = vpop.f32.mrf.mxu0 }
 0x15b   :  { %v1991_v9 = vpop.f32.mrf.mxu1 }
 0x15c   :  { %2133 = vmatmul.bf16.gmra.mxu3 %v1606_v13  ;;  %v1992_v43 = vadd.f32 %v1991_v9, %v4918_v46 }
 0x15e   :  { %2079 = vmatmul.bf16.gmra.mxu2 %v1570_v4 }
 0x15f   :  { %v2094_v15 = vpop.f32.mrf.mxu3 }
 0x161   :  { %v2040_v53 = vpop.f32.mrf.mxu2  ;;  %v2148_v29 = vpop.f32.mrf.mxu0 }
 0x162   :  { %v2041_v35 = vadd.f32 %v2040_v53, %v1987_v27 }
 0x163   :  { %v1993_v42 = vpop.f32.mrf.mxu1 }
 0x164   :  { %v2095_v60 = vadd.f32 %v2094_v15, %v2041_v35  ;;  %4185 = vmatmul.msk.bf16.gmra.mxu0 %vm779_vm0, %v1463_v1 }
 0x166   :  { %v4982_v33 = vadd.f32 %v2148_v29, %v2095_v60 }
 0x167   :  { %v2096_v37 = vpop.f32.mrf.mxu3 }
 0x169   :  { %v2042_v51 = vpop.f32.mrf.mxu2  ;;  %v2150_v3 = vpop.f32.mrf.mxu0 }
 0x16b   :  { %v1996_v63 = vpop.f32.mrf.mxu1 }
 0x16c   :  { %v1997_v54 = vadd.f32 %v1996_v63, %v4933_v5 }
 0x16f   :  { %v2099_v32 = vpop.f32.mrf.mxu3 }
 0x171   :  { %v2045_v11 = vpop.f32.mrf.mxu2  ;;  %v2153_v44 = vpop.f32.mrf.mxu0 }
 0x172   :  { %v2046_v23 = vadd.f32 %v2045_v11, %v1992_v43  ;;  %v18_v11 = vlaneseq }
 0x173   :  { %v1998_v7 = vpop.f32.mrf.mxu1 }
 0x174   :  { %v2100_v48 = vadd.f32 %v2099_v32, %v2046_v23  ;;  %v1989_v23 = vadd.f32 %v4977_v31, %v4912_v28 }
 0x176   :  { %v4985_v55 = vadd.f32 %v2153_v44, %v2100_v48  ;;  %v5023_v48 = vshrl.u32 %v18_v11, 7  ;;  %v2193_v11 = vmul.f32 0.0, %v4982_v33 }
 0x177   :  { %v2101_v24 = vpop.f32.mrf.mxu3 }
 0x178   :  { %v22_v31 = vadd.s32 24, %v5023_v48 }
 0x179   :  { %v2047_v56 = vpop.f32.mrf.mxu2  ;;  %v4987_v57 = vpop.f32.mrf.mxu0 }
 0x17a   :  { %vm94_vm4 = vcmp.ge.s32.totalorder %v22_v31, 25  ;;  %v2211_v31 = vsel %vm779_vm0, %v2193_v11, 0.0 }
 0x17b   :  { %v2001_v18 = vpop.f32.mrf.mxu1 }
 0x17c   :  { %v2002_v21 = vadd.f32 %v2001_v18, %v4950_v25  ;;  %v21_v18 = vadd.s32 16, %v5023_v48 }
 0x17e   :  { %vm57_vm3 = vcmp.lt.s32.totalorder %v21_v18, 23 }
 0x17f   :  { %v2104_v58 = vpop.f32.mrf.mxu3 }
 0x181   :  { %v2050_v41 = vpop.f32.mrf.mxu2  ;;  %v2158_v50 = vpop.f32.mrf.mxu0 }
 0x182   :  { %v2051_v62 = vadd.f32 %v2050_v41, %v1997_v54 }
 0x183   :  { %v2003_v44 = vpop.f32.mrf.mxu1 }
 0x184   :  { %v2105_v14 = vadd.f32 %v2104_v58, %v2051_v62  ;;  %v2043_v58 = vadd.f32 %v2042_v51, %v1989_v23  ;;  %v23_v51 = vadd.s32 32, %v5023_v48  ;;  %v5053_v23 = vsel %vm57_vm3, 1.0, %v4433_v0 }
 0x185   :  { %6088 = vst [vmem:[#allocation4_spill] sm:$0xff] %v5053_v23 }
 0x186   :  { %v4990_v46 = vadd.f32 %v2158_v50, %v2105_v14  ;;  %v20_v50 = vadd.s32 8, %v5023_v48  ;;  %v2097_v62 = vadd.f32 %v2096_v37, %v2043_v58  ;;  %v1994_v14 = vadd.f32 %v1993_v42, %v4926_v61 }
 0x187   :  { %v4992_v8 = vpop.f32.mrf.mxu3  ;;  %v1999_v61 = vadd.f32 %v1998_v7, %v4945_v49  ;;  %vm113_vm5 = vcmp.lt.s32.totalorder %v23_v51, 35  ;;  %vm167_vm6 = vcmp.ge.s32.totalorder %v23_v51, 37  ;;  %v2004_v58 = vadd.f32 %v2003_v44, %v4961_v26 }
 0x188   :  { %vm38_vm2 = vcmp.ge.s32.totalorder %v20_v50, 13  ;;  %v2048_v28 = vadd.f32 %v2047_v56, %v1994_v14  ;;  %v24_v56 = vadd.s32 40, %v5023_v48  ;;  %v26_v49 = vadd.s32 56, %v5023_v48  ;;  %vm221_vm7 = vmor %vm113_vm5, %vm167_vm6 }
 0x189   :  { %v2052_v10 = vpop.f32.mrf.mxu2  ;;  %v4994_v16 = vpop.f32.mrf.mxu0  ;;  %v5045_v37 = vsel %vm38_vm2, 1.0, %v4433_v0  ;;  %v2195_v14 = vmul.f32 %v5053_v23, %v4985_v55 }
 0x18a   :  { %6087 = vst [vmem:[#allocation3_spill] sm:$0xff] %v5045_v37  ;;  %v2102_v42 = vadd.f32 %v2101_v24, %v2048_v28  ;;  %v5060_v24 = vsel %vm94_vm4, 1.0, %v4433_v0  ;;  %vm186_vm8 = vcmp.lt.s32.totalorder %v24_v56, 47  ;;  %vm260_vm9 = vcmp.lt.s32.totalorder %v26_v49, 59 }
 0x18b   :  { %vm314_vm10 = vcmp.ge.s32.totalorder %v26_v49, 61 }
 0x18c   :  { %v5063_v50 = vadd.f32 %v4987_v57, %v2102_v42  ;;  %v5074_v57 = vsel %vm221_vm7, 1.0, %v4433_v0  ;;  %vm368_vm12 = vmor %vm260_vm9, %vm314_vm10 }
 0x18d   :  { %6089 = vst [vmem:[#allocation5_spill] sm:$0xff] %v5074_v57 }
 0x18e   :  { %v2196_v56 = vmul.f32 %v5060_v24, %v5063_v50 }
 0x18f   :  { %v2109_v19 = vpop.f32.mrf.mxu3 }
 0x191   :  { %v2055_v22 = vpop.f32.mrf.mxu2  ;;  %v2163_v13 = vpop.f32.mrf.mxu0 }
 0x192   :  { %v2056_v4 = vadd.f32 %v2055_v22, %v2002_v21  ;;  %v2006_v21 = vpop.f32.mrf.mxu1  ;;  %v5037_v22 = vadd.f32 %v2150_v3, %v2097_v62 }
 0x194   :  { %v2110_v5 = vadd.f32 %v2109_v19, %v2056_v4  ;;  %v2194_v3 = vmul.f32 %v5045_v37, %v5037_v22 }
 0x196   :  { %v4997_v2 = vadd.f32 %v2163_v13, %v2110_v5  ;;  %v2053_v5 = vadd.f32 %v2052_v10, %v1999_v61  ;;  %v25_v10 = vadd.s32 48, %v5023_v48  ;;  %v2212_v62 = vsel %vm779_vm0, %v2194_v3, 0.0 }
 0x197   :  { %v4999_v47 = vpop.f32.mrf.mxu3  ;;  %v5077_v61 = vsel %vm186_vm8, 1.0, %v4433_v0  ;;  %v2213_v42 = vadd.f32 %v2212_v62, %v2211_v31  ;;  %v27_v62 = vadd.s32 64, %v5023_v48 }
 0x198   :  { %v2107_v26 = vadd.f32 %v4992_v8, %v2053_v5  ;;  %v2007_v8 = vadd.f32 %v2006_v21, %v4965_v45  ;;  %vm241_vm11 = vcmp.ge.s32.totalorder %v25_v10, 49  ;;  %v29_v45 = vadd.s32 80, %v5023_v48 }
 0x199   :  { %v2057_v15 = vpop.f32.mrf.mxu2  ;;  %v5001_v27 = vpop.f32.mrf.mxu0  ;;  %vm333_vm13 = vcmp.lt.s32.totalorder %v27_v62, 71 }
 0x19a   :  { %v2058_v44 = vadd.f32 %v2057_v15, %v2004_v58  ;;  %v2008_v51 = vpop.f32.mrf.mxu1  ;;  %v2214_v15 = vsel %vm779_vm0, %v2195_v14, 0.0  ;;  %v5084_v3 = vadd.f32 %v4994_v16, %v2107_v26  ;;  %v2197_v58 = vmul.f32 %v5074_v57, %v4990_v46 }
 0x19b   :  { %v2009_v5 = vadd.f32 %v2008_v51, %v4975_v52  ;;  %v2215_v16 = vadd.f32 %v2214_v15, %v2213_v42  ;;  %v2216_v14 = vsel %vm779_vm0, %v2196_v56, 0.0  ;;  %v5098_v52 = vsel %vm241_vm11, 1.0, %v4433_v0 }
 0x19c   :  { %v2112_v11 = vadd.f32 %v4999_v47, %v2058_v44  ;;  %v28_v47 = vadd.s32 72, %v5023_v48  ;;  %v2198_v26 = vmul.f32 %v5077_v61, %v5084_v3  ;;  %v2218_v42 = vsel %vm779_vm0, %v2197_v58, 0.0 }
 0x19d   :  { %vm407_vm14 = vcmp.lt.s32.totalorder %v29_v45, 83  ;;  %vm461_vm15 = vcmp.ge.s32.totalorder %v29_v45, 85  ;;  %v5131_v58 = vsel %vm333_vm13, 1.0, %v4433_v0 }
 0x19e   :  { %v5107_v44 = vadd.f32 %v5001_v27, %v2112_v11  ;;  %v30_v27 = vadd.s32 88, %v5023_v48  ;;  %vm388_vm1 = vcmp.ge.s32.totalorder %v28_v47, 73  ;;  %v2220_v11 = vsel %vm779_vm0, %v2198_v26, 0.0  ;;  %vm515_vm2 = vmor %vm407_vm14, %vm461_vm15 }
 0x19f   :  { %v5003_v1 = vpop.f32.mrf.mxu3 }
 0x1a0   :  { %vm480_vm3 = vcmp.lt.s32.totalorder %v30_v27, 95 }
 0x1a1   :  { %v5005_v53 = vpop.f32.mrf.mxu2  ;;  %v5007_v29 = vpop.f32.mrf.mxu0  ;;  %v5160_v26 = vsel %vm480_vm3, 1.0, %v4433_v0 }
 0x1a2   :  { %v2061_v49 = vadd.f32 %v5005_v53, %v2007_v8  ;;  %v5104_v53 = vsel %vm368_vm12, 1.0, %v4433_v0  ;;  %6090 = vst [vmem:[#allocation6_spill] sm:$0xff] %v5160_v26 }
 0x1a4   :  { %v2115_v56 = vadd.f32 %v5003_v1, %v2061_v49  ;;  %v2199_v1 = vmul.f32 %v5098_v52, %v4997_v2 }
 0x1a7   :  { %v5009_v35 = vpop.f32.mrf.mxu3 }
 0x1a9   :  { %v5011_v25 = vpop.f32.mrf.mxu2  ;;  %v5013_v9 = vpop.f32.mrf.mxu0 }
 0x1aa   :  { %v2063_v21 = vadd.f32 %v5011_v25, %v2009_v5  ;;  %v2217_v5 = vadd.f32 %v2216_v14, %v2215_v16  ;;  %v2222_v16 = vsel %vm779_vm0, %v2199_v1, 0.0 }
 0x1ac   :  { %v2117_v8 = vadd.f32 %v5009_v35, %v2063_v21  ;;  %v2200_v35 = vmul.f32 %v5104_v53, %v5107_v44  ;;  %v5146_v21 = vsel %vm388_vm1, 1.0, %v4433_v0 }
 0x1af   :  { %v5015_v60 = vpop.f32.mrf.mxu3 }
 0x1b1   :  { %v5017_v32 = vpop.f32.mrf.mxu2  ;;  %v5019_v43 = vpop.f32.mrf.mxu0 }
 0x1b2   :  { %v2066_v25 = vadd.f32 %v5017_v32, %v4920_v40  ;;  %v2019_v40 = vadd.f32 %v4940_v12, %v4943_v36  ;;  %v2024_v32 = vadd.f32 %v4956_v59, %v4959_v20  ;;  %v5134_v12 = vadd.f32 %v5007_v29, %v2115_v56 }
 0x1b3   :  { %v5140_v59 = vadd.f32 %v5013_v9, %v2117_v8  ;;  %v31_v29 = vadd.s32 96, %v5023_v48  ;;  %v5152_v9 = vsel %vm515_vm2, 1.0, %v4433_v0  ;;  %v33_v8 = vadd.s32 112, %v5023_v48 }
 0x1b4   :  { %v2201_v47 = vmul.f32 %v5131_v58, %v5134_v12 }
 0x1b5   :  { %vm535_vm6 = vcmp.ge.s32.totalorder %v31_v29, 97  ;;  %vm627_vm8 = vcmp.lt.s32.totalorder %v33_v8, 119 }
 0x1b6   :  { %v5201_v29 = vsel %vm627_vm8, 1.0, %v4433_v0 }
 0x1b7   :  { %v5025_v63 = vpop.f32.mrf.mxu3  ;;  %6093 = vst [vmem:[#allocation9_spill] sm:$0xff] %v5201_v29 }
 0x1b9   :  { %v5027_v54 = vpop.f32.mrf.mxu2  ;;  %v5029_v41 = vpop.f32.mrf.mxu0 }
 0x1ba   :  { %v2068_v15 = vadd.f32 %v5027_v54, %v4928_v34  ;;  %v2120_v34 = vadd.f32 %v5015_v60, %v2066_v25  ;;  %v2219_v54 = vadd.f32 %v2218_v42, %v2217_v5  ;;  %v32_v60 = vadd.s32 104, %v5023_v48 }
 0x1bb   :  { %v2202_v42 = vmul.f32 %v5146_v21, %v5140_v59 }
 0x1bc   :  { %v2122_v20 = vadd.f32 %v5025_v63, %v2068_v15  ;;  %v2221_v62 = vadd.f32 %v2220_v11, %v2219_v54  ;;  %v5155_v63 = vadd.f32 %v5019_v43, %v2120_v34  ;;  %vm554_vm4 = vcmp.lt.s32.totalorder %v32_v60, 107 }
 0x1bd   :  { %vm608_vm5 = vcmp.ge.s32.totalorder %v32_v60, 109  ;;  %v5183_v11 = vsel %vm535_vm6, 1.0, %v4433_v0 }
 0x1be   :  { %v5167_v56 = vadd.f32 %v5029_v41, %v2122_v20  ;;  %v2223_v27 = vadd.f32 %v2222_v16, %v2221_v62  ;;  %vm662_vm7 = vmor %vm554_vm4, %vm608_vm5  ;;  %6091 = vst [vmem:[#allocation7_spill] sm:$0xff] %v5183_v11 }
 0x1bf   :  { %v5034_v19 = vpop.f32.mrf.mxu3  ;;  %v5191_v54 = vsel %vm662_vm7, 1.0, %v4433_v0 }
 0x1c0   :  { %6092 = vst [vmem:[#allocation8_spill] sm:$0xff] %v5191_v54 }
 0x1c1   :  { %v5040_v13 = vpop.f32.mrf.mxu2  ;;  %v5042_v4 = vpop.f32.mrf.mxu0 }
 0x1c2   :  { %v2071_v36 = vadd.f32 %v5040_v13, %v4935_v6  ;;  %v2224_v6 = vsel %vm779_vm0, %v2200_v35, 0.0  ;;  %v35_v35 = vadd.s32 128, %v5023_v48 }
 0x1c3   :  { %v2225_v5 = vadd.f32 %v2224_v6, %v2223_v27 }
 0x1c4   :  { %vm701_vm10 = vcmp.lt.s32.totalorder %v35_v35, 131 }
 0x1c7   :  { %v5057_v7 = vpop.f32.mrf.mxu3 }
 0x1c9   :  { %v2072_v18 = vpop.f32.mrf.mxu2  ;;  %v5070_v28 = vpop.f32.mrf.mxu0 }
 0x1ca   :  { %v2073_v45 = vadd.f32 %v2072_v18, %v2019_v40  ;;  %v2125_v18 = vadd.f32 %v5034_v19, %v2071_v36  ;;  %v2203_v19 = vmul.f32 %v5152_v9, %v5155_v63  ;;  %v34_v40 = vadd.s32 120, %v5023_v48 }
 0x1cc   :  { %v2127_v43 = vadd.f32 %v5057_v7, %v2073_v45  ;;  %v2228_v7 = vsel %vm779_vm0, %v2202_v42, 0.0  ;;  %vm682_vm9 = vcmp.ge.s32.totalorder %v34_v40, 121 }
 0x1ce   :  { %v5186_v1 = vadd.f32 %v5070_v28, %v2127_v43  ;;  %v5216_v43 = vsel %vm701_vm10, 1.0, %v4433_v0 }
 0x1cf   :  { %v5094_v10 = vpop.f32.mrf.mxu3  ;;  %6095 = vst [vmem:[#allocation11_spill] sm:$0xff] %v5216_v43 }
 0x1d0   :  { %v2206_v16 = vmul.f32 %v5191_v54, %v5186_v1 }
 0x1d1   :  { %v2075_v31 = vpop.f32.mrf.mxu2  ;;  %v5111_v51 = vpop.f32.mrf.mxu0 }
 0x1d2   :  { %v2076_v25 = vadd.f32 %v2075_v31, %v4952_v39  ;;  %v2226_v39 = vsel %vm779_vm0, %v2201_v47, 0.0  ;;  %v5175_v31 = vadd.f32 %v5042_v4, %v2125_v18  ;;  %v2236_v8 = vsel %vm779_vm0, %v2206_v16, 0.0 }
 0x1d3   :  { %v2227_v34 = vadd.f32 %v2226_v39, %v2225_v5 }
 0x1d4   :  { %v2130_v41 = vadd.f32 %v5094_v10, %v2076_v25  ;;  %v2230_v10 = vsel %vm779_vm0, %v2203_v19, 0.0  ;;  %v2205_v60 = vmul.f32 %v5183_v11, %v5175_v31 }
 0x1d6   :  { %v5196_v62 = vadd.f32 %v5111_v51, %v2130_v41  ;;  %v5208_v51 = vsel %vm682_vm9, 1.0, %v4433_v0 }
 0x1d7   :  { %v2131_v49 = vpop.f32.mrf.mxu3  ;;  %6094 = vst [vmem:[#allocation10_spill] sm:$0xff] %v5208_v51 }
 0x1d8   :  { %v2207_v18 = vmul.f32 %v5201_v29, %v5196_v62 }
 0x1d9   :  { %v2077_v13 = vpop.f32.mrf.mxu2  ;;  %v2185_v14 = vpop.f32.mrf.mxu0 }
 0x1da   :  { %v2078_v15 = vadd.f32 %v2077_v13, %v2024_v32  ;;  %v2204_v32 = vmul.f32 %v5160_v26, %v5167_v56  ;;  %v2238_v39 = vsel %vm779_vm0, %v2207_v18, 0.0 }
 0x1dc   :  { %v2132_v4 = vadd.f32 %v2131_v49, %v2078_v15  ;;  %v2229_v49 = vadd.f32 %v2228_v7, %v2227_v34  ;;  %v2232_v48 = vsel %vm779_vm0, %v2204_v32, 0.0 }
 0x1de   :  { %v5205_v6 = vadd.f32 %v2185_v14, %v2132_v4  ;;  %v2231_v47 = vadd.f32 %v2230_v10, %v2229_v49  ;;  %v2029_v14 = vadd.f32 %v4970_v17, %v4973_v38 }
 0x1df   :  { %v2134_v36 = vpop.f32.mrf.mxu3 }
 0x1e0   :  { %v2233_v42 = vadd.f32 %v2232_v48, %v2231_v47  ;;  %v2208_v15 = vmul.f32 %v5208_v51, %v5205_v6 }
 0x1e1   :  { %v2080_v20 = vpop.f32.mrf.mxu2  ;;  %v2188_v45 = vpop.f32.mrf.mxu0 }
 0x1e2   :  { %v2081_v28 = vadd.f32 %v2080_v20, %v4967_v30  ;;  %v2234_v30 = vsel %vm779_vm0, %v2205_v60, 0.0  ;;  %v2240_v0 = vsel %vm779_vm0, %v2208_v15, 0.0 }
 0x1e3   :  { %v2235_v27 = vadd.f32 %v2234_v30, %v2233_v42 }
 0x1e4   :  { %v2135_v13 = vadd.f32 %v2134_v36, %v2081_v28 }
 0x1e5   :  { %v2237_v5 = vadd.f32 %v2236_v8, %v2235_v27 }
 0x1e6   :  { %v5213_v25 = vadd.f32 %v2188_v45, %v2135_v13 }
 0x1e7   :  { %v2136_v7 = vpop.f32.mrf.mxu3  ;;  %v2239_v4 = vadd.f32 %v2238_v39, %v2237_v5 }
 0x1e8   :  { %v2209_v41 = vmul.f32 %v5216_v43, %v5213_v25 }
 0x1e9   :  { %v2082_v19 = vpop.f32.mrf.mxu2  ;;  %v2190_v17 = vpop.f32.mrf.mxu0  ;;  %v2241_v34 = vadd.f32 %v2240_v0, %v2239_v4 }
 0x1ea   :  { %v2083_v40 = vadd.f32 %v2082_v19, %v2029_v14  ;;  %v2242_v38 = vsel %vm779_vm0, %v2209_v41, 0.0 }
 0x1eb   :  { %v2243_v36 = vadd.f32 %v2242_v38, %v2241_v34 }
 0x1ec   :  { %v2137_v32 = vadd.f32 %v2136_v7, %v2083_v40 }
 0x1ee   :  { %v5228_v35 = vadd.f32 %v2190_v17, %v2137_v32 }
 0x1f0   :  { %v2210_v10 = vmul.f32 0.0, %v5228_v35 }
 0x1f2   :  { %v2244_v20 = vsel %vm779_vm0, %v2210_v10, 0.0 }
 0x1f3   :  { %v2245_v60 = vadd.f32 %v2244_v20, %v2243_v36 }
 0x1f5   :  { %v2246_v28 = vrot.slane %v2245_v60, 4 }
 0x1f7   :  { %v2247_v49 = vadd.f32 %v2246_v28, %v2245_v60 }
 0x1f9   :  { %v2248_v48 = vrot.slane %v2247_v49, 2 }
 0x1fb   :  { %v2249_v45 = vadd.f32 %v2248_v48, %v2247_v49 }
 0x1fd   :  { %v2250_v16 = vrot.slane %v2249_v45, 1 }
 0x1ff   :  { %v2251_v13 = vadd.f32 %v2250_v16, %v2249_v45 }
 0x201   :  { %v5232_v47 = vmul.f32 0.01, %v2251_v13 }
 0x203   :  { %v2253_v30 = vsub.f32 %v4982_v33, %v5232_v47  ;;  %v2254_v18 = vsub.f32 %v5037_v22, %v5232_v47  ;;  %v2255_v42 = vsub.f32 %v4985_v55, %v5232_v47  ;;  %v2256_v14 = vsub.f32 %v5063_v50, %v5232_v47 }
 0x204   :  { %v2257_v27 = vsub.f32 %v4990_v46, %v5232_v47  ;;  %v2258_v39 = vsub.f32 %v5084_v3, %v5232_v47  ;;  %v2259_v7 = vsub.f32 %v4997_v2, %v5232_v47  ;;  %v2260_v4 = vsub.f32 %v5107_v44, %v5232_v47 }
 0x205   :  { %v2271_v8 = vmul.f32 0.0, %v2253_v30  ;;  %v2272_v15 = vmul.f32 %v5045_v37, %v2254_v18  ;;  %v2273_v19 = vmul.f32 %v5053_v23, %v2255_v42  ;;  %v2274_v41 = vmul.f32 %v5060_v24, %v2256_v14 }
 0x206   :  { %v2275_v0 = vmul.f32 %v5074_v57, %v2257_v27  ;;  %v2276_v17 = vmul.f32 %v5077_v61, %v2258_v39  ;;  %v2261_v20 = vsub.f32 %v5134_v12, %v5232_v47  ;;  %v2277_v60 = vmul.f32 %v5098_v52, %v2259_v7 }
 0x207   :  { %v2289_v40 = vmul.f32 %v2271_v8, %v2271_v8  ;;  %v2290_v5 = vmul.f32 %v2272_v15, %v2272_v15  ;;  %v2291_v32 = vmul.f32 %v2273_v19, %v2273_v19  ;;  %v2292_v38 = vmul.f32 %v2274_v41, %v2274_v41 }
 0x208   :  { %v2293_v28 = vmul.f32 %v2275_v0, %v2275_v0  ;;  %v2262_v45 = vsub.f32 %v5140_v59, %v5232_v47  ;;  %v2278_v16 = vmul.f32 %v5104_v53, %v2260_v4  ;;  %v2294_v13 = vmul.f32 %v2276_v17, %v2276_v17 }
 0x209   :  { %v2307_v34 = vsel %vm779_vm0, %v2289_v40, 0.0  ;;  %v2308_v10 = vsel %vm779_vm0, %v2290_v5, 0.0  ;;  %v2310_v49 = vsel %vm779_vm0, %v2291_v32, 0.0  ;;  %v2312_v30 = vsel %vm779_vm0, %v2292_v38, 0.0 }
 0x20a   :  { %v2309_v36 = vadd.f32 %v2308_v10, %v2307_v34  ;;  %v2263_v42 = vsub.f32 %v5155_v63, %v5232_v47  ;;  %v2279_v14 = vmul.f32 %v5131_v58, %v2261_v20  ;;  %v2295_v8 = vmul.f32 %v2277_v60, %v2277_v60 }
 0x20b   :  { %v2314_v15 = vsel %vm779_vm0, %v2293_v28, 0.0  ;;  %v2264_v19 = vsub.f32 %v5167_v56, %v5232_v47  ;;  %v2280_v39 = vmul.f32 %v5146_v21, %v2262_v45  ;;  %v2296_v41 = vmul.f32 %v2278_v16, %v2278_v16 }
 0x20c   :  { %v2311_v48 = vadd.f32 %v2310_v49, %v2309_v36  ;;  %v2316_v40 = vsel %vm779_vm0, %v2294_v13, 0.0  ;;  %v2265_v7 = vsub.f32 %v5175_v31, %v5232_v47  ;;  %v2281_v0 = vmul.f32 %v5152_v9, %v2263_v42 }
 0x20d   :  { %v2297_v32 = vmul.f32 %v2279_v14, %v2279_v14  ;;  %v2318_v4 = vsel %vm779_vm0, %v2295_v8, 0.0  ;;  %v2266_v38 = vsub.f32 %v5186_v1, %v5232_v47  ;;  %v2282_v34 = vmul.f32 %v5160_v26, %v2264_v19 }
 0x20e   :  { %v2313_v18 = vadd.f32 %v2312_v30, %v2311_v48  ;;  %v2298_v10 = vmul.f32 %v2280_v39, %v2280_v39  ;;  %v2320_v36 = vsel %vm779_vm0, %v2296_v41, 0.0  ;;  %v2267_v60 = vsub.f32 %v5196_v62, %v5232_v47 }
 0x20f   :  { %v2283_v28 = vmul.f32 %v5183_v11, %v2265_v7  ;;  %v2299_v49 = vmul.f32 %v2281_v0, %v2281_v0  ;;  %v2322_v48 = vsel %vm779_vm0, %v2297_v32, 0.0  ;;  %v2268_v16 = vsub.f32 %v5205_v6, %v5232_v47 }
 0x210   :  { %v2315_v27 = vadd.f32 %v2314_v15, %v2313_v18  ;;  %v2284_v13 = vmul.f32 %v5191_v54, %v2266_v38  ;;  %v2300_v30 = vmul.f32 %v2282_v34, %v2282_v34  ;;  %v2324_v18 = vsel %vm779_vm0, %v2298_v10, 0.0 }
 0x211   :  { %v2269_v14 = vsub.f32 %v5213_v25, %v5232_v47  ;;  %v2285_v8 = vmul.f32 %v5201_v29, %v2267_v60  ;;  %v2301_v15 = vmul.f32 %v2283_v28, %v2283_v28  ;;  %v2270_v39 = vsub.f32 %v5228_v35, %v5232_v47 }
 0x212   :  { %v2317_v5 = vadd.f32 %v2316_v40, %v2315_v27  ;;  %v2326_v27 = vsel %vm779_vm0, %v2299_v49, 0.0  ;;  %v2286_v41 = vmul.f32 %v5208_v51, %v2268_v16  ;;  %v2302_v40 = vmul.f32 %v2284_v13, %v2284_v13 }
 0x213   :  { %v2287_v0 = vmul.f32 %v5216_v43, %v2269_v14  ;;  %v2303_v32 = vmul.f32 %v2285_v8, %v2285_v8  ;;  %v2288_v38 = vmul.f32 0.0, %v2270_v39 }
 0x214   :  { %v2319_v17 = vadd.f32 %v2318_v4, %v2317_v5  ;;  %v2328_v5 = vsel %vm779_vm0, %v2300_v30, 0.0  ;;  %v2330_v4 = vsel %vm779_vm0, %v2301_v15, 0.0  ;;  %v2304_v34 = vmul.f32 %v2286_v41, %v2286_v41 }
 0x215   :  { %v2332_v10 = vsel %vm779_vm0, %v2302_v40, 0.0  ;;  %v2334_v60 = vsel %vm779_vm0, %v2303_v32, 0.0  ;;  %v2306_v49 = vmul.f32 %v2288_v38, %v2288_v38 }
 0x216   :  { %v2321_v20 = vadd.f32 %v2320_v36, %v2319_v17 }
 0x217   :  { %v2340_v30 = vsel %vm779_vm0, %v2306_v49, 0.0 }
 0x218   :  { %v2323_v45 = vadd.f32 %v2322_v48, %v2321_v20  ;;  %v2305_v20 = vmul.f32 %v2287_v0, %v2287_v0  ;;  %v2336_v48 = vsel %vm779_vm0, %v2304_v34, 0.0 }
 0x21a   :  { %v2325_v42 = vadd.f32 %v2324_v18, %v2323_v45  ;;  %v2338_v16 = vsel %vm779_vm0, %v2305_v20, 0.0 }
 0x21c   :  { %v2327_v19 = vadd.f32 %v2326_v27, %v2325_v42 }
 0x21e   :  { %v2329_v7 = vadd.f32 %v2328_v5, %v2327_v19 }
 0x220   :  { %v2331_v17 = vadd.f32 %v2330_v4, %v2329_v7  ;;  %v775_v4 = vld [vmem:[%s6067_s3] sm:$0x1] }
 0x222   :  { %v2333_v36 = vadd.f32 %v2332_v10, %v2331_v17  ;;  %v776_v10 = vld [vmem:[%s6067_s3 + $0x1] sm:$0x1] }
 0x224   :  { %v2335_v28 = vadd.f32 %v2334_v60, %v2333_v36 }
 0x226   :  { %v2337_v45 = vadd.f32 %v2336_v48, %v2335_v28 }
 0x228   :  { %v2339_v13 = vadd.f32 %v2338_v16, %v2337_v45 }
 0x22a   :  { %v2341_v18 = vadd.f32 %v2340_v30, %v2339_v13 }
 0x22c   :  { %v2342_v42 = vrot.slane %v2341_v18, 4 }
 0x22e   :  { %v2343_v14 = vadd.f32 %v2342_v42, %v2341_v18 }
 0x230   :  { %v2344_v8 = vrot.slane %v2343_v14, 2 }
 0x232   :  { %v2345_v15 = vadd.f32 %v2344_v8, %v2343_v14 }
 0x234   :  { %v2346_v27 = vrot.slane %v2345_v15, 1 }
 0x236   :  { %v2347_v19 = vadd.f32 %v2346_v27, %v2345_v15 }
 0x238   :  { %v2348_v39 = vmul.f32 0.01, %v2347_v19 }
 0x23a   :  { %v2349_v41 = vadd.f32 1e-05, %v2348_v39 }
 0x23c   :  { %4429 = vrsqrt.f32 %v2349_v41  ;;  %vm2356_vm12 = vweird.f32 %v2349_v41 }
 0x242   :  { %v4430_v40 = vpop.eup %4429 }
 0x243   :  { %v2351_v5 = vmul.f32 %v4430_v40, %v2349_v41  ;;  %vm2357_vm11 = vweird.f32 %v4430_v40 }
 0x244   :  { %vm2358_vm13 = vmor %vm2356_vm12, %vm2357_vm11 }
 0x245   :  { %v2352_v7 = vmul.f32 %v4430_v40, %v2351_v5 }
 0x247   :  { %v2353_v0 = vmul.f32 0.5, %v2352_v7 }
 0x249   :  { %v2354_v32 = vsub.f32 1.5, %v2353_v0 }
 0x24b   :  { %v2355_v17 = vmul.f32 %v4430_v40, %v2354_v32 }
 0x24d   :  { %v2359_v38 = vsel %vm2358_vm13, %v4430_v40, %v2355_v17 }
 0x24e   :  { %v2360_v34 = vmul.f32 %v2359_v38, %v775_v4 }
 0x250   :  { %v2361_v36 = vmul.f32 %v2360_v34, %v5232_v47  ;;  %v2363_v20 = vperm.slane %v2360_v34, 0 }
 0x252   :  { %v2362_v60 = vsub.f32 %v776_v10, %v2361_v36  ;;  %v2381_v28 = vmul.f32 %v2363_v20, %v5228_v35  ;;  %v2366_v48 = vmul.f32 %v2363_v20, %v4985_v55  ;;  %v2367_v45 = vmul.f32 %v2363_v20, %v5063_v50  ;;  %v2473_v10 = vld [vmem:[#allocation2 + $0x4] sm:$0xff] }
 0x253   :  { %v2368_v16 = vmul.f32 %v2363_v20, %v4990_v46  ;;  %v2364_v13 = vmul.f32 %v2363_v20, %v4982_v33  ;;  %v2365_v30 = vmul.f32 %v2363_v20, %v5037_v22  ;;  %v2372_v18 = vmul.f32 %v2363_v20, %v5134_v12 }
 0x254   :  { %v2382_v49 = vperm.slane %v2362_v60, 0  ;;  %v2373_v35 = vmul.f32 %v2363_v20, %v5140_v59  ;;  %v2374_v55 = vmul.f32 %v2363_v20, %v5155_v63  ;;  %v2370_v12 = vmul.f32 %v2363_v20, %v4997_v2 }
 0x255   :  { %v2371_v5 = vmul.f32 %v2363_v20, %v5107_v44  ;;  %v2369_v7 = vmul.f32 %v2363_v20, %v5084_v3  ;;  %v2378_v2 = vmul.f32 %v2363_v20, %v5196_v62  ;;  %v2379_v44 = vmul.f32 %v2363_v20, %v5205_v6 }
 0x256   :  { %v2400_v42 = vadd.f32 %v2382_v49, %v2381_v28  ;;  %v2385_v14 = vadd.f32 %v2382_v49, %v2366_v48  ;;  %v2386_v47 = vadd.f32 %v2382_v49, %v2367_v45  ;;  %v2387_v8 = vadd.f32 %v2382_v49, %v2368_v16 }
 0x257   :  { %v2383_v15 = vadd.f32 %v2382_v49, %v2364_v13  ;;  %v2384_v27 = vadd.f32 %v2382_v49, %v2365_v30  ;;  %v2391_v33 = vadd.f32 %v2382_v49, %v2372_v18  ;;  %v2392_v39 = vadd.f32 %v2382_v49, %v2373_v35 }
 0x258   :  { %v2418_v19 = vmul.f32 0.0, %v2400_v42  ;;  %v2403_v50 = vmul.f32 %v5053_v23, %v2385_v14  ;;  %v2404_v46 = vmul.f32 %v5060_v24, %v2386_v47  ;;  %v2405_v22 = vmul.f32 %v5074_v57, %v2387_v8 }
 0x259   :  { %v2401_v41 = vmul.f32 0.0, %v2383_v15  ;;  %v2393_v40 = vadd.f32 %v2382_v49, %v2374_v55  ;;  %v2402_v59 = vmul.f32 %v5045_v37, %v2384_v27  ;;  %v2389_v63 = vadd.f32 %v2382_v49, %v2370_v12 }
 0x25a   :  { %2436 = vst.msk [vmem:[#allocation2 + $0x98] sm:$0xff] %vm779_vm0, %v2418_v19  ;;  %v2409_v0 = vmul.f32 %v5131_v58, %v2391_v33  ;;  %v2390_v32 = vadd.f32 %v2382_v49, %v2371_v5  ;;  %v2410_v4 = vmul.f32 %v5146_v21, %v2392_v39  ;;  %v2388_v17 = vadd.f32 %v2382_v49, %v2369_v7 }
 0x25b   :  { %2421 = vst.msk [vmem:[#allocation2 + $0x20] sm:$0xff] %vm779_vm0, %v2403_v50  ;;  %v2411_v38 = vmul.f32 %v5152_v9, %v2393_v40  ;;  %v2380_v3 = vmul.f32 %v2363_v20, %v5213_v25  ;;  %v2397_v34 = vadd.f32 %v2382_v49, %v2378_v2  ;;  %v2407_v36 = vmul.f32 %v5098_v52, %v2389_v63 }
 0x25c   :  { %2422 = vst.msk [vmem:[#allocation2 + $0x28] sm:$0xff] %vm779_vm0, %v2404_v46  ;;  %v2398_v62 = vadd.f32 %v2382_v49, %v2379_v44  ;;  %v2376_v60 = vmul.f32 %v2363_v20, %v5175_v31  ;;  %v2408_v28 = vmul.f32 %v5104_v53, %v2390_v32  ;;  %v2377_v48 = vmul.f32 %v2363_v20, %v5186_v1 }
 0x25d   :  { %2423 = vst.msk [vmem:[#allocation2 + $0x30] sm:$0xff] %vm779_vm0, %v2405_v22  ;;  %v2399_v6 = vadd.f32 %v2382_v49, %v2380_v3  ;;  %v2406_v25 = vmul.f32 %v5077_v61, %v2388_v17  ;;  %v2375_v16 = vmul.f32 %v2363_v20, %v5167_v56  ;;  %v2491_v13 = vpack.c.bf16 %v2473_v10, %v2473_v10 }
 0x25e   :  { %2419 = vst.msk [vmem:[#allocation2 + $0x10] sm:$0xff] %vm779_vm0, %v2401_v41  ;;  %v2395_v45 = vadd.f32 %v2382_v49, %v2376_v60  ;;  %v2415_v30 = vmul.f32 %v5201_v29, %v2397_v34  ;;  %v2396_v31 = vadd.f32 %v2382_v49, %v2377_v48  ;;  %v2416_v42 = vmul.f32 %v5208_v51, %v2398_v62 }
 0x25f   :  { %2420 = vst.msk [vmem:[#allocation2 + $0x18] sm:$0xff] %vm779_vm0, %v2402_v59  ;;  %v2394_v14 = vadd.f32 %v2382_v49, %v2375_v16  ;;  %v2417_v8 = vmul.f32 %v5216_v43, %v2399_v6  ;;  %v2734_v50 = vunpack.c.l.b16 %v2491_v13 }
 0x260   :  { %2427 = vst.msk [vmem:[#allocation2 + $0x50] sm:$0xff] %vm779_vm0, %v2409_v0  ;;  %v2413_v20 = vmul.f32 %v5183_v11, %v2395_v45  ;;  %v2414_v49 = vmul.f32 %v5191_v54, %v2396_v31 }
 0x261   :  { %2428 = vst.msk [vmem:[#allocation2 + $0x58] sm:$0xff] %vm779_vm0, %v2410_v4  ;;  %v2412_v39 = vmul.f32 %v5160_v26, %v2394_v14 }
 0x262   :  { %2429 = vst.msk [vmem:[#allocation2 + $0x60] sm:$0xff] %vm779_vm0, %v2411_v38 }
 0x263   :  { %v2477_v18 = vld [vmem:[#allocation2 + $0x24] sm:$0xff]  ;;  %2425 = vst.msk [vmem:[#allocation2 + $0x40] sm:$0xff] %vm779_vm0, %v2407_v36 }
 0x264   :  { %v2478_v1 = vld [vmem:[#allocation2 + $0x2c] sm:$0xff]  ;;  %v2495_v47 = vpack.c.bf16 %v2477_v18, %v2477_v18  ;;  %2426 = vst.msk [vmem:[#allocation2 + $0x48] sm:$0xff] %vm779_vm0, %v2408_v28  ;;  %v4382_v28 = vld [vmem:[%s6068_s2 + $0x38] sm:$0xff] }
 0x265   :  { %v2496_v15 = vpack.c.bf16 %v2478_v1, %v2478_v1  ;;  %v2474_v56 = vld [vmem:[#allocation2 + $0xc] sm:$0xff]  ;;  %2424 = vst.msk [vmem:[#allocation2 + $0x38] sm:$0xff] %vm779_vm0, %v2406_v25  ;;  %3517 = vmatpush.bf16.msrb.mxu1 %v4382_v28 }
 0x266   :  { %v5355_v27 = vunpack.c.l.b16 %v2495_v47  ;;  %v2475_v35 = vld [vmem:[#allocation2 + $0x14] sm:$0xff]  ;;  %v2476_v55 = vld [vmem:[#allocation2 + $0x1c] sm:$0xff]  ;;  %v2492_v19 = vpack.c.bf16 %v2474_v56, %v2474_v56  ;;  %2433 = vst.msk [vmem:[#allocation2 + $0x80] sm:$0xff] %vm779_vm0, %v2415_v30 }
 0x267   :  { %v5359_v46 = vunpack.c.l.b16 %v2496_v15  ;;  %v2493_v33 = vpack.c.bf16 %v2475_v35, %v2475_v35  ;;  %v2494_v22 = vpack.c.bf16 %v2476_v55, %v2476_v55  ;;  %2434 = vst.msk [vmem:[#allocation2 + $0x88] sm:$0xff] %vm779_vm0, %v2416_v42  ;;  %v2547_v28 = vld [vmem:[#allocation2 + $0x1f] sm:$0xff] }
 0x268   :  { %v2735_v12 = vunpack.c.l.b16 %v2492_v19  ;;  %v2483_v41 = vld [vmem:[#allocation2 + $0x54] sm:$0xff]  ;;  %2435 = vst.msk [vmem:[#allocation2 + $0x90] sm:$0xff] %vm779_vm0, %v2417_v8 }
 0x269   :  { %v2754_v40 = vpack.c.b16 %v5359_v46, %v5355_v27  ;;  %v2736_v5 = vunpack.c.l.b16 %v2493_v33  ;;  %v5366_v59 = vunpack.c.l.b16 %v2494_v22  ;;  %v2484_v63 = vld [vmem:[#allocation2 + $0x5c] sm:$0xff]  ;;  %v2501_v7 = vpack.c.bf16 %v2483_v41, %v2483_v41  ;;  %2431 = vst.msk [vmem:[#allocation2 + $0x70] sm:$0xff] %vm779_vm0, %v2413_v20  ;;  %v2545_v41 = vld [vmem:[#allocation2 + $0xf] sm:$0xff] }
 0x26a   :  { %v2752_v0 = vpack.c.b16 %v2735_v12, %v2734_v50  ;;  %v2502_v32 = vpack.c.bf16 %v2484_v63, %v2484_v63  ;;  %2432 = vst.msk [vmem:[#allocation2 + $0x78] sm:$0xff] %vm779_vm0, %v2414_v49  ;;  %v4381_v49 = vld [vmem:[%s6068_s2 + $0x30] sm:$0xff]  ;;  %v2618_v63 = vld [vmem:[#allocation2 + $0x19] sm:$0xff] }
 0x26b   :  { %2765 = vrot.lane.b32.xlu2 %v2754_v40, %s4434_s15  ;;  %v2753_v2 = vpack.c.b16 %v5366_v59, %v2736_v5  ;;  %v2481_v4 = vld [vmem:[#allocation2 + $0x44] sm:$0xff]  ;;  %v2482_v17 = vld [vmem:[#allocation2 + $0x4c] sm:$0xff]  ;;  %2430 = vst.msk [vmem:[#allocation2 + $0x68] sm:$0xff] %vm779_vm0, %v2412_v39  ;;  %v5375_v10 = vunpack.c.l.b16 %v2501_v7  ;;  %v2546_v40 = vld [vmem:[#allocation2 + $0x17] sm:$0xff]  ;;  %3518 = vmatpush.bf16.msrb.mxu1 %v4381_v49 }
 0x26c   :  { %2761 = vrot.lane.b32.xlu0 %v2752_v0, %s4434_s15  ;;  %v2499_v44 = vpack.c.bf16 %v2481_v4, %v2481_v4  ;;  %v2500_v38 = vpack.c.bf16 %v2482_v17, %v2482_v17  ;;  %v2479_v3 = vld [vmem:[#allocation2 + $0x34] sm:$0xff]  ;;  %v2480_v34 = vld [vmem:[#allocation2 + $0x3c] sm:$0xff]  ;;  %v5377_v36 = vunpack.c.l.b16 %v2502_v32  ;;  %v2563_v32 = vpack.c.bf16 %v2545_v41, %v2545_v41 }
 0x26d   :  { %2763 = vrot.lane.b32.xlu1 %v2753_v2, %s4434_s15  ;;  %v2497_v62 = vpack.c.bf16 %v2479_v3, %v2479_v3  ;;  %v2498_v60 = vpack.c.bf16 %v2480_v34, %v2480_v34  ;;  %v2617_v5 = vld [vmem:[#allocation2 + $0x11] sm:$0xff]  ;;  %v2564_v2 = vpack.c.bf16 %v2546_v40, %v2546_v40 }
 0x26e   :  { %v5382_v6 = vunpack.c.l.b16 %v2499_v44  ;;  %v5384_v48 = vunpack.c.l.b16 %v2500_v38  ;;  %v2489_v25 = vld [vmem:[#allocation2 + $0x84] sm:$0xff]  ;;  %v2757_v30 = vpack.c.b16 %v5377_v36, %v5375_v10  ;;  %v2635_v17 = vpack.c.bf16 %v2617_v5, %v2617_v5  ;;  %v2550_v49 = vld [vmem:[#allocation2 + $0x37] sm:$0xff] }
 0x26f   :  { %v5386_v45 = vunpack.c.l.b16 %v2497_v62  ;;  %v5388_v16 = vunpack.c.l.b16 %v2498_v60  ;;  %v2490_v13 = vld [vmem:[#allocation2 + $0x8c] sm:$0xff]  ;;  %v2507_v31 = vpack.c.bf16 %v2489_v25, %v2489_v25  ;;  %v2636_v44 = vpack.c.bf16 %v2618_v63, %v2618_v63 }
 0x270   :  { %v2508_v18 = vpack.c.bf16 %v2490_v13, %v2490_v13  ;;  %v2756_v1 = vpack.c.b16 %v5384_v48, %v5382_v6  ;;  %v4380_v38 = vld [vmem:[%s6068_s2 + $0x28] sm:$0xff]  ;;  %v2842_v3 = vunpack.c.l.b16 %v2563_v32  ;;  %v2843_v34 = vunpack.c.l.b16 %v2564_v2  ;;  %v2621_v41 = vld [vmem:[#allocation2 + $0x31] sm:$0xff]  ;;  %v4379_v2 = vld [vmem:[%s6068_s2 + $0x20] sm:$0xff] }
 0x271   :  { %v2487_v42 = vld [vmem:[#allocation2 + $0x74] sm:$0xff]  ;;  %v2488_v14 = vld [vmem:[#allocation2 + $0x7c] sm:$0xff]  ;;  %v2755_v47 = vpack.c.b16 %v5388_v16, %v5386_v45  ;;  %v5399_v19 = vunpack.c.l.b16 %v2507_v31  ;;  %v2950_v62 = vunpack.c.l.b16 %v2635_v17  ;;  %v2951_v60 = vunpack.c.l.b16 %v2636_v44  ;;  %v2548_v25 = vld [vmem:[#allocation2 + $0x27] sm:$0xff]  ;;  %3519 = vmatpush.bf16.msrb.mxu1 %v4380_v38 }
 0x272   :  { %v2485_v8 = vld [vmem:[#allocation2 + $0x64] sm:$0xff]  ;;  %v2486_v15 = vld [vmem:[#allocation2 + $0x6c] sm:$0xff]  ;;  %v2505_v56 = vpack.c.bf16 %v2487_v42, %v2487_v42  ;;  %v2506_v20 = vpack.c.bf16 %v2488_v14, %v2488_v14  ;;  %v5401_v50 = vunpack.c.l.b16 %v2508_v18  ;;  %v3016_v31 = vpack.c.b16 %v5355_v27, %v5366_v59  ;;  %v2622_v27 = vld [vmem:[#allocation2 + $0x39] sm:$0xff] }
 0x273   :  { %2771 = vrot.lane.b32.xlu2 %v2757_v30, %s4434_s15  ;;  %v2503_v35 = vpack.c.bf16 %v2485_v8, %v2485_v8  ;;  %v2504_v55 = vpack.c.bf16 %v2486_v15, %v2486_v15  ;;  %v2619_v13 = vld [vmem:[#allocation2 + $0x21] sm:$0xff]  ;;  %v2620_v30 = vld [vmem:[#allocation2 + $0x29] sm:$0xff]  ;;  %v2860_v18 = vpack.c.b16 %v2843_v34, %v2842_v3  ;;  %v2565_v42 = vpack.c.bf16 %v2547_v28, %v2547_v28 }
 0x274   :  { %2767 = vrot.lane.b32.xlu0 %v2755_v47, %s4434_s15  ;;  %v5410_v39 = vunpack.c.l.b16 %v2505_v56  ;;  %v5412_v12 = vunpack.c.l.b16 %v2506_v20  ;;  %v2760_v7 = vpack.c.b16 %v5401_v50, %v5399_v19  ;;  %v2566_v14 = vpack.c.bf16 %v2548_v25, %v2548_v25  ;;  %v2551_v38 = vld [vmem:[#allocation2 + $0x3f] sm:$0xff]  ;;  %v2552_v3 = vld [vmem:[#allocation2 + $0x47] sm:$0xff] }
 0x275   :  { %2769 = vrot.lane.b32.xlu1 %v2756_v1, %s4434_s15  ;;  %v5406_v33 = vunpack.c.l.b16 %v2503_v35  ;;  %v5408_v22 = vunpack.c.l.b16 %v2504_v55  ;;  %v2968_v1 = vpack.c.b16 %v2951_v60, %v2950_v62  ;;  %v2637_v47 = vpack.c.bf16 %v2619_v13, %v2619_v13  ;;  %v2549_v55 = vld [vmem:[#allocation2 + $0x2f] sm:$0xff]  ;;  %3520 = vmatpush.bf16.msrb.mxu1 %v4379_v2  ;;  %v2623_v34 = vld [vmem:[#allocation2 + $0x41] sm:$0xff] }
 0x276   :  { %v2759_v4 = vpack.c.b16 %v5412_v12, %v5410_v39  ;;  %v2638_v8 = vpack.c.bf16 %v2620_v30, %v2620_v30  ;;  %v2844_v15 = vunpack.c.l.b16 %v2565_v42  ;;  %v2845_v56 = vunpack.c.l.b16 %v2566_v14  ;;  %v2624_v62 = vld [vmem:[#allocation2 + $0x49] sm:$0xff]  ;;  %v2627_v2 = vld [vmem:[#allocation2 + $0x61] sm:$0xff] }
 0x277   :  { %v2758_v0 = vpack.c.b16 %v5408_v22, %v5406_v33  ;;  %v2952_v20 = vunpack.c.l.b16 %v2637_v47  ;;  %v3017_v59 = vpack.c.b16 %v5386_v45, %v5359_v46  ;;  %v2567_v5 = vpack.c.bf16 %v2549_v55, %v2549_v55  ;;  %v2513_v25 = vld [vmem:[#allocation2 + $0x25] sm:$0xff]  ;;  %v2554_v55 = vld [vmem:[#allocation2 + $0x57] sm:$0xff] }
 0x278   :  { %v2953_v35 = vunpack.c.l.b16 %v2638_v8  ;;  %v2861_v40 = vpack.c.b16 %v2845_v56, %v2844_v15  ;;  %v2568_v63 = vpack.c.bf16 %v2550_v49, %v2550_v49  ;;  %v2640_v32 = vpack.c.bf16 %v2622_v27, %v2622_v27  ;;  %v2625_v49 = vld [vmem:[#allocation2 + $0x51] sm:$0xff] }
 0x279   :  { %v2846_v17 = vunpack.c.l.b16 %v2567_v5  ;;  %v3018_v28 = vpack.c.b16 %v5382_v6, %v5388_v16  ;;  %v2569_v30 = vpack.c.bf16 %v2551_v38, %v2551_v38  ;;  %v2641_v42 = vpack.c.bf16 %v2623_v34, %v2623_v34  ;;  %v4378_v6 = vld [vmem:[%s6068_s2 + $0x18] sm:$0xff]  ;;  %v2628_v34 = vld [vmem:[#allocation2 + $0x69] sm:$0xff] }
 0x27a   :  { %v2847_v44 = vunpack.c.l.b16 %v2568_v63  ;;  %v2955_v45 = vunpack.c.l.b16 %v2640_v32  ;;  %v2642_v14 = vpack.c.bf16 %v2624_v62, %v2624_v62  ;;  %v2531_v47 = vpack.c.bf16 %v2513_v25, %v2513_v25  ;;  %3521 = vmatpush.bf16.msrb.mxu1 %v4378_v6  ;;  %v2518_v6 = vld [vmem:[#allocation2 + $0x4d] sm:$0xff] }
 0x27b   :  { %2777 = vrot.lane.b32.xlu2 %v2760_v7, %s4434_s15  ;;  %v2969_v7 = vpack.c.b16 %v2953_v35, %v2952_v20  ;;  %v2848_v16 = vunpack.c.l.b16 %v2569_v30  ;;  %v2956_v56 = vunpack.c.l.b16 %v2641_v42  ;;  %v2553_v35 = vld [vmem:[#allocation2 + $0x4f] sm:$0xff]  ;;  %v2572_v63 = vpack.c.bf16 %v2554_v55, %v2554_v55 }
 0x27c   :  { %2773 = vrot.lane.b32.xlu0 %v2758_v0, %s4434_s15  ;;  %v2639_v0 = vpack.c.bf16 %v2621_v41, %v2621_v41  ;;  %v2862_v13 = vpack.c.b16 %v2847_v44, %v2846_v17  ;;  %v5449_v15 = vunpack.c.l.b16 %v2531_v47  ;;  %v2957_v20 = vunpack.c.l.b16 %v2642_v14  ;;  %v2626_v41 = vld [vmem:[#allocation2 + $0x59] sm:$0xff]  ;;  %v2556_v17 = vld [vmem:[#allocation2 + $0x67] sm:$0xff]  ;;  %v5470_v42 = vld [vmem:[#allocation2 + $0x6f] sm:$0xff] }
 0x27d   :  { %2775 = vrot.lane.b32.xlu1 %v2759_v4, %s4434_s15  ;;  %v2512_v4 = vld [vmem:[#allocation2 + $0x1d] sm:$0xff]  ;;  %v2571_v5 = vpack.c.bf16 %v2553_v35, %v2553_v35  ;;  %v2644_v32 = vpack.c.bf16 %v2626_v41, %v2626_v41  ;;  %v3020_v25 = vpack.c.b16 %v5406_v33, %v5377_v36  ;;  %v2514_v30 = vld [vmem:[#allocation2 + $0x2d] sm:$0xff]  ;;  %v2517_v47 = vld [vmem:[#allocation2 + $0x45] sm:$0xff] }
 0x27e   :  { %v2954_v46 = vunpack.c.l.b16 %v2639_v0  ;;  %v2530_v60 = vpack.c.bf16 %v2512_v4, %v2512_v4  ;;  %v2643_v0 = vpack.c.bf16 %v2625_v49, %v2625_v49  ;;  %v2555_v4 = vld [vmem:[#allocation2 + $0x5f] sm:$0xff]  ;;  %v2519_v35 = vld [vmem:[#allocation2 + $0x55] sm:$0xff] }
 0x27f   :  { %v4406_v44 = vld [vmem:[%s6068_s2 + $0xf8] sm:$0xff]  ;;  %v2959_v38 = vunpack.c.l.b16 %v2644_v32  ;;  %v2573_v62 = vpack.c.bf16 %v2555_v4, %v2555_v4  ;;  %v2521_v33 = vld [vmem:[#allocation2 + $0x65] sm:$0xff]  ;;  %v2535_v32 = vpack.c.bf16 %v2517_v47, %v2517_v47 }
 0x280   :  { %3679 = vmatpush.bf16.msra.mxu0 %v4406_v44  ;;  %v2516_v14 = vld [vmem:[#allocation2 + $0x3d] sm:$0xff]  ;;  %v2537_v44 = vpack.c.bf16 %v2519_v35, %v2519_v35 }
 0x281   :  { %v2520_v36 = vld [vmem:[#allocation2 + $0x5d] sm:$0xff]  ;;  %v2852_v55 = vunpack.c.l.b16 %v2573_v62  ;;  %v2525_v62 = vld [vmem:[#allocation2 + $0x85] sm:$0xff] }
 0x282   :  { %v2524_v4 = vld [vmem:[#allocation2 + $0x7d] sm:$0xff] }
 0x283   :  { %3025 = vrot.lane.b32.xlu2 %v3016_v31, %s4434_s15  ;;  %v2570_v31 = vpack.c.bf16 %v2552_v3, %v2552_v3  ;;  %v2645_v3 = vpack.c.bf16 %v2627_v2, %v2627_v2  ;;  %v2536_v2 = vpack.c.bf16 %v2518_v6, %v2518_v6  ;;  %v4403_v35 = vld [vmem:[%s6068_s2 + $0xe0] sm:$0xff] }
 0x284   :  { %2869 = vrot.lane.b32.xlu0 %v2860_v18, %s4434_s15  ;;  %v2970_v18 = vpack.c.b16 %v2955_v45, %v2954_v46  ;;  %v2851_v46 = vunpack.c.l.b16 %v2572_v63  ;;  %v2958_v45 = vunpack.c.l.b16 %v2643_v0  ;;  %v2523_v63 = vld [vmem:[#allocation2 + $0x75] sm:$0xff]  ;;  %v2534_v0 = vpack.c.bf16 %v2516_v14, %v2516_v14 }
 0x285   :  { %2977 = vrot.lane.b32.xlu1 %v2968_v1, %s4434_s15  ;;  %v5443_v1 = vunpack.c.l.b16 %v2530_v60  ;;  %v2849_v8 = vunpack.c.l.b16 %v2570_v31  ;;  %v2574_v60 = vpack.c.bf16 %v2556_v17, %v2556_v17  ;;  %v2515_v31 = vld [vmem:[#allocation2 + $0x35] sm:$0xff]  ;;  %v5502_v14 = vunpack.c.l.b16 %v2537_v44  ;;  %v2560_v44 = vld [vmem:[#allocation2 + $0x87] sm:$0xff] }
 0x287   :  { %v3049_v27 = vpack.c.b16 %v5449_v15, %v5443_v1  ;;  %v2853_v49 = vunpack.c.l.b16 %v2574_v60 }
 0x289   :  { %v2865_v60 = vpack.c.b16 %v2853_v49, %v2852_v55 }
 0x28b   :  { %3027 = vrot.lane.b32.xlu2 %v3017_v59, %s4434_s15  ;;  %v3019_v59 = vpack.c.b16 %v5375_v10, %v5384_v48  ;;  %v4377_v10 = vld [vmem:[%s6068_s2 + $0x10] sm:$0xff]  ;;  %v2850_v48 = vunpack.c.l.b16 %v2571_v5 }
 0x28c   :  { %2871 = vrot.lane.b32.xlu0 %v2861_v40, %s4434_s15  ;;  %v2863_v40 = vpack.c.b16 %v2849_v8, %v2848_v16  ;;  %3522 = vmatpush.bf16.msrb.mxu1 %v4377_v10  ;;  %v2972_v16 = vpack.c.b16 %v2959_v38, %v2958_v45  ;;  %v3021_v8 = vpack.c.b16 %v5410_v39, %v5408_v22  ;;  %v2522_v5 = vld [vmem:[#allocation2 + $0x6d] sm:$0xff] }
 0x28d   :  { %2979 = vrot.lane.b32.xlu1 %v2969_v7, %s4434_s15  ;;  %v2971_v7 = vpack.c.b16 %v2957_v20, %v2956_v56  ;;  %v2646_v56 = vpack.c.bf16 %v2628_v34, %v2628_v34  ;;  %v2960_v20 = vunpack.c.l.b16 %v2645_v3  ;;  %v4405_v22 = vld [vmem:[%s6068_s2 + $0xf0] sm:$0xff]  ;;  %v4376_v39 = vld [vmem:[%s6068_s2 + $0x8] sm:$0xff]  ;;  %v2538_v10 = vpack.c.bf16 %v2520_v36, %v2520_v36 }
 0x28e   :  { %v2575_v45 = vpack.c.bf16 %v5470_v42, %v5470_v42  ;;  %3680 = vmatpush.bf16.msra.mxu0 %v4405_v22  ;;  %v4404_v3 = vld [vmem:[%s6068_s2 + $0xe8] sm:$0xff]  ;;  %v2540_v34 = vpack.c.bf16 %v2522_v5, %v2522_v5  ;;  %v5500_v42 = vunpack.c.l.b16 %v2536_v2  ;;  %v4375_v22 = vld [vmem:[%s6068_s2] sm:$0xff] }
 0x28f   :  { %v5504_v47 = vunpack.c.l.b16 %v2538_v10  ;;  %v4402_v10 = vld [vmem:[%s6068_s2 + $0xd8] sm:$0xff] }
 0x290   :  { %3523 = vmatpush.bf16.msrb.mxu1 %v4376_v39  ;;  %v5512_v36 = vunpack.c.l.b16 %v2540_v34  ;;  %v4398_v39 = vld [vmem:[%s6068_s2 + $0xb8] sm:$0xff] }
 0x291   :  { %3625 = vmatpush.bf16.msra.mxu3 %v4398_v39  ;;  %v2561_v39 = vld [vmem:[#allocation2 + $0x8f] sm:$0xff] }
 0x292   :  { %3681 = vmatpush.bf16.msra.mxu0 %v4404_v3 }
 0x293   :  { %3029 = vrot.lane.b32.xlu2 %v3018_v28, %s4434_s15  ;;  %v5464_v28 = vld [vmem:[#allocation2 + $0x71] sm:$0xff] }
 0x294   :  { %2873 = vrot.lane.b32.xlu0 %v2862_v13, %s4434_s15  ;;  %v5468_v13 = vld [vmem:[#allocation2 + $0x79] sm:$0xff]  ;;  %v2647_v41 = vpack.c.bf16 %v5464_v28, %v5464_v28  ;;  %3524 = vmatpush.bf16.msrb.mxu1 %v4375_v22 }
 0x295   :  { %2981 = vrot.lane.b32.xlu1 %v2970_v18, %s4434_s15  ;;  %v2864_v18 = vpack.c.b16 %v2851_v46, %v2850_v48  ;;  %v2648_v17 = vpack.c.bf16 %v5468_v13, %v5468_v13  ;;  %v2539_v48 = vpack.c.bf16 %v2521_v33, %v2521_v33  ;;  %v2961_v46 = vunpack.c.l.b16 %v2646_v56 }
 0x296   :  { %v2542_v13 = vpack.c.bf16 %v2524_v4, %v2524_v4  ;;  %v2559_v4 = vld [vmem:[#allocation2 + $0x7f] sm:$0xff]  ;;  %3682 = vmatpush.bf16.msra.mxu0 %v4403_v35 }
 0x297   :  { %v5506_v6 = vunpack.c.l.b16 %v2539_v48  ;;  %v2973_v56 = vpack.c.b16 %v2961_v46, %v2960_v20  ;;  %v2963_v2 = vunpack.c.l.b16 %v2648_v17  ;;  %v2577_v34 = vpack.c.bf16 %v2559_v4, %v2559_v4  ;;  %v2633_v4 = vld [vmem:[#allocation2 + $0x91] sm:$0xff]  ;;  %v2444_v48 = vld [vmem:[#allocation2 + $0x3b] sm:$0xff] }
 0x298   :  { %v5516_v55 = vunpack.c.l.b16 %v2542_v13 }
 0x299   :  { %v2856_v35 = vunpack.c.l.b16 %v2577_v34 }
 0x29a   :  { %3683 = vmatpush.bf16.msra.mxu0 %v4402_v10 }
 0x29b   :  { %3031 = vrot.lane.b32.xlu2 %v3019_v59, %s4434_s15  ;;  %v2558_v59 = vld [vmem:[#allocation2 + $0x77] sm:$0xff] }
 0x29c   :  { %2875 = vrot.lane.b32.xlu0 %v2863_v40, %s4434_s15  ;;  %v2532_v40 = vpack.c.bf16 %v2514_v30, %v2514_v30  ;;  %v2576_v38 = vpack.c.bf16 %v2558_v59, %v2558_v59 }
 0x29d   :  { %2983 = vrot.lane.b32.xlu1 %v2971_v7, %s4434_s15  ;;  %v2533_v7 = vpack.c.bf16 %v2515_v31, %v2515_v31  ;;  %v5496_v31 = vunpack.c.l.b16 %v2534_v0  ;;  %v2445_v0 = vld [vmem:[#allocation2 + $0x43] sm:$0xff] }
 0x29e   :  { %v5492_v28 = vunpack.c.l.b16 %v2532_v40  ;;  %v2854_v40 = vunpack.c.l.b16 %v2575_v45  ;;  %v2855_v5 = vunpack.c.l.b16 %v2576_v38  ;;  %v2631_v45 = vld [vmem:[#allocation2 + $0x81] sm:$0xff]  ;;  %v2632_v38 = vld [vmem:[#allocation2 + $0x89] sm:$0xff] }
 0x29f   :  { %v5494_v30 = vunpack.c.l.b16 %v2533_v7  ;;  %v2650_v13 = vpack.c.bf16 %v2632_v38, %v2632_v38 }
 0x2a0   :  { %v2866_v3 = vpack.c.b16 %v2855_v5, %v2854_v40  ;;  %v2660_v40 = vld [vmem:[#allocation2 + $0x9c] sm:$0xff]  ;;  %v2661_v5 = vld [vmem:[#allocation2 + $0xa4] sm:$0xff] }
 0x2a1   :  { %v2965_v22 = vunpack.c.l.b16 %v2650_v13  ;;  %v2664_v38 = vpack.c.bf16 %v2661_v5, %v2661_v5 }
 0x2a3   :  { %3033 = vrot.lane.b32.xlu2 %v3020_v25, %s4434_s15  ;;  %v2541_v25 = vpack.c.bf16 %v2523_v63, %v2523_v63  ;;  %v2659_v63 = vld [vmem:[#allocation2 + $0x94] sm:$0xff]  ;;  %v3015_v13 = vunpack.c.l.b16 %v2664_v38 }
 0x2a4   :  { %2877 = vrot.lane.b32.xlu0 %v2864_v18, %s4434_s15  ;;  %v5498_v18 = vunpack.c.l.b16 %v2535_v32  ;;  %v2962_v32 = vunpack.c.l.b16 %v2647_v41  ;;  %v3022_v41 = vpack.c.b16 %v5399_v19, %v5412_v12  ;;  %v2662_v17 = vpack.c.bf16 %v2659_v63, %v2659_v63  ;;  %v4389_v19 = vld [vmem:[%s6068_s2 + $0x70] sm:$0xff] }
 0x2a5   :  { %2985 = vrot.lane.b32.xlu1 %v2972_v16, %s4434_s15  ;;  %v2543_v16 = vpack.c.bf16 %v2525_v62, %v2525_v62  ;;  %v5514_v33 = vunpack.c.l.b16 %v2541_v25  ;;  %v2578_v62 = vpack.c.bf16 %v2560_v44, %v2560_v44  ;;  %v2649_v25 = vpack.c.bf16 %v2631_v45, %v2631_v45  ;;  %v4397_v12 = vld [vmem:[%s6068_s2 + $0xb0] sm:$0xff]  ;;  %v2634_v44 = vld [vmem:[#allocation2 + $0x99] sm:$0xff] }
 0x2a6   :  { %3626 = vmatpush.bf16.msra.mxu3 %v4397_v12  ;;  %v2663_v45 = vpack.c.bf16 %v2660_v40, %v2660_v40  ;;  %v4396_v40 = vld [vmem:[%s6068_s2 + $0xa8] sm:$0xff] }
 0x2a7   :  { %v5519_v49 = vunpack.c.l.b16 %v2543_v16  ;;  %v4401_v16 = vld [vmem:[%s6068_s2 + $0xd0] sm:$0xff]  ;;  %v2964_v63 = vunpack.c.l.b16 %v2649_v25  ;;  %v4399_v25 = vld [vmem:[%s6068_s2 + $0xc0] sm:$0xff] }
 0x2a8   :  { %3684 = vmatpush.bf16.msra.mxu0 %v4401_v16 }
 0x2a9   :  { %v2975_v34 = vpack.c.b16 %v2965_v22, %v2964_v63  ;;  %v4387_v22 = vld [vmem:[%s6068_s2 + $0x60] sm:$0xff] }
 0x2aa   :  { %3627 = vmatpush.bf16.msra.mxu3 %v4396_v40 }
 0x2ab   :  { %3035 = vrot.lane.b32.xlu2 %v3021_v8, %s4434_s15  ;;  %v4390_v8 = vld [vmem:[%s6068_s2 + $0x78] sm:$0xff] }
 0x2ac   :  { %2879 = vrot.lane.b32.xlu0 %v2865_v60, %s4434_s15  ;;  %3571 = vmatpush.bf16.msra.mxu2 %v4390_v8  ;;  %v2974_v60 = vpack.c.b16 %v2963_v2, %v2962_v32  ;;  %v2857_v8 = vunpack.c.l.b16 %v2578_v62  ;;  %v2562_v32 = vld [vmem:[#allocation2 + $0x97] sm:$0xff]  ;;  %v4400_v2 = vld [vmem:[%s6068_s2 + $0xc8] sm:$0xff]  ;;  %v2651_v62 = vpack.c.bf16 %v2633_v4, %v2633_v4 }
 0x2ad   :  { %2987 = vrot.lane.b32.xlu1 %v2973_v56, %s4434_s15  ;;  %v3013_v56 = vunpack.c.l.b16 %v2662_v17  ;;  %v2579_v17 = vpack.c.bf16 %v2561_v39, %v2561_v39  ;;  %3685 = vmatpush.bf16.msra.mxu0 %v4400_v2  ;;  %v4386_v4 = vld [vmem:[%s6068_s2 + $0x58] sm:$0xff] }
 0x2af   :  { %v3023_v10 = vpack.c.b16 %v3013_v56, %v5401_v50  ;;  %v3014_v50 = vunpack.c.l.b16 %v2663_v45  ;;  %v2858_v16 = vunpack.c.l.b16 %v2579_v17  ;;  %v4393_v45 = vld [vmem:[%s6068_s2 + $0x90] sm:$0xff]  ;;  %v4392_v17 = vld [vmem:[%s6068_s2 + $0x88] sm:$0xff] }
 0x2b0   :  { %3572 = vmatpush.bf16.msra.mxu2 %v4389_v19  ;;  %v2966_v19 = vunpack.c.l.b16 %v2651_v62  ;;  %v2437_v62 = vld [vmem:[#allocation2 + $0x3] sm:$0xff] }
 0x2b1   :  { %3686 = vmatpush.bf16.msra.mxu0 %v4399_v25  ;;  %v3024_v5 = vpack.c.b16 %v3015_v13, %v3014_v50  ;;  %v4383_v25 = vld [vmem:[%s6068_s2 + $0x40] sm:$0xff] }
 0x2b2   :  { %v4391_v50 = vld [vmem:[%s6068_s2 + $0x80] sm:$0xff] }
 0x2b3   :  { %3037 = vrot.lane.b32.xlu2 %v3022_v41, %s4434_s15  ;;  %v2867_v41 = vpack.c.b16 %v2857_v8, %v2856_v35  ;;  %v4410_v35 = vld [vmem:[%s6068_s2 + $0x118] sm:$0xff]  ;;  %v4388_v8 = vld [vmem:[%s6068_s2 + $0x68] sm:$0xff] }
 0x2b4   :  { %2881 = vrot.lane.b32.xlu0 %v2866_v3, %s4434_s15  ;;  %v2580_v3 = vpack.c.bf16 %v2562_v32, %v2562_v32  ;;  %3737 = vmatpush.bf16.msra.mxu1 %v4410_v35  ;;  %v4395_v32 = vld [vmem:[%s6068_s2 + $0xa0] sm:$0xff] }
 0x2b5   :  { %2989 = vrot.lane.b32.xlu1 %v2974_v60, %s4434_s15  ;;  %v2652_v60 = vpack.c.bf16 %v2634_v44, %v2634_v44  ;;  %3573 = vmatpush.bf16.msra.mxu2 %v4388_v8  ;;  %v4394_v44 = vld [vmem:[%s6068_s2 + $0x98] sm:$0xff] }
 0x2b6   :  { %v2859_v56 = vunpack.c.l.b16 %v2580_v3  ;;  %3628 = vmatpush.bf16.msra.mxu3 %v4395_v32  ;;  %v2441_v3 = vld [vmem:[#allocation2 + $0x23] sm:$0xff] }
 0x2b7   :  { %v2967_v12 = vunpack.c.l.b16 %v2652_v60  ;;  %v2438_v60 = vld [vmem:[#allocation2 + $0xb] sm:$0xff]  ;;  %v2459_v13 = vpack.c.bf16 %v2441_v3, %v2441_v3  ;;  %v2439_v3 = vld [vmem:[#allocation2 + $0x13] sm:$0xff] }
 0x2b8   :  { %v2868_v63 = vpack.c.b16 %v2859_v56, %v2858_v16 }
 0x2b9   :  { %v2976_v39 = vpack.c.b16 %v2967_v12, %v2966_v19  ;;  %3574 = vmatpush.bf16.msra.mxu2 %v4387_v22  ;;  %v2455_v19 = vpack.c.bf16 %v2437_v62, %v2437_v62  ;;  %v2456_v12 = vpack.c.bf16 %v2438_v60, %v2438_v60  ;;  %v5618_v35 = vunpack.c.l.b16 %v2459_v13 }
 0x2ba   :  { %3629 = vmatpush.bf16.msra.mxu3 %v4394_v44  ;;  %v2457_v60 = vpack.c.bf16 %v2439_v3, %v2439_v3 }
 0x2bb   :  { %3039 = vrot.lane.b32.xlu2 %v3023_v10, %s4434_s15  ;;  %v4385_v10 = vld [vmem:[%s6068_s2 + $0x50] sm:$0xff]  ;;  %v2689_v40 = vunpack.c.l.b16 %v2455_v19 }
 0x2bc   :  { %2883 = vrot.lane.b32.xlu0 %v2867_v41, %s4434_s15  ;;  %v4384_v41 = vld [vmem:[%s6068_s2 + $0x48] sm:$0xff]  ;;  %v2691_v19 = vunpack.c.l.b16 %v2457_v60 }
 0x2bd   :  { %2991 = vrot.lane.b32.xlu1 %v2975_v34, %s4434_s15  ;;  %3575 = vmatpush.bf16.msra.mxu2 %v4386_v4  ;;  %v2440_v34 = vld [vmem:[#allocation2 + $0x1b] sm:$0xff] }
 0x2be   :  { %3630 = vmatpush.bf16.msra.mxu3 %v4393_v45  ;;  %v2458_v16 = vpack.c.bf16 %v2440_v34, %v2440_v34  ;;  %v4409_v45 = vld [vmem:[%s6068_s2 + $0x110] sm:$0xff] }
 0x2bf   :  { %3738 = vmatpush.bf16.msra.mxu1 %v4409_v45 }
 0x2c0   :  { %v2692_v8 = vunpack.c.l.b16 %v2458_v16 }
 0x2c1   :  { %3576 = vmatpush.bf16.msra.mxu2 %v4385_v10 }
 0x2c2   :  { %3631 = vmatpush.bf16.msra.mxu3 %v4392_v17  ;;  %v2443_v17 = vld [vmem:[#allocation2 + $0x33] sm:$0xff] }
 0x2c3   :  { %3041 = vrot.lane.b32.xlu2 %v3024_v5, %s4434_s15  ;;  %v2690_v5 = vunpack.c.l.b16 %v2456_v12  ;;  %v2461_v62 = vpack.c.bf16 %v2443_v17, %v2443_v17  ;;  %v2509_v12 = vld [vmem:[#allocation2 + $0x5] sm:$0xff] }
 0x2c4   :  { %2885 = vrot.lane.b32.xlu0 %v2868_v63, %s4434_s15  ;;  %v3001_v63 = vpack.c.b16 %v5618_v35, %v2692_v8 }
 0x2c5   :  { %2993 = vrot.lane.b32.xlu1 %v2976_v39, %s4434_s15  ;;  %v5588_v2 = vpop.permute.xlu2 %2765  ;;  %3577 = vmatpush.bf16.msra.mxu2 %v4384_v41  ;;  %v2707_v39 = vpack.c.b16 %v2690_v5, %v2689_v40  ;;  %v2442_v41 = vld [vmem:[#allocation2 + $0x2b] sm:$0xff]  ;;  %v5630_v16 = vunpack.c.l.b16 %v2461_v62 }
 0x2c6   :  { %3632 = vmatpush.bf16.msra.mxu3 %v4391_v50  ;;  %v2460_v34 = vpack.c.bf16 %v2442_v41, %v2442_v41  ;;  %v2510_v40 = vld [vmem:[#allocation2 + $0xd] sm:$0xff] }
 0x2c8   :  { %v2694_v13 = vunpack.c.l.b16 %v2460_v34 }
 0x2c9   :  { %3578 = vmatpush.bf16.msra.mxu2 %v4383_v25 }
 0x2cd   :  { %v5602_v38 = vpop.permute.xlu2 %2771 }
 0x2d5   :  { %v5616_v56 = vpop.permute.xlu2 %2777 }
 0x2dd   :  { %v3026_v22 = vpop.permute.xlu2 %3025 }
 0x2de   :  { %v3168_v32 = vsel %vm779_vm0, %v3001_v63, %v3026_v22  ;;  %v2762_v4 = vpop.permute.xlu0 %2761  ;;  %v2581_v63 = vld [vmem:[#allocation2 + $0x10] sm:$0xff]  ;;  %v2582_v22 = vld [vmem:[#allocation2 + $0x18] sm:$0xff] }
 0x2df   :  { %v2764_v44 = vpop.permute.xlu1 %2763  ;;  %v3060_v10 = vsel %vm779_vm0, %v2707_v39, %v2762_v4  ;;  %3687 = vmatmul.bf16.vlgmr.msra.gmra.mxu0 %v3168_v32  ;;  %v3002_v39 = vpack.c.b16 %v5630_v16, %v2694_v13  ;;  %v2708_v32 = vpack.c.b16 %v2692_v8, %v2691_v19  ;;  %v2527_v4 = vpack.c.bf16 %v2509_v12, %v2509_v12 }
 0x2e0   :  { %3525 = vmatmul.bf16.vlgmr.msrb.gmra.mxu1 %v3060_v10  ;;  %v2528_v10 = vpack.c.bf16 %v2510_v40, %v2510_v40  ;;  %v2599_v17 = vpack.c.bf16 %v2581_v63, %v2581_v63  ;;  %v2600_v3 = vpack.c.bf16 %v2582_v22, %v2582_v22  ;;  %v2462_v19 = vpack.c.bf16 %v2444_v48, %v2444_v48 }
 0x2e1   :  { %v3064_v62 = vsel %vm779_vm0, %v2708_v32, %v2764_v44  ;;  %v2797_v60 = vunpack.c.l.b16 %v2527_v4  ;;  %v2463_v12 = vpack.c.bf16 %v2445_v0, %v2445_v0  ;;  %v2511_v32 = vld [vmem:[#allocation2 + $0x15] sm:$0xff]  ;;  %v2709_v0 = vpack.c.b16 %v2694_v13, %v5618_v35 }
 0x2e2   :  { %v2798_v46 = vunpack.c.l.b16 %v2528_v10  ;;  %v2905_v7 = vunpack.c.l.b16 %v2599_v17  ;;  %v2906_v8 = vunpack.c.l.b16 %v2600_v3  ;;  %v2696_v44 = vunpack.c.l.b16 %v2462_v19  ;;  %v2583_v10 = vld [vmem:[#allocation2 + $0x20] sm:$0xff] }
 0x2e3   :  { %v2601_v17 = vpack.c.bf16 %v2583_v10, %v2583_v10  ;;  %v4408_v10 = vld [vmem:[%s6068_s2 + $0x108] sm:$0xff] }
 0x2e4   :  { %v2815_v40 = vpack.c.b16 %v2798_v46, %v2797_v60  ;;  %v2923_v59 = vpack.c.b16 %v2906_v8, %v2905_v7  ;;  %v2529_v7 = vpack.c.bf16 %v2511_v32, %v2511_v32  ;;  %v2447_v60 = vld [vmem:[#allocation2 + $0x53] sm:$0xff]  ;;  %3739 = vmatpush.bf16.msra.mxu1 %v4408_v10  ;;  %v2587_v10 = vld [vmem:[#allocation2 + $0x40] sm:$0xff] }
 0x2e5   :  { %v3028_v5 = vpop.permute.xlu2 %3027  ;;  %v2907_v8 = vunpack.c.l.b16 %v2601_v17 }
 0x2e6   :  { %v5626_v25 = vpop.permute.xlu0 %2767  ;;  %v3172_v41 = vsel %vm779_vm0, %v3002_v39, %v3028_v5  ;;  %v5641_v39 = vunpack.c.l.b16 %v2463_v12  ;;  %v2799_v3 = vunpack.c.l.b16 %v2529_v7 }
 0x2e7   :  { %v5628_v50 = vpop.permute.xlu1 %2769 }
 0x2e8   :  { %v3003_v48 = vpack.c.b16 %v5641_v39, %v2696_v44  ;;  %v2816_v35 = vpack.c.b16 %v5443_v1, %v2799_v3 }
 0x2ed   :  { %v3030_v4 = vpop.permute.xlu2 %3029 }
 0x2ee   :  { %v5633_v45 = vpop.permute.xlu0 %2773  ;;  %v3176_v46 = vsel %vm779_vm0, %v3003_v48, %v3030_v4  ;;  %v2585_v48 = vld [vmem:[#allocation2 + $0x30] sm:$0xff] }
 0x2ef   :  { %v5636_v34 = vpop.permute.xlu1 %2775  ;;  %3692 = vmatmul.bf16.gmra.mxu0 %v3172_v41  ;;  %v2584_v41 = vld [vmem:[#allocation2 + $0x28] sm:$0xff] }
 0x2f0   :  { %3530 = vmatmul.bf16.gmra.mxu1 %v3064_v62  ;;  %v2446_v62 = vld [vmem:[#allocation2 + $0x4b] sm:$0xff] }
 0x2f6   :  { %v2870_v20 = vpop.permute.xlu0 %2869 }
 0x2f7   :  { %v2978_v5 = vpop.permute.xlu1 %2977  ;;  %v3096_v63 = vsel %vm779_vm0, %v2815_v40, %v2870_v20  ;;  %v2602_v20 = vpack.c.bf16 %v2584_v41, %v2584_v41  ;;  %v2464_v40 = vpack.c.bf16 %v2446_v62, %v2446_v62  ;;  %v3032_v41 = vpop.permute.xlu2 %3031  ;;  %v2448_v62 = vld [vmem:[#allocation2 + $0x5b] sm:$0xff] }
 0x2f8   :  { %v3132_v22 = vsel %vm779_vm0, %v2923_v59, %v2978_v5  ;;  %3579 = vmatmul.bf16.vlgmr.msra.gmra.mxu2 %v3096_v63  ;;  %v3068_v59 = vsel %vm779_vm0, %v2709_v0, %v5588_v2  ;;  %v2465_v5 = vpack.c.bf16 %v2447_v60, %v2447_v60  ;;  %v2586_v0 = vld [vmem:[#allocation2 + $0x38] sm:$0xff]  ;;  %v2449_v60 = vld [vmem:[#allocation2 + $0x63] sm:$0xff] }
 0x2f9   :  { %3633 = vmatmul.bf16.vlgmr.msra.gmra.mxu3 %v3132_v22  ;;  %v2908_v19 = vunpack.c.l.b16 %v2602_v20  ;;  %v2698_v2 = vunpack.c.l.b16 %v2464_v40  ;;  %v2603_v20 = vpack.c.bf16 %v2585_v48, %v2585_v48  ;;  %v2466_v40 = vpack.c.bf16 %v2448_v62, %v2448_v62 }
 0x2fa   :  { %v5651_v4 = vunpack.c.l.b16 %v2465_v5  ;;  %v2467_v5 = vpack.c.bf16 %v2449_v60, %v2449_v60 }
 0x2fb   :  { %v2924_v13 = vpack.c.b16 %v2908_v19, %v2907_v8  ;;  %v2909_v8 = vunpack.c.l.b16 %v2603_v20 }
 0x2fc   :  { %v3004_v7 = vpack.c.b16 %v5651_v4, %v2698_v2 }
 0x2fe   :  { %v2872_v12 = vpop.permute.xlu0 %2871  ;;  %v3180_v17 = vsel %vm779_vm0, %v3004_v7, %v3032_v41  ;;  %v2588_v41 = vld [vmem:[#allocation2 + $0x48] sm:$0xff] }
 0x2ff   :  { %3697 = vmatmul.bf16.gmra.mxu0 %v3176_v46  ;;  %v2980_v63 = vpop.permute.xlu1 %2979  ;;  %v3100_v22 = vsel %vm779_vm0, %v2816_v35, %v2872_v12  ;;  %v2710_v46 = vpack.c.b16 %v2696_v44, %v5630_v16  ;;  %v2817_v16 = vpack.c.b16 %v5492_v28, %v5449_v15 }
 0x300   :  { %3535 = vmatmul.bf16.gmra.mxu1 %v3068_v59  ;;  %v3136_v32 = vsel %vm779_vm0, %v2924_v13, %v2980_v63  ;;  %v2604_v59 = vpack.c.bf16 %v2586_v0, %v2586_v0  ;;  %v2711_v0 = vpack.c.b16 %v2698_v2, %v5641_v39  ;;  %v2818_v39 = vpack.c.b16 %v5496_v31, %v5494_v30 }
 0x301   :  { %v3072_v3 = vsel %vm779_vm0, %v2710_v46, %v5626_v25  ;;  %v2700_v25 = vunpack.c.l.b16 %v2466_v40  ;;  %v2605_v46 = vpack.c.bf16 %v2587_v10, %v2587_v10 }
 0x302   :  { %v2910_v19 = vunpack.c.l.b16 %v2604_v59  ;;  %v3076_v20 = vsel %vm779_vm0, %v2711_v0, %v5628_v50  ;;  %v2450_v59 = vld [vmem:[#allocation2 + $0x6b] sm:$0xff] }
 0x303   :  { %v2911_v62 = vunpack.c.l.b16 %v2605_v46 }
 0x304   :  { %v2925_v44 = vpack.c.b16 %v2910_v19, %v2909_v8  ;;  %v2468_v19 = vpack.c.bf16 %v2450_v59, %v2450_v59 }
 0x306   :  { %v2874_v12 = vpop.permute.xlu0 %2873  ;;  %v2702_v50 = vunpack.c.l.b16 %v2468_v19 }
 0x307   :  { %v2982_v63 = vpop.permute.xlu1 %2981  ;;  %v3104_v35 = vsel %vm779_vm0, %v2817_v16, %v2874_v12 }
 0x308   :  { %3584 = vmatmul.bf16.gmra.mxu2 %v3100_v22  ;;  %v3140_v13 = vsel %vm779_vm0, %v2925_v44, %v2982_v63  ;;  %v5665_v22 = vunpack.c.l.b16 %v2467_v5  ;;  %v4407_v44 = vld [vmem:[%s6068_s2 + $0x100] sm:$0xff] }
 0x309   :  { %3638 = vmatmul.bf16.gmra.mxu3 %v3136_v32  ;;  %v3034_v32 = vpop.permute.xlu2 %3033  ;;  %3740 = vmatpush.bf16.msra.mxu1 %v4407_v44 }
 0x30a   :  { %v3005_v48 = vpack.c.b16 %v5665_v22, %v2700_v25 }
 0x30c   :  { %v3184_v7 = vsel %vm779_vm0, %v3005_v48, %v3034_v32  ;;  %v2590_v32 = vld [vmem:[#allocation2 + $0x58] sm:$0xff] }
 0x30e   :  { %v2876_v8 = vpop.permute.xlu0 %2875 }
 0x30f   :  { %3702 = vmatmul.bf16.gmra.mxu0 %v3180_v17  ;;  %v2606_v17 = vpack.c.bf16 %v2588_v41, %v2588_v41  ;;  %v2984_v40 = vpop.permute.xlu1 %2983  ;;  %v3108_v5 = vsel %vm779_vm0, %v2818_v39, %v2876_v8  ;;  %v2712_v41 = vpack.c.b16 %v2700_v25, %v5651_v4  ;;  %v2819_v4 = vpack.c.b16 %v5500_v42, %v5498_v18 }
 0x310   :  { %3540 = vmatmul.bf16.gmra.mxu1 %v3072_v3  ;;  %v2451_v3 = vld [vmem:[#allocation2 + $0x73] sm:$0xff] }
 0x311   :  { %v2912_v60 = vunpack.c.l.b16 %v2606_v17  ;;  %v2469_v12 = vpack.c.bf16 %v2451_v3, %v2451_v3  ;;  %v3080_v46 = vsel %vm779_vm0, %v2712_v41, %v5602_v38  ;;  %v2452_v17 = vld [vmem:[#allocation2 + $0x7b] sm:$0xff] }
 0x313   :  { %v2926_v2 = vpack.c.b16 %v2912_v60, %v2911_v62  ;;  %v5676_v16 = vunpack.c.l.b16 %v2469_v12  ;;  %v2470_v60 = vpack.c.bf16 %v2452_v17, %v2452_v17 }
 0x315   :  { %v3144_v63 = vsel %vm779_vm0, %v2926_v2, %v2984_v40  ;;  %v3006_v10 = vpack.c.b16 %v5676_v16, %v2702_v50  ;;  %v2704_v38 = vunpack.c.l.b16 %v2470_v60 }
 0x316   :  { %v2878_v62 = vpop.permute.xlu0 %2877 }
 0x317   :  { %v2986_v19 = vpop.permute.xlu1 %2985  ;;  %v3112_v12 = vsel %vm779_vm0, %v2819_v4, %v2878_v62  ;;  %v2593_v4 = vld [vmem:[#allocation2 + $0x70] sm:$0xff] }
 0x318   :  { %3589 = vmatmul.bf16.gmra.mxu2 %v3104_v35  ;;  %v3036_v35 = vpop.permute.xlu2 %3035 }
 0x319   :  { %3643 = vmatmul.bf16.gmra.mxu3 %v3140_v13  ;;  %v2589_v13 = vld [vmem:[#allocation2 + $0x50] sm:$0xff]  ;;  %v3188_v48 = vsel %vm779_vm0, %v3006_v10, %v3036_v35  ;;  %v2713_v35 = vpack.c.b16 %v2702_v50, %v5665_v22  ;;  %v2820_v22 = vpack.c.b16 %v5504_v47, %v5502_v14 }
 0x31a   :  { %v2607_v0 = vpack.c.bf16 %v2589_v13, %v2589_v13 }
 0x31b   :  { %v3084_v41 = vsel %vm779_vm0, %v2713_v35, %v5633_v45  ;;  %v2654_v35 = vld [vmem:[#allocation2 + $0x9b] sm:$0xff] }
 0x31c   :  { %v2913_v59 = vunpack.c.l.b16 %v2607_v0  ;;  %v2653_v0 = vld [vmem:[#allocation2 + $0x93] sm:$0xff] }
 0x31e   :  { %v2880_v17 = vpop.permute.xlu0 %2879 }
 0x31f   :  { %3707 = vmatmul.bf16.gmra.mxu0 %v3184_v7  ;;  %v2608_v7 = vpack.c.bf16 %v2590_v32, %v2590_v32  ;;  %v3116_v62 = vsel %vm779_vm0, %v2820_v22, %v2880_v17  ;;  %v2596_v22 = vld [vmem:[#allocation2 + $0x88] sm:$0xff] }
 0x320   :  { %3545 = vmatmul.bf16.gmra.mxu1 %v3076_v20  ;;  %v2453_v20 = vld [vmem:[#allocation2 + $0x83] sm:$0xff]  ;;  %v3038_v2 = vpop.permute.xlu2 %3037 }
 0x321   :  { %v2914_v3 = vunpack.c.l.b16 %v2608_v7  ;;  %v2471_v8 = vpack.c.bf16 %v2453_v20, %v2453_v20 }
 0x323   :  { %v2927_v25 = vpack.c.b16 %v2914_v3, %v2913_v59  ;;  %v5690_v39 = vunpack.c.l.b16 %v2471_v8  ;;  %v2656_v59 = vpack.c.bf16 %v2653_v0, %v2653_v0  ;;  %v2988_v3 = vpop.permute.xlu1 %2987 }
 0x325   :  { %v3148_v40 = vsel %vm779_vm0, %v2927_v25, %v2986_v19  ;;  %v3007_v44 = vpack.c.b16 %v5690_v39, %v2704_v38  ;;  %v2998_v8 = vunpack.c.l.b16 %v2656_v59  ;;  %v2594_v25 = vld [vmem:[#allocation2 + $0x78] sm:$0xff] }
 0x327   :  { %v3192_v13 = vsel %vm779_vm0, %v3007_v44, %v3038_v2 }
 0x328   :  { %3594 = vmatmul.bf16.gmra.mxu2 %v3108_v5  ;;  %v2591_v5 = vld [vmem:[#allocation2 + $0x60] sm:$0xff]  ;;  %v3040_v19 = vpop.permute.xlu2 %3039 }
 0x329   :  { %3648 = vmatmul.bf16.gmra.mxu3 %v3144_v63  ;;  %v2592_v63 = vld [vmem:[#allocation2 + $0x68] sm:$0xff]  ;;  %v2609_v32 = vpack.c.bf16 %v2591_v5, %v2591_v5  ;;  %v2611_v5 = vpack.c.bf16 %v2593_v4, %v2593_v4  ;;  %v2614_v4 = vpack.c.bf16 %v2596_v22, %v2596_v22 }
 0x32a   :  { %v2610_v10 = vpack.c.bf16 %v2592_v63, %v2592_v63  ;;  %v2612_v63 = vpack.c.bf16 %v2594_v25, %v2594_v25 }
 0x32b   :  { %v2915_v7 = vunpack.c.l.b16 %v2609_v32  ;;  %v2917_v32 = vunpack.c.l.b16 %v2611_v5 }
 0x32f   :  { %3712 = vmatmul.bf16.gmra.mxu0 %v3188_v48  ;;  %v2454_v48 = vld [vmem:[#allocation2 + $0x8b] sm:$0xff] }
 0x330   :  { %3550 = vmatmul.bf16.gmra.mxu1 %v3080_v46  ;;  %v2916_v46 = vunpack.c.l.b16 %v2610_v10  ;;  %v2472_v20 = vpack.c.bf16 %v2454_v48, %v2454_v48  ;;  %v2918_v10 = vunpack.c.l.b16 %v2612_v63  ;;  %v2657_v48 = vpack.c.bf16 %v2654_v35, %v2654_v35  ;;  %v3042_v59 = vpop.permute.xlu2 %3041 }
 0x332   :  { %v2928_v50 = vpack.c.b16 %v2916_v46, %v2915_v7  ;;  %v2706_v45 = vunpack.c.l.b16 %v2472_v20  ;;  %v2990_v7 = vpop.permute.xlu1 %2989 }
 0x334   :  { %v3152_v60 = vsel %vm779_vm0, %v2928_v50, %v2988_v3  ;;  %v2595_v3 = vld [vmem:[#allocation2 + $0x80] sm:$0xff] }
 0x338   :  { %3599 = vmatmul.bf16.gmra.mxu2 %v3112_v12  ;;  %v3008_v12 = vpack.c.b16 %v2998_v8, %v2706_v45 }
 0x339   :  { %3653 = vmatmul.bf16.gmra.mxu3 %v3148_v40  ;;  %v2714_v40 = vpack.c.b16 %v2704_v38, %v5676_v16  ;;  %v2821_v16 = vpack.c.b16 %v5512_v36, %v5506_v6  ;;  %v2929_v38 = vpack.c.b16 %v2918_v10, %v2917_v32  ;;  %v2597_v32 = vld [vmem:[#allocation2 + $0x90] sm:$0xff] }
 0x33a   :  { %v3196_v2 = vsel %vm779_vm0, %v3008_v12, %v3040_v19  ;;  %v2613_v19 = vpack.c.bf16 %v2595_v3, %v2595_v3  ;;  %v2992_v5 = vpop.permute.xlu1 %2991 }
 0x33b   :  { %v3088_v44 = vsel %vm779_vm0, %v2714_v40, %v5636_v34  ;;  %v3156_v17 = vsel %vm779_vm0, %v2929_v38, %v2990_v7  ;;  %v2999_v34 = vunpack.c.l.b16 %v2657_v48  ;;  %v2920_v40 = vunpack.c.l.b16 %v2614_v4 }
 0x33c   :  { %v2919_v12 = vunpack.c.l.b16 %v2613_v19  ;;  %v2615_v48 = vpack.c.bf16 %v2597_v32, %v2597_v32 }
 0x33e   :  { %v2930_v35 = vpack.c.b16 %v2920_v40, %v2919_v12 }
 0x33f   :  { %3717 = vmatmul.bf16.gmra.mxu0 %v3192_v13  ;;  %v2655_v13 = vld [vmem:[#allocation2 + $0xa3] sm:$0xff] }
 0x340   :  { %3555 = vmatmul.bf16.gmra.mxu1 %v3084_v41  ;;  %v2882_v41 = vpop.permute.xlu0 %2881  ;;  %v2658_v0 = vpack.c.bf16 %v2655_v13, %v2655_v13  ;;  %v2526_v13 = vld [vmem:[#allocation2 + $0x8d] sm:$0xff] }
 0x341   :  { %v3120_v46 = vsel %vm779_vm0, %v2821_v16, %v2882_v41  ;;  %v2544_v41 = vpack.c.bf16 %v2526_v13, %v2526_v13  ;;  %v2921_v16 = vunpack.c.l.b16 %v2615_v48 }
 0x342   :  { %v3000_v20 = vunpack.c.l.b16 %v2658_v0 }
 0x343   :  { %v5721_v7 = vunpack.c.l.b16 %v2544_v41 }
 0x344   :  { %v3009_v50 = vpack.c.b16 %v3000_v20, %v2999_v34 }
 0x345   :  { %v2823_v20 = vpack.c.b16 %v5721_v7, %v5519_v49 }
 0x346   :  { %v3200_v8 = vsel %vm779_vm0, %v3009_v50, %v3042_v59 }
 0x348   :  { %3604 = vmatmul.bf16.gmra.mxu2 %v3116_v62 }
 0x349   :  { %3658 = vmatmul.bf16.gmra.mxu3 %v3152_v60  ;;  %v2715_v60 = vpack.c.b16 %v2706_v45, %v5690_v39  ;;  %v3160_v45 = vsel %vm779_vm0, %v2930_v35, %v2992_v5 }
 0x34b   :  { %v3092_v25 = vsel %vm779_vm0, %v2715_v60, %v5616_v56  ;;  %v2598_v56 = vld [vmem:[#allocation2 + $0x98] sm:$0xff] }
 0x34c   :  { %v2616_v0 = vpack.c.bf16 %v2598_v56, %v2598_v56 }
 0x34e   :  { %v2922_v38 = vunpack.c.l.b16 %v2616_v0 }
 0x34f   :  { %3722 = vmatmul.bf16.gmra.mxu0 %v3196_v2  ;;  %v2884_v2 = vpop.permute.xlu0 %2883 }
 0x350   :  { %3560 = vmatmul.bf16.gmra.mxu1 %v3088_v44  ;;  %v2822_v44 = vpack.c.b16 %v5516_v55, %v5514_v33  ;;  %v2931_v59 = vpack.c.b16 %v2922_v38, %v2921_v16  ;;  %v6098_v16 = vpack.c.b16 %v5502_v14, %v5500_v42 }
 0x352   :  { %v3124_v39 = vsel %vm779_vm0, %v2822_v44, %v2884_v2 }
 0x358   :  { %3609 = vmatmul.bf16.gmra.mxu2 %v3120_v46  ;;  %v2886_v46 = vpop.permute.xlu0 %2885 }
 0x359   :  { %3663 = vmatmul.bf16.gmra.mxu3 %v3156_v17  ;;  %v2994_v17 = vpop.permute.xlu1 %2993  ;;  %v3128_v3 = vsel %vm779_vm0, %v2823_v20, %v2886_v46 }
 0x35a   :  { %v3164_v22 = vsel %vm779_vm0, %v2931_v59, %v2994_v17 }
 0x35d   :  { %v3526_v62 = vpop.f32.mrf.mxu1 }
 0x35f   :  { %3727 = vmatmul.bf16.gmra.mxu0 %v3200_v8  ;;  %v6096_v8 = vpack.c.b16 %v5494_v30, %v5492_v28 }
 0x360   :  { %3565 = vmatmul.bf16.gmra.mxu1 %v3092_v25 }
 0x365   :  { %v3528_v63 = vpop.f32.mrf.mxu1 }
 0x368   :  { %3614 = vmatmul.bf16.gmra.mxu2 %v3124_v39 }
 0x369   :  { %3668 = vmatmul.bf16.gmra.mxu3 %v3160_v45 }
 0x36d   :  { %v3531_v10 = vpop.f32.mrf.mxu1 }
 0x370   :  { %4330 = vmatmul.msk.bf16.vlgmr.msra.gmra.mxu1 %vm779_vm0, %v3049_v27 }
 0x375   :  { %v3533_v34 = vpop.f32.mrf.mxu1 }
 0x378   :  { %3619 = vmatmul.bf16.gmra.mxu2 %v3128_v3 }
 0x379   :  { %3673 = vmatmul.bf16.gmra.mxu3 %v3164_v22 }
 0x37b   :  { %v3580_v1 = vpop.f32.mrf.mxu2 }
 0x37c   :  { %v3581_v15 = vadd.f32 %v3580_v1, %v3526_v62  ;;  %v3634_v27 = vpop.f32.mrf.mxu3  ;;  %v6097_v62 = vpack.c.b16 %v5498_v18, %v5496_v31 }
 0x37d   :  { %v3536_v50 = vpop.f32.mrf.mxu1 }
 0x37e   :  { %v5727_v60 = vadd.f32 %v3634_v27, %v3581_v15  ;;  %v6099_v15 = vpack.c.b16 %v5506_v6, %v5504_v47  ;;  %v6101_v47 = vpack.c.b16 %v5519_v49, %v5516_v55  ;;  %v2665_v6 = vld [vmem:[#allocation2 + $0x95] sm:$0xff] }
 0x380   :  { %4331 = vmatmul.msk.bf16.gmra.mxu1 %vm779_vm0, %v6096_v8  ;;  %v6100_v8 = vpack.c.b16 %v5514_v33, %v5512_v36 }
 0x383   :  { %v3582_v19 = vpop.f32.mrf.mxu2 }
 0x384   :  { %v3583_v4 = vadd.f32 %v3582_v19, %v3528_v63  ;;  %v3636_v25 = vpop.f32.mrf.mxu3 }
 0x385   :  { %v3538_v12 = vpop.f32.mrf.mxu1 }
 0x386   :  { %v3637_v40 = vadd.f32 %v3636_v25, %v3583_v4 }
 0x38b   :  { %v3585_v2 = vpop.f32.mrf.mxu2 }
 0x38c   :  { %v3586_v5 = vadd.f32 %v3585_v2, %v3531_v10  ;;  %v3639_v44 = vpop.f32.mrf.mxu3  ;;  %v3688_v10 = vpop.f32.mrf.mxu0 }
 0x38d   :  { %v3541_v35 = vpop.f32.mrf.mxu1 }
 0x38e   :  { %v3640_v39 = vadd.f32 %v3639_v44, %v3586_v5  ;;  %v2668_v5 = vpack.c.bf16 %v2665_v6, %v2665_v6 }
 0x390   :  { %4332 = vmatmul.msk.bf16.gmra.mxu1 %vm779_vm0, %v6097_v62 }
 0x393   :  { %v3587_v45 = vpop.f32.mrf.mxu2 }
 0x394   :  { %v3588_v13 = vadd.f32 %v3587_v45, %v3533_v34  ;;  %v3641_v28 = vpop.f32.mrf.mxu3  ;;  %v3690_v34 = vpop.f32.mrf.mxu0  ;;  %v2666_v45 = vld [vmem:[#allocation2 + $0x9d] sm:$0xff] }
 0x395   :  { %v5737_v30 = vpop.f32.mrf.mxu1  ;;  %v2669_v55 = vpack.c.bf16 %v2666_v45, %v2666_v45 }
 0x396   :  { %v3642_v32 = vadd.f32 %v3641_v28, %v3588_v13  ;;  %v2667_v13 = vld [vmem:[#allocation2 + $0xa5] sm:$0xff] }
 0x397   :  { %v2670_v49 = vpack.c.bf16 %v2667_v13, %v2667_v13 }
 0x39b   :  { %v3590_v63 = vpop.f32.mrf.mxu2 }
 0x39c   :  { %v3591_v56 = vadd.f32 %v3590_v63, %v3536_v50  ;;  %v3644_v41 = vpop.f32.mrf.mxu3  ;;  %v3693_v42 = vpop.f32.mrf.mxu0  ;;  %v3047_v63 = vunpack.c.l.b16 %v2669_v55 }
 0x39d   :  { %v5739_v48 = vpop.f32.mrf.mxu1 }
 0x39e   :  { %v3645_v0 = vadd.f32 %v3644_v41, %v3591_v56  ;;  %v3048_v56 = vunpack.c.l.b16 %v2670_v49  ;;  %v3689_v41 = vadd.f32 %v3688_v10, %v5727_v60 }
 0x3a0   :  { %4333 = vmatmul.msk.bf16.gmra.mxu1 %vm779_vm0, %v6098_v16 }
 0x3a3   :  { %v3592_v31 = vpop.f32.mrf.mxu2 }
 0x3a4   :  { %v3593_v18 = vadd.f32 %v3592_v31, %v3538_v12  ;;  %v3646_v38 = vpop.f32.mrf.mxu3  ;;  %v3695_v27 = vpop.f32.mrf.mxu0 }
 0x3a5   :  { %v5745_v46 = vpop.f32.mrf.mxu1 }
 0x3a6   :  { %v3647_v17 = vadd.f32 %v3646_v38, %v3593_v18  ;;  %v3057_v18 = vpack.c.b16 %v3048_v56, %v3047_v63  ;;  %v3691_v38 = vadd.f32 %v3690_v34, %v3637_v40 }
 0x3ab   :  { %v3595_v20 = vpop.f32.mrf.mxu2 }
 0x3ac   :  { %v3596_v59 = vadd.f32 %v3595_v20, %v3541_v35  ;;  %v3649_v3 = vpop.f32.mrf.mxu3  ;;  %v3698_v4 = vpop.f32.mrf.mxu0  ;;  %v3046_v35 = vunpack.c.l.b16 %v2668_v5 }
 0x3ad   :  { %v5747_v22 = vpop.f32.mrf.mxu1  ;;  %v3699_v10 = vadd.f32 %v3698_v4, %v3645_v0 }
 0x3ae   :  { %v3650_v1 = vadd.f32 %v3649_v3, %v3596_v59  ;;  %v3056_v62 = vpack.c.b16 %v3046_v35, %v5721_v7  ;;  %v3694_v59 = vadd.f32 %v3693_v42, %v3640_v39 }
 0x3b0   :  { %4334 = vmatmul.msk.bf16.gmra.mxu1 %vm779_vm0, %v6099_v15 }
 0x3b3   :  { %v3597_v15 = vpop.f32.mrf.mxu2 }
 0x3b4   :  { %v3700_v12 = vpop.f32.mrf.mxu0  ;;  %v3651_v60 = vpop.f32.mrf.mxu3 }
 0x3b5   :  { %v5753_v14 = vpop.f32.mrf.mxu1  ;;  %v3701_v40 = vadd.f32 %v3700_v12, %v3647_v17 }
 0x3bc   :  { %v3703_v44 = vpop.f32.mrf.mxu0  ;;  %v3654_v34 = vpop.f32.mrf.mxu3 }
 0x3bd   :  { %v5755_v50 = vpop.f32.mrf.mxu1  ;;  %v3704_v36 = vadd.f32 %v3703_v44, %v3650_v1  ;;  %v3600_v44 = vpop.f32.mrf.mxu2 }
 0x3be   :  { %v3601_v43 = vadd.f32 %v3600_v44, %v5739_v48 }
 0x3c0   :  { %4335 = vmatmul.msk.bf16.gmra.mxu1 %vm779_vm0, %v6100_v8  ;;  %v3696_v8 = vadd.f32 %v3695_v27, %v3642_v32 }
 0x3c4   :  { %v3656_v32 = vpop.f32.mrf.mxu3 }
 0x3c5   :  { %v5761_v19 = vpop.f32.mrf.mxu1  ;;  %v3602_v39 = vpop.f32.mrf.mxu2 }
 0x3c6   :  { %v3603_v54 = vadd.f32 %v3602_v39, %v5745_v46 }
 0x3cc   :  { %v3659_v0 = vpop.f32.mrf.mxu3 }
 0x3cd   :  { %v5763_v25 = vpop.f32.mrf.mxu1  ;;  %v3605_v27 = vpop.f32.mrf.mxu2 }
 0x3d0   :  { %4336 = vmatmul.msk.bf16.gmra.mxu1 %vm779_vm0, %v6101_v47 }
 0x3d5   :  { %v5769_v2 = vpop.f32.mrf.mxu1  ;;  %v3607_v4 = vpop.f32.mrf.mxu2 }
 0x3d6   :  { %v3608_v46 = vadd.f32 %v3607_v4, %v5753_v14 }
 0x3dd   :  { %v5771_v33 = vpop.f32.mrf.mxu1  ;;  %v3610_v17 = vpop.f32.mrf.mxu2 }
 0x3e0   :  { %4337 = vmatmul.msk.bf16.gmra.mxu1 %vm779_vm0, %v3056_v62  ;;  %v3705_v62 = vpop.f32.mrf.mxu0 }
 0x3e5   :  { %v5775_v28 = vpop.f32.mrf.mxu1 }
 0x3e6   :  { %6102 = vst [vmem:[#allocation12_spill] sm:$0xff] %v5775_v28 }
 0x3e8   :  { %v3708_v42 = vpop.f32.mrf.mxu0 }
 0x3ed   :  { %v3742_v16 = vpop.f32.mrf.mxu1 }
 0x3ee   :  { %v5778_v31 = vadd.f32 %v3742_v16, %v3689_v41 }
 0x3f0   :  { %4338 = vmatmul.msk.bf16.gmra.mxu1 %vm779_vm0, %v3057_v18  ;;  %v3710_v63 = vpop.f32.mrf.mxu0  ;;  %v3661_v18 = vpop.f32.mrf.mxu3 }
 0x3f5   :  { %v3744_v7 = vpop.f32.mrf.mxu1 }
 0x3f6   :  { %v5781_v20 = vadd.f32 %v3744_v7, %v3691_v38 }
 0x3f8   :  { %6103 = vst [vmem:[#allocation13_spill] sm:$0xff] %v5781_v20  ;;  %v3713_v41 = vpop.f32.mrf.mxu0  ;;  %v3664_v7 = vpop.f32.mrf.mxu3  ;;  %v3788_v29 = vmul.f32 %v5045_v37, %v5781_v20  ;;  %v3657_v37 = vadd.f32 %v3656_v32, %v3603_v54 }
 0x3fa   :  { %v3806_v48 = vsel %vm779_vm0, %v3788_v29, 0.0 }
 0x3fd   :  { %v3747_v3 = vpop.f32.mrf.mxu1 }
 0x3fe   :  { %v5783_v1 = vadd.f32 %v3747_v3, %v3694_v59  ;;  %v3612_v3 = vpop.f32.mrf.mxu2 }
 0x3ff   :  { %v3613_v4 = vadd.f32 %v3612_v3, %v5761_v19 }
 0x400   :  { %v3715_v12 = vpop.f32.mrf.mxu0 }
 0x405   :  { %v3749_v47 = vpop.f32.mrf.mxu1 }
 0x406   :  { %v5785_v6 = vadd.f32 %v3749_v47, %v3696_v8 }
 0x408   :  { %v5793_v8 = vpop.f32.mrf.mxu0  ;;  %v3790_v44 = vmul.f32 %v5060_v24, %v5785_v6 }
 0x40a   :  { %v3810_v29 = vsel %vm779_vm0, %v3790_v44, 0.0 }
 0x40d   :  { %v3752_v5 = vpop.f32.mrf.mxu1 }
 0x40e   :  { %v5787_v35 = vadd.f32 %v3752_v5, %v3699_v10  ;;  %v3615_v10 = vpop.f32.mrf.mxu2 }
 0x410   :  { %v5797_v5 = vpop.f32.mrf.mxu0 }
 0x411   :  { %6104 = vst [vmem:[#allocation14_spill] sm:$0xff] %v5797_v5  ;;  %v3787_v5 = vmul.f32 0.0, %v5778_v31 }
 0x413   :  { %v3805_v39 = vsel %vm779_vm0, %v3787_v5, 0.0 }
 0x415   :  { %v3754_v45 = vpop.f32.mrf.mxu1 }
 0x416   :  { %v5789_v13 = vadd.f32 %v3754_v45, %v3701_v40  ;;  %v3617_v51 = vpop.f32.mrf.mxu2 }
 0x418   :  { %v5806_v28 = vpop.f32.mrf.mxu0  ;;  %v3792_v54 = vmul.f32 %v5077_v61, %v5789_v13 }
 0x41d   :  { %v3757_v55 = vpop.f32.mrf.mxu1 }
 0x41e   :  { %v5791_v49 = vadd.f32 %v3757_v55, %v3704_v36  ;;  %v3666_v36 = vpop.f32.mrf.mxu3  ;;  %v3598_v55 = vadd.f32 %v3597_v15, %v5737_v30  ;;  %v3606_v30 = vadd.f32 %v3605_v27, %v5747_v22  ;;  %v3655_v15 = vadd.f32 %v3654_v34, %v3601_v43 }
 0x41f   :  { %v3611_v22 = vadd.f32 %v3610_v17, %v5755_v50  ;;  %v3807_v34 = vadd.f32 %v3806_v48, %v3805_v39  ;;  %v3662_v27 = vadd.f32 %v3661_v18, %v3608_v46  ;;  %v3618_v48 = vadd.f32 %v3617_v51, %v5769_v2 }
 0x420   :  { %v3652_v26 = vadd.f32 %v3651_v60, %v3598_v55  ;;  %v3791_v55 = vmul.f32 %v5074_v57, %v5787_v35  ;;  %v3709_v14 = vadd.f32 %v3708_v42, %v3655_v15  ;;  %v3620_v57 = vpop.f32.mrf.mxu2  ;;  %v3793_v50 = vmul.f32 %v5098_v52, %v5791_v49  ;;  %v3725_v17 = vpop.f32.mrf.mxu0 }
 0x421   :  { %v3814_v42 = vsel %vm779_vm0, %v3792_v54, 0.0  ;;  %v3667_v15 = vadd.f32 %v3666_v36, %v3613_v4 }
 0x422   :  { %v3706_v20 = vadd.f32 %v3705_v62, %v3652_v26  ;;  %v3812_v26 = vsel %vm779_vm0, %v3791_v55, 0.0 }
 0x425   :  { %v3759_v56 = vpop.f32.mrf.mxu1 }
 0x426   :  { %v3669_v45 = vpop.f32.mrf.mxu3  ;;  %v5826_v32 = vadd.f32 %v3759_v56, %v3706_v20  ;;  %v3616_v20 = vadd.f32 %v3615_v10, %v5763_v25  ;;  %v3716_v25 = vadd.f32 %v3715_v12, %v3662_v27  ;;  %v3621_v10 = vadd.f32 %v3620_v57, %v5771_v33 }
 0x428   :  { %v3794_v19 = vmul.f32 %v5104_v53, %v5826_v32  ;;  %v3728_v27 = vpop.f32.mrf.mxu0 }
 0x42d   :  { %v3762_v16 = vpop.f32.mrf.mxu1 }
 0x42e   :  { %v3671_v43 = vpop.f32.mrf.mxu3  ;;  %v5832_v62 = vadd.f32 %v3762_v16, %v3709_v14  ;;  %v3816_v16 = vsel %vm779_vm0, %v3793_v50, 0.0 }
 0x435   :  { %v3764_v38 = vpop.f32.mrf.mxu1 }
 0x436   :  { %v3674_v36 = vpop.f32.mrf.mxu3 }
 0x43d   :  { %v3767_v59 = vpop.f32.mrf.mxu1 }
 0x445   :  { %v5795_v47 = vpop.f32.mrf.mxu1 }
 0x446   :  { %v5851_v51 = vadd.f32 %v5795_v47, %v3716_v25  ;;  %v3622_v47 = vpop.f32.mrf.mxu2 }
 0x44d   :  { %v5799_v40 = vpop.f32.mrf.mxu1 }
 0x44e   :  { %6105 = vst [vmem:[#allocation15_spill] sm:$0xff] %v5799_v40  ;;  %v3789_v40 = vmul.f32 %v5053_v23, %v5783_v1  ;;  %v3660_v23 = vadd.f32 %v3659_v0, %v3606_v30  ;;  %v3711_v0 = vadd.f32 %v3710_v63, %v3657_v37  ;;  %v3665_v30 = vadd.f32 %v3664_v7, %v3611_v22 }
 0x44f   :  { %v3795_v37 = vmul.f32 %v5131_v58, %v5832_v62  ;;  %v3670_v7 = vadd.f32 %v3669_v45, %v3616_v20  ;;  %v3675_v22 = vadd.f32 %v3674_v36, %v3621_v10  ;;  %v6110_v20 = vld [vmem:[#allocation12_spill] sm:$0xff]  ;;  %v6114_v36 = vld [vmem:[#allocation11_spill] sm:$0xff] }
 0x450   :  { %v3808_v60 = vsel %vm779_vm0, %v3789_v40, 0.0  ;;  %v5838_v18 = vadd.f32 %v3764_v38, %v3711_v0  ;;  %v3714_v3 = vadd.f32 %v3713_v41, %v3660_v23  ;;  %v3818_v38 = vsel %vm779_vm0, %v3794_v19, 0.0 }
 0x451   :  { %v3809_v5 = vadd.f32 %v3808_v60, %v3807_v34  ;;  %v3719_v2 = vadd.f32 %v5793_v8, %v3665_v30  ;;  %v3672_v41 = vadd.f32 %v3671_v43, %v3618_v48  ;;  %v3820_v12 = vsel %vm779_vm0, %v3795_v37, 0.0  ;;  %v6107_v60 = vld [vmem:[#allocation14_spill] sm:$0xff]  ;;  %v6112_v37 = vld [vmem:[#allocation9_spill] sm:$0xff] }
 0x452   :  { %v5844_v63 = vadd.f32 %v3767_v59, %v3714_v3  ;;  %v3796_v23 = vmul.f32 %v5146_v21, %v5838_v18  ;;  %v3721_v55 = vadd.f32 %v6107_v60, %v3667_v15  ;;  %v6108_v8 = vld [vmem:[#allocation6_spill] sm:$0xff]  ;;  %v3724_v14 = vadd.f32 %v5806_v28, %v3670_v7 }
 0x453   :  { %v3811_v56 = vadd.f32 %v3810_v29, %v3809_v5  ;;  %v3798_v43 = vmul.f32 %v6108_v8, %v5851_v51  ;;  %v3726_v30 = vadd.f32 %v3725_v17, %v3672_v41  ;;  %v3729_v28 = vadd.f32 %v3728_v27, %v3675_v22  ;;  %v3676_v17 = vpop.f32.mrf.mxu3 }
 0x454   :  { %v3797_v57 = vmul.f32 %v5152_v9, %v5844_v63  ;;  %v3822_v29 = vsel %vm779_vm0, %v3796_v23, 0.0 }
 0x455   :  { %v5808_v11 = vpop.f32.mrf.mxu1  ;;  %v3813_v44 = vadd.f32 %v3812_v26, %v3811_v56  ;;  %v6106_v33 = vld [vmem:[#allocation15_spill] sm:$0xff]  ;;  %v3623_v56 = vadd.f32 %v3622_v47, %v6110_v20  ;;  %v3826_v19 = vsel %vm779_vm0, %v3798_v43, 0.0 }
 0x456   :  { %v5858_v45 = vadd.f32 %v6106_v33, %v3719_v2  ;;  %v5865_v54 = vadd.f32 %v5808_v11, %v3721_v55  ;;  %v3824_v5 = vsel %vm779_vm0, %v3797_v57, 0.0  ;;  %v6109_v26 = vld [vmem:[#allocation7_spill] sm:$0xff]  ;;  %v6111_v11 = vld [vmem:[#allocation8_spill] sm:$0xff] }
 0x457   :  { %v3815_v46 = vadd.f32 %v3814_v42, %v3813_v44  ;;  %v3677_v10 = vadd.f32 %v3676_v17, %v3623_v56 }
 0x458   :  { %v3799_v50 = vmul.f32 %v6109_v26, %v5858_v45  ;;  %v3800_v3 = vmul.f32 %v6111_v11, %v5865_v54 }
 0x459   :  { %v3817_v39 = vadd.f32 %v3816_v16, %v3815_v46 }
 0x45a   :  { %v3828_v16 = vsel %vm779_vm0, %v3799_v50, 0.0  ;;  %v3830_v46 = vsel %vm779_vm0, %v3800_v3, 0.0  ;;  %v6115_v3 = vld [vmem:[#allocation13_spill] sm:$0xff] }
 0x45b   :  { %v3819_v34 = vadd.f32 %v3818_v38, %v3817_v39  ;;  %v6113_v38 = vld [vmem:[#allocation10_spill] sm:$0xff] }
 0x45d   :  { %v3777_v40 = vpop.f32.mrf.mxu1  ;;  %v3821_v4 = vadd.f32 %v3820_v12, %v3819_v34 }
 0x45e   :  { %v5871_v0 = vadd.f32 %v3777_v40, %v3724_v14 }
 0x45f   :  { %v3823_v42 = vadd.f32 %v3822_v29, %v3821_v4 }
 0x460   :  { %v3801_v40 = vmul.f32 %v6112_v37, %v5871_v0 }
 0x461   :  { %v3825_v48 = vadd.f32 %v3824_v5, %v3823_v42 }
 0x462   :  { %v3832_v41 = vsel %vm779_vm0, %v3801_v40, 0.0  ;;  %v6116_v40 = vld [vmem:[#allocation3_spill] sm:$0xff] }
 0x463   :  { %v3827_v7 = vadd.f32 %v3826_v19, %v3825_v48 }
 0x465   :  { %v3779_v59 = vpop.f32.mrf.mxu1  ;;  %v3829_v2 = vadd.f32 %v3828_v16, %v3827_v7 }
 0x466   :  { %v5877_v15 = vadd.f32 %v3779_v59, %v3726_v30  ;;  %v3730_v59 = vpop.f32.mrf.mxu0 }
 0x467   :  { %v3831_v12 = vadd.f32 %v3830_v46, %v3829_v2  ;;  %v3731_v33 = vadd.f32 %v3730_v59, %v3677_v10  ;;  %v6117_v10 = vld [vmem:[#allocation4_spill] sm:$0xff] }
 0x468   :  { %v3802_v23 = vmul.f32 %v6113_v38, %v5877_v15 }
 0x469   :  { %v3833_v60 = vadd.f32 %v3832_v41, %v3831_v12  ;;  %v6118_v12 = vld [vmem:[#allocation5_spill] sm:$0xff] }
 0x46a   :  { %v3834_v57 = vsel %vm779_vm0, %v3802_v23, 0.0 }
 0x46b   :  { %v3835_v47 = vadd.f32 %v3834_v57, %v3833_v60 }
 0x46d   :  { %v3782_v44 = vpop.f32.mrf.mxu1 }
 0x46e   :  { %v5882_v25 = vadd.f32 %v3782_v44, %v3729_v28 }
 0x470   :  { %v3803_v39 = vmul.f32 %v6114_v36, %v5882_v25 }
 0x472   :  { %v3836_v22 = vsel %vm779_vm0, %v3803_v39, 0.0 }
 0x473   :  { %v3837_v43 = vadd.f32 %v3836_v22, %v3835_v47 }
 0x475   :  { %v3784_v55 = vpop.f32.mrf.mxu1 }
 0x476   :  { %v5892_v34 = vadd.f32 %v3784_v55, %v3731_v33 }
 0x478   :  { %v3804_v29 = vmul.f32 0.0, %v5892_v34 }
 0x47a   :  { %v3838_v14 = vsel %vm779_vm0, %v3804_v29, 0.0 }
 0x47b   :  { %v3839_v27 = vadd.f32 %v3838_v14, %v3837_v43 }
 0x47d   :  { %v3840_v4 = vrot.slane %v3839_v27, 4 }
 0x47f   :  { %v3841_v5 = vadd.f32 %v3840_v4, %v3839_v27 }
 0x481   :  { %v3842_v50 = vrot.slane %v3841_v5, 2 }
 0x483   :  { %v3843_v30 = vadd.f32 %v3842_v50, %v3841_v5 }
 0x485   :  { %v3844_v20 = vrot.slane %v3843_v30, 1 }
 0x487   :  { %v3845_v56 = vadd.f32 %v3844_v20, %v3843_v30 }
 0x489   :  { %v5896_v42 = vmul.f32 0.01, %v3845_v56 }
 0x48b   :  { %v3847_v19 = vsub.f32 %v5778_v31, %v5896_v42  ;;  %v3848_v28 = vsub.f32 %v6115_v3, %v5896_v42  ;;  %v3849_v48 = vsub.f32 %v5783_v1, %v5896_v42  ;;  %v3850_v44 = vsub.f32 %v5785_v6, %v5896_v42 }
 0x48c   :  { %v3851_v7 = vsub.f32 %v5787_v35, %v5896_v42  ;;  %v3852_v23 = vsub.f32 %v5789_v13, %v5896_v42  ;;  %v3853_v59 = vsub.f32 %v5791_v49, %v5896_v42  ;;  %v3854_v60 = vsub.f32 %v5826_v32, %v5896_v42 }
 0x48d   :  { %v3865_v16 = vmul.f32 0.0, %v3847_v19  ;;  %v3866_v17 = vmul.f32 %v6116_v40, %v3848_v28  ;;  %v3867_v46 = vmul.f32 %v6117_v10, %v3849_v48  ;;  %v3868_v2 = vmul.f32 %v5060_v24, %v3850_v44 }
 0x48e   :  { %v3869_v57 = vmul.f32 %v6118_v12, %v3851_v7  ;;  %v3870_v55 = vmul.f32 %v5077_v61, %v3852_v23  ;;  %v3855_v24 = vsub.f32 %v5832_v62, %v5896_v42  ;;  %v3871_v14 = vmul.f32 %v5098_v52, %v3853_v59 }
 0x48f   :  { %v3883_v41 = vmul.f32 %v3865_v16, %v3865_v16  ;;  %v3884_v39 = vmul.f32 %v3866_v17, %v3866_v17  ;;  %v3885_v33 = vmul.f32 %v3867_v46, %v3867_v46  ;;  %v3886_v22 = vmul.f32 %v3868_v2, %v3868_v2 }
 0x490   :  { %v3887_v27 = vmul.f32 %v3869_v57, %v3869_v57  ;;  %v3856_v50 = vsub.f32 %v5838_v18, %v5896_v42  ;;  %v3872_v61 = vmul.f32 %v5104_v53, %v3854_v60  ;;  %v3888_v30 = vmul.f32 %v3870_v55, %v3870_v55 }
 0x491   :  { %v3901_v47 = vsel %vm779_vm0, %v3883_v41, 0.0  ;;  %v3902_v29 = vsel %vm779_vm0, %v3884_v39, 0.0  ;;  %v3904_v4 = vsel %vm779_vm0, %v3885_v33, 0.0  ;;  %v3906_v20 = vsel %vm779_vm0, %v3886_v22, 0.0 }
 0x492   :  { %v3903_v43 = vadd.f32 %v3902_v29, %v3901_v47  ;;  %v3857_v19 = vsub.f32 %v5844_v63, %v5896_v42  ;;  %v3873_v28 = vmul.f32 %v5131_v58, %v3855_v24  ;;  %v3889_v48 = vmul.f32 %v3871_v14, %v3871_v14 }
 0x493   :  { %v3908_v52 = vsel %vm779_vm0, %v3887_v27, 0.0  ;;  %v3858_v16 = vsub.f32 %v5851_v51, %v5896_v42  ;;  %v3874_v40 = vmul.f32 %v5146_v21, %v3856_v50  ;;  %v3890_v17 = vmul.f32 %v3872_v61, %v3872_v61 }
 0x494   :  { %v3905_v5 = vadd.f32 %v3904_v4, %v3903_v43  ;;  %v3910_v53 = vsel %vm779_vm0, %v3888_v30, 0.0  ;;  %v3859_v10 = vsub.f32 %v5858_v45, %v5896_v42  ;;  %v3875_v46 = vmul.f32 %v5152_v9, %v3857_v19 }
 0x495   :  { %v3891_v23 = vmul.f32 %v3873_v28, %v3873_v28  ;;  %v3912_v58 = vsel %vm779_vm0, %v3889_v48, 0.0  ;;  %v3860_v41 = vsub.f32 %v5865_v54, %v5896_v42  ;;  %v3876_v39 = vmul.f32 %v6108_v8, %v3858_v16 }
 0x496   :  { %v3907_v56 = vadd.f32 %v3906_v20, %v3905_v5  ;;  %v3892_v59 = vmul.f32 %v3874_v40, %v3874_v40  ;;  %v3914_v21 = vsel %vm779_vm0, %v3890_v17, 0.0  ;;  %v3861_v57 = vsub.f32 %v5871_v0, %v5896_v42 }
 0x497   :  { %v3877_v33 = vmul.f32 %v6109_v26, %v3859_v10  ;;  %v3893_v60 = vmul.f32 %v3875_v46, %v3875_v46  ;;  %v3916_v9 = vsel %vm779_vm0, %v3891_v23, 0.0  ;;  %v3862_v22 = vsub.f32 %v5877_v15, %v5896_v42 }
 0x498   :  { %v3909_v44 = vadd.f32 %v3908_v52, %v3907_v56  ;;  %v3878_v47 = vmul.f32 %v6111_v11, %v3860_v41  ;;  %v3894_v29 = vmul.f32 %v3876_v39, %v3876_v39  ;;  %v3918_v8 = vsel %vm779_vm0, %v3892_v59, 0.0 }
 0x499   :  { %v3863_v24 = vsub.f32 %v5882_v25, %v5896_v42  ;;  %v3879_v14 = vmul.f32 %v6112_v37, %v3861_v57  ;;  %v3895_v27 = vmul.f32 %v3877_v33, %v3877_v33  ;;  %v3920_v26 = vsel %vm779_vm0, %v3893_v60, 0.0 }
 0x49a   :  { %v3911_v7 = vadd.f32 %v3910_v53, %v3909_v44  ;;  %v3864_v5 = vsub.f32 %v5892_v34, %v5896_v42  ;;  %v3880_v50 = vmul.f32 %v6113_v38, %v3862_v22  ;;  %v3896_v61 = vmul.f32 %v3878_v47, %v3878_v47  ;;  %v777_v47 = vld [vmem:[%s6067_s3 + $0x2] sm:$0x1] }
 0x49b   :  { %v3922_v11 = vsel %vm779_vm0, %v3894_v29, 0.0  ;;  %v3881_v20 = vmul.f32 %v6114_v36, %v3863_v24  ;;  %v3897_v56 = vmul.f32 %v3879_v14, %v3879_v14  ;;  %v3924_v19 = vsel %vm779_vm0, %v3895_v27, 0.0  ;;  %v778_v24 = vld [vmem:[%s6067_s3 + $0x3] sm:$0x1] }
 0x49c   :  { %v3913_v2 = vadd.f32 %v3912_v58, %v3911_v7  ;;  %v3882_v37 = vmul.f32 0.0, %v3864_v5  ;;  %v3898_v48 = vmul.f32 %v3880_v50, %v3880_v50  ;;  %v3926_v52 = vsel %vm779_vm0, %v3896_v61, 0.0 }
 0x49d   :  { %v3899_v16 = vmul.f32 %v3881_v20, %v3881_v20  ;;  %v3928_v40 = vsel %vm779_vm0, %v3897_v56, 0.0 }
 0x49e   :  { %v3915_v12 = vadd.f32 %v3914_v21, %v3913_v2  ;;  %v3900_v38 = vmul.f32 %v3882_v37, %v3882_v37  ;;  %v3930_v53 = vsel %vm779_vm0, %v3898_v48, 0.0 }
 0x49f   :  { %v3932_v10 = vsel %vm779_vm0, %v3899_v16, 0.0 }
 0x4a0   :  { %v3917_v55 = vadd.f32 %v3916_v9, %v3915_v12  ;;  %v3934_v46 = vsel %vm779_vm0, %v3900_v38, 0.0 }
 0x4a2   :  { %v3919_v43 = vadd.f32 %v3918_v8, %v3917_v55 }
 0x4a4   :  { %v3921_v4 = vadd.f32 %v3920_v26, %v3919_v43 }
 0x4a6   :  { %v3923_v30 = vadd.f32 %v3922_v11, %v3921_v4 }
 0x4a8   :  { %v3925_v28 = vadd.f32 %v3924_v19, %v3923_v30 }
 0x4aa   :  { %v3927_v44 = vadd.f32 %v3926_v52, %v3925_v28 }
 0x4ac   :  { %v3929_v17 = vadd.f32 %v3928_v40, %v3927_v44 }
 0x4ae   :  { %v3931_v7 = vadd.f32 %v3930_v53, %v3929_v17 }
 0x4b0   :  { %v3933_v36 = vadd.f32 %v3932_v10, %v3931_v7 }
 0x4b2   :  { %v3935_v23 = vadd.f32 %v3934_v46, %v3933_v36 }
 0x4b4   :  { %v3936_v58 = vrot.slane %v3935_v23, 4 }
 0x4b6   :  { %v3937_v2 = vadd.f32 %v3936_v58, %v3935_v23 }
 0x4b8   :  { %v3938_v41 = vrot.slane %v3937_v2, 2 }
 0x4ba   :  { %v3939_v39 = vadd.f32 %v3938_v41, %v3937_v2 }
 0x4bc   :  { %v3940_v59 = vrot.slane %v3939_v39, 1 }
 0x4be   :  { %v3941_v21 = vadd.f32 %v3940_v59, %v3939_v39 }
 0x4c0   :  { %v3942_v12 = vmul.f32 0.01, %v3941_v21 }
 0x4c2   :  { %v3943_v57 = vadd.f32 1e-05, %v3942_v12 }
 0x4c4   :  { %4431 = vrsqrt.f32 %v3943_v57  ;;  %vm3950_vm15 = vweird.f32 %v3943_v57 }
 0x4ca   :  { %v4432_v33 = vpop.eup %4431 }
 0x4cb   :  { %v3945_v60 = vmul.f32 %v4432_v33, %v3943_v57  ;;  %vm3951_vm14 = vweird.f32 %v4432_v33 }
 0x4cc   :  { %vm3952_vm1 = vmor %vm3950_vm15, %vm3951_vm14 }
 0x4cd   :  { %v3946_v9 = vmul.f32 %v4432_v33, %v3945_v60 }
 0x4cf   :  { %v3947_v55 = vmul.f32 0.5, %v3946_v9 }
 0x4d1   :  { %v3948_v22 = vsub.f32 1.5, %v3947_v55 }
 0x4d3   :  { %v3949_v29 = vmul.f32 %v4432_v33, %v3948_v22 }
 0x4d5   :  { %v3953_v8 = vsel %vm3952_vm1, %v4432_v33, %v3949_v29 }
 0x4d6   :  { %v3954_v43 = vmul.f32 %v3953_v8, %v777_v47 }
 0x4d8   :  { %v3955_v14 = vmul.f32 %v3954_v43, %v5896_v42  ;;  %v3957_v26 = vperm.slane %v3954_v43, 0 }
 0x4da   :  { %v3956_v27 = vsub.f32 %v778_v24, %v3955_v14  ;;  %v3958_v4 = vmul.f32 %v3957_v26, %v5778_v31  ;;  %v3959_v5 = vmul.f32 %v3957_v26, %v6115_v3  ;;  %v3960_v50 = vmul.f32 %v3957_v26, %v5783_v1 }
 0x4db   :  { %v3961_v11 = vmul.f32 %v3957_v26, %v5785_v6  ;;  %v3962_v30 = vmul.f32 %v3957_v26, %v5787_v35  ;;  %v3963_v28 = vmul.f32 %v3957_v26, %v5789_v13  ;;  %v3964_v42 = vmul.f32 %v3957_v26, %v5791_v49 }
 0x4dc   :  { %v3976_v61 = vperm.slane %v3956_v27, 0  ;;  %v3965_v31 = vmul.f32 %v3957_v26, %v5826_v32  ;;  %v3966_v6 = vmul.f32 %v3957_v26, %v5832_v62  ;;  %v3967_v13 = vmul.f32 %v3957_v26, %v5838_v18 }
 0x4dd   :  { %v3968_v32 = vmul.f32 %v3957_v26, %v5844_v63  ;;  %v3969_v62 = vmul.f32 %v3957_v26, %v5851_v51  ;;  %v3970_v18 = vmul.f32 %v3957_v26, %v5858_v45  ;;  %v3971_v63 = vmul.f32 %v3957_v26, %v5865_v54 }
 0x4de   :  { %v3977_v20 = vadd.f32 %v3976_v61, %v3958_v4  ;;  %v3978_v56 = vadd.f32 %v3976_v61, %v3959_v5  ;;  %v3979_v19 = vadd.f32 %v3976_v61, %v3960_v50  ;;  %v3980_v37 = vadd.f32 %v3976_v61, %v3961_v11 }
 0x4df   :  { %v3981_v48 = vadd.f32 %v3976_v61, %v3962_v30  ;;  %v3982_v1 = vadd.f32 %v3976_v61, %v3963_v28  ;;  %v3983_v35 = vadd.f32 %v3976_v61, %v3964_v42  ;;  %v3984_v49 = vadd.f32 %v3976_v61, %v3965_v31 }
 0x4e0   :  { %3995 = vst.msk [vmem:[%s6069_s4] sm:$0xff] %vm779_vm0, %v3977_v20  ;;  %v3985_v3 = vadd.f32 %v3976_v61, %v3966_v6  ;;  %v3986_v52 = vadd.f32 %v3976_v61, %v3967_v13  ;;  %v3987_v44 = vadd.f32 %v3976_v61, %v3968_v32  ;;  %v3988_v16 = vadd.f32 %v3976_v61, %v3969_v62 }
 0x4e1   :  { %3996 = vst.msk [vmem:[%s6069_s4 + $0x8] sm:$0xff] %vm779_vm0, %v3978_v56  ;;  %v3972_v51 = vmul.f32 %v3957_v26, %v5871_v0  ;;  %v3989_v40 = vadd.f32 %v3976_v61, %v3970_v18  ;;  %v3973_v45 = vmul.f32 %v3957_v26, %v5877_v15  ;;  %v3990_v17 = vadd.f32 %v3976_v61, %v3971_v63 }
 0x4e2   :  { %3997 = vst.msk [vmem:[%s6069_s4 + $0x10] sm:$0xff] %vm779_vm0, %v3979_v19  ;;  %v3974_v54 = vmul.f32 %v3957_v26, %v5882_v25  ;;  %v3975_v0 = vmul.f32 %v3957_v26, %v5892_v34 }
 0x4e3   :  { %3998 = vst.msk [vmem:[%s6069_s4 + $0x18] sm:$0xff] %vm779_vm0, %v3980_v37  ;;  %v3991_v38 = vadd.f32 %v3976_v61, %v3972_v51  ;;  %v3992_v53 = vadd.f32 %v3976_v61, %v3973_v45 }
 0x4e4   :  { %3999 = vst.msk [vmem:[%s6069_s4 + $0x20] sm:$0xff] %vm779_vm0, %v3981_v48  ;;  %v3993_v15 = vadd.f32 %v3976_v61, %v3974_v54  ;;  %v3994_v25 = vadd.f32 %v3976_v61, %v3975_v0 }
 0x4e5   :  { %4000 = vst.msk [vmem:[%s6069_s4 + $0x28] sm:$0xff] %vm779_vm0, %v3982_v1 }
 0x4e6   :  { %4001 = vst.msk [vmem:[%s6069_s4 + $0x30] sm:$0xff] %vm779_vm0, %v3983_v35 }
 0x4e7   :  { %4002 = vst.msk [vmem:[%s6069_s4 + $0x38] sm:$0xff] %vm779_vm0, %v3984_v49 }
 0x4e8   :  { %4003 = vst.msk [vmem:[%s6069_s4 + $0x40] sm:$0xff] %vm779_vm0, %v3985_v3 }
 0x4e9   :  { %4004 = vst.msk [vmem:[%s6069_s4 + $0x48] sm:$0xff] %vm779_vm0, %v3986_v52 }
 0x4ea   :  { %4005 = vst.msk [vmem:[%s6069_s4 + $0x50] sm:$0xff] %vm779_vm0, %v3987_v44 }
 0x4eb   :  { %4006 = vst.msk [vmem:[%s6069_s4 + $0x58] sm:$0xff] %vm779_vm0, %v3988_v16 }
 0x4ec   :  { %4007 = vst.msk [vmem:[%s6069_s4 + $0x60] sm:$0xff] %vm779_vm0, %v3989_v40 }
 0x4ed   :  { %4008 = vst.msk [vmem:[%s6069_s4 + $0x68] sm:$0xff] %vm779_vm0, %v3990_v17 }
 0x4ee   :  { %4009 = vst.msk [vmem:[%s6069_s4 + $0x70] sm:$0xff] %vm779_vm0, %v3991_v38 }
 0x4ef   :  { %4010 = vst.msk [vmem:[%s6069_s4 + $0x78] sm:$0xff] %vm779_vm0, %v3992_v53 }
 0x4f0   :  { %4011 = vst.msk [vmem:[%s6069_s4 + $0x80] sm:$0xff] %vm779_vm0, %v3993_v15 }
 0x4f1   :  { %4012 = vst.msk [vmem:[%s6069_s4 + $0x88] sm:$0xff] %vm779_vm0, %v3994_v25 }

</bundles_post_ra>
